<compile_context>
chip_gen: v7x
topology: tpu7x:2x2x1
jax: 0.10.0
libtpu: 0.0.40
codegen_flags: <defaults>
</compile_context>

<pallas_src>
import numpy as np
import jax
import jax.numpy as jnp
from jax.experimental import pallas as pl
from jax.experimental.pallas import tpu as pltpu

NDF = 16                 # feature maps (module default 64; kept small here)
BATCH = 2
IMG = 28
LRELU_SLOPE = 0.2
BN_EPS = 1e-5
BKW = 256                # per-H-tap lane block width (multiple of 128)

# Per-image row strides of the activation buffers (multiples of 8 so every
# per-image block starts sublane-aligned).
_RS0, _RS1, _RS2, _RS3 = 32, 16, 8, 8


def _lrelu(x):
    return jnp.where(x >= 0, x, LRELU_SLOPE * x)


# --------------------------- the fused Pallas kernel --------------------------

def _fused_discriminator_kernel(
        x_ref,                                      # (BATCH*_RS0, 28) f32 image
        b1_ref, s1_ref,                             # layer-1 banded W, selectors
        b2_ref, s2_ref, g2_ref, be2_ref, gm2_ref,   # layer-2 (+BN affine/gather)
        b3_ref, s3_ref, g3_ref, be3_ref, gm3_ref,   # layer-3
        w4_ref,                                     # layer-4 taps, row-tiled
        o_ref,                                      # (1, BATCH) probabilities
        a1_ref, a2_ref, a3_ref):                    # VMEM activation scratch

    def conv(x_f32, b_ref, sel_ref, k, out_rows):
        """Batched strided conv.  Stage A: one bf16 MXU matmul contracting the
        W-taps + input channels for the WHOLE batch (weights laid out banded,
        1024 lanes = k H-tap blocks of BKW).  Stage B: k block-diagonal 0/1
        selector matmuls realize the stride-2 H-tap reduction (incl. H
        zero-padding) directly in the strided per-image row layout.
        Returns (out_rows, BKW) f32 raw conv outputs, lanes = (out col j, d)."""
        u = jnp.dot(x_f32.astype(jnp.bfloat16), b_ref[...],
                    preferred_element_type=jnp.float32)      # (in_rows, k*BKW)
        y = jnp.zeros((out_rows, BKW), jnp.float32)
        for ky in range(k):
            y = y + jnp.dot(sel_ref[ky], u[:, ky * BKW:(ky + 1) * BKW],
                            preferred_element_type=jnp.float32)
        return y

    def bn_scale_shift(y, gm_ref, gamma_ref, beta_ref, m_count):
        # One-pass batch statistics (sum, sum-of-squares) over the whole
        # batched block; padding rows are exactly zero (zero selector rows),
        # padding lanes are dropped by the zero rows of the gather matrix, so
        # the effective count is exactly N*OH*OW.
        cout = gamma_ref.shape[1]
        s1 = jnp.dot(jnp.sum(y, axis=0, keepdims=True), gm_ref[...],
                     preferred_element_type=jnp.float32)
        s2 = jnp.dot(jnp.sum(y * y, axis=0, keepdims=True), gm_ref[...],
                     preferred_element_type=jnp.float32)
        mean = s1 / m_count
        var = s2 / m_count - mean * mean             # biased batch variance
        scale = gamma_ref[...] * jax.lax.rsqrt(var + BN_EPS)
        shift = beta_ref[...] - mean * scale
        reps = BKW // cout                           # lane-tile to BKW width
        return (jnp.concatenate([scale] * reps, axis=1),
                jnp.concatenate([shift] * reps, axis=1))

    # ---- layer 1: Conv(1 -> ndf, k4 s2 p1) + LeakyReLU ----------------------
    y = conv(x_ref[...], b1_ref, s1_ref, k=4, out_rows=BATCH * _RS1)
    a1_ref[...] = _lrelu(y)                          # single full-block store

    # ---- layer 2: Conv(ndf -> 2ndf, k4 s2 p1) + BatchNorm + LeakyReLU -------
    y = conv(a1_ref[...], b2_ref, s2_ref, k=4, out_rows=BATCH * _RS2)
    sc, sh = bn_scale_shift(y, gm2_ref, g2_ref, be2_ref, float(BATCH * 7 * 7))
    a2_ref[...] = _lrelu(y * sc + sh)

    # ---- layer 3: Conv(2ndf -> 4ndf, k4 s2 p1) + BatchNorm + LeakyReLU ------
    y = conv(a2_ref[...], b3_ref, s3_ref, k=4, out_rows=BATCH * _RS3)
    sc, sh = bn_scale_shift(y, gm3_ref, g3_ref, be3_ref, float(BATCH * 3 * 3))
    a3_ref[...] = _lrelu(y * sc + sh)

    # ---- layer 4: Conv(4ndf -> 1, k3 s1 p0) + Sigmoid -----------------------
    # w4_ref is pre-tiled to the strided batched row layout with zeros in the
    # padding rows/lanes, so one elementwise multiply covers the whole batch.
    p = a3_ref[...] * w4_ref[...]                    # (BATCH*_RS3, BKW) f32
    outs = []
    for n in range(BATCH):
        pn = p[n * _RS3:n * _RS3 + 3, :]
        logit = jnp.sum(jnp.sum(pn, axis=1, keepdims=True),
                        axis=0, keepdims=True)       # (1, 1)
        # exact sigmoid (exp on the EUP + exact divide); only BATCH values.
        outs.append(1.0 / (1.0 + jnp.exp(-logit)))
    o_ref[...] = jnp.concatenate(outs, axis=1)


# --------------- weight-only preprocessing (no activation data) --------------

def _banded_weight(w_oihw, w_in, ow, stride, pad, row_pad):
    """(Cout,Cin,k,k) conv weight -> (row_pad, k*BKW) banded matrix:
    rows = (input col w, cin) [zero-padded to row_pad], cols = (H-tap ky,
    out col j, cout); entry = W[d, c, ky, kx] iff w + pad == stride*j + kx
    (zero otherwise, implementing the W zero-padding of the conv)."""
    cout, cin, k, _ = w_oihw.shape
    w_i = np.arange(w_in)[:, None, None]
    j_i = np.arange(ow)[None, :, None]
    kx_i = np.arange(k)[None, None, :]
    onehot = jnp.asarray((w_i + pad == stride * j_i + kx_i).astype(np.float32))
    b = jnp.einsum('wjx,dcyx->wcyjd', onehot, w_oihw.astype(jnp.float32))
    b = b.reshape(w_in * cin, k, ow * cout)
    b = jnp.pad(b, ((0, 0), (0, 0), (0, BKW - ow * cout)))
    b = b.reshape(w_in * cin, k * BKW)
    b = jnp.pad(b, ((0, row_pad - w_in * cin), (0, 0)))
    return b.astype(jnp.bfloat16)


def _selector(oh, h_in, rs_out, rs_in, stride, k, pad):
    """Block-diagonal 0/1 matrices (k, BATCH*rs_out, BATCH*rs_in):
    sel[ky, n*rs_out+i, n*rs_in+r] = 1 iff r + pad == stride*i + ky and
    0 <= r < h_in (zero-padding along H and image-block isolation)."""
    s = np.zeros((k, BATCH * rs_out, BATCH * rs_in), np.float32)
    for ky in range(k):
        for n in range(BATCH):
            for i in range(oh):
                r = stride * i + ky - pad
                if 0 <= r < h_in:
                    s[ky, n * rs_out + i, n * rs_in + r] = 1.0
    return jnp.asarray(s)


def _channel_gather(ow, c):
    """(BKW, c) 0/1 matrix summing the ow output-column copies of a channel."""
    g = np.zeros((BKW, c), np.float32)
    for j in range(ow):
        g[j * c:(j + 1) * c, :] = np.eye(c, dtype=np.float32)
    return jnp.asarray(g)


# --------------------------------- forward -----------------------------------

@jax.jit
def discriminator_forward(img_nchw, params):
    n = img_nchw.shape[0]
    assert n == BATCH
    # image -> rows=(n, h) with per-image stride _RS0, lanes=w (Cin=1).
    x = img_nchw.reshape(n, IMG, IMG).astype(jnp.float32)
    x = jnp.pad(x, ((0, 0), (0, _RS0 - IMG), (0, 0))).reshape(n * _RS0, IMG)

    # weight-only preprocessing (independent of activations; folded by jit /
    # hoisted out of the per-step path in a real training loop).
    b1 = _banded_weight(params["w1"], IMG, 14, 2, 1, IMG)   # (28, 1024)
    b2 = _banded_weight(params["w2"], 14, 7, 2, 1, BKW)     # (256, 1024)
    b3 = _banded_weight(params["w3"], 7, 3, 2, 1, BKW)      # (256, 1024)
    s1 = _selector(14, IMG, _RS1, _RS0, 2, 4, 1)            # (4, 32, 64)
    s2 = _selector(7, 14, _RS2, _RS1, 2, 4, 1)              # (4, 16, 32)
    s3 = _selector(3, 7, _RS3, _RS2, 2, 4, 1)               # (4, 16, 16)
    gm2 = _channel_gather(7, 2 * NDF)                       # (256, 32)
    gm3 = _channel_gather(3, 4 * NDF)                       # (256, 64)

    # layer-4 taps, tiled to the strided batched row layout of a3 (zeros at
    # padding rows / lanes so garbage there is annihilated).
    w4row = jnp.transpose(params["w4"][0], (1, 2, 0)).reshape(3, 3 * 4 * NDF)
    w4row = jnp.pad(w4row.astype(jnp.float32), ((0, 0), (0, BKW - 3 * 4 * NDF)))
    w4t = jnp.zeros((BATCH * _RS3, BKW), jnp.float32)
    for m in range(BATCH):
        w4t = w4t.at[m * _RS3:m * _RS3 + 3, :].set(w4row)

    args = (x,
            b1, s1,
            b2, s2, params["g2"][None, :], params["b2"][None, :], gm2,
            b3, s3, params["g3"][None, :], params["b3"][None, :], gm3,
            w4t)

    out = pl.pallas_call(
        _fused_discriminator_kernel,
        out_shape=jax.ShapeDtypeStruct((1, BATCH), jnp.float32),
        in_specs=[pl.BlockSpec(memory_space=pltpu.MemorySpace.VMEM)] * len(args),
        out_specs=pl.BlockSpec(memory_space=pltpu.MemorySpace.VMEM),
        scratch_shapes=[
            pltpu.VMEM((BATCH * _RS1, BKW), jnp.float32),   # act1 14x14x16
            pltpu.VMEM((BATCH * _RS2, BKW), jnp.float32),   # act2 7x7x32
            pltpu.VMEM((BATCH * _RS3, BKW), jnp.float32),   # act3 3x3x64
        ],
        # No grid: the whole net is a few MFLOPs and fits VMEM many times over.
        # TODO(synk): at real DCGAN sizes (ndf=64, large batch) tile the batched
        # row dimension with a ("parallel",) grid axis and switch BatchNorm to
        # a cross-tile accumulated two-pass scheme.
    )(*args)
    return out.reshape(n)
    # TODO(synk): BatchNorm running-stat updates (training side effect) are not
    # reproduced; they do not affect the returned forward value.


# ---------------- pure-JAX reference (for correctness check) ------------------

def _ref_forward(img_nchw, params):
    x = jnp.transpose(img_nchw, (0, 2, 3, 1)).astype(jnp.float32)

    def conv(h, w_oihw, stride, pad):
        w = jnp.transpose(w_oihw, (2, 3, 1, 0))
        return jax.lax.conv_general_dilated(
            h, w, (stride, stride), [(pad, pad), (pad, pad)],
            dimension_numbers=("NHWC", "HWIO", "NHWC"))

    def bn(h, g, b):
        m = jnp.mean(h, axis=(0, 1, 2), keepdims=True)
        v = jnp.mean(jnp.square(h - m), axis=(0, 1, 2), keepdims=True)
        return (h - m) * jax.lax.rsqrt(v + BN_EPS) * g + b

    lrelu = lambda h: jnp.where(h >= 0, h, LRELU_SLOPE * h)

    x = lrelu(conv(x, params["w1"], 2, 1))
    x = lrelu(bn(conv(x, params["w2"], 2, 1), params["g2"], params["b2"]))
    x = lrelu(bn(conv(x, params["w3"], 2, 1), params["g3"], params["b3"]))
    x = jax.nn.sigmoid(conv(x, params["w4"], 1, 0))
    return x.reshape(img_nchw.shape[0])


if __name__ == "__main__":
    key = jax.random.PRNGKey(0)
    k_img, k1, k2, k3, k4, kg2, kg3 = jax.random.split(key, 7)
    params = {
        "w1": 0.02 * jax.random.normal(k1, (NDF, 1, 4, 4), jnp.float32),
        "w2": 0.02 * jax.random.normal(k2, (2 * NDF, NDF, 4, 4), jnp.float32),
        "w3": 0.02 * jax.random.normal(k3, (4 * NDF, 2 * NDF, 4, 4), jnp.float32),
        "w4": 0.02 * jax.random.normal(k4, (1, 4 * NDF, 3, 3), jnp.float32),
        "g2": 1.0 + 0.02 * jax.random.normal(kg2, (2 * NDF,), jnp.float32),
        "b2": jnp.zeros((2 * NDF,), jnp.float32),
        "g3": 1.0 + 0.02 * jax.random.normal(kg3, (4 * NDF,), jnp.float32),
        "b3": jnp.zeros((4 * NDF,), jnp.float32),
    }
    img = jax.random.normal(k_img, (BATCH, 1, 28, 28), jnp.float32)

    out = jax.block_until_ready(discriminator_forward(img, params))
    ref = jax.block_until_ready(_ref_forward(img, params))

    assert out.shape == (BATCH,), out.shape
    assert bool(jnp.all(jnp.isfinite(out)))
    assert bool(jnp.allclose(out, ref, atol=5e-3, rtol=5e-3)), (out, ref)
    print("KERNEL_OK")
</pallas_src>

<mosaic_0001>
module attributes {stable_mosaic.version = 11 : i64} {
  func.func @_fused_discriminator_kernel(%arg0: memref<64x28xf32, #tpu.memory_space<vmem>>, %arg1: memref<28x1024xbf16, #tpu.memory_space<vmem>>, %arg2: memref<4x32x64xf32, #tpu.memory_space<vmem>>, %arg3: memref<256x1024xbf16, #tpu.memory_space<vmem>>, %arg4: memref<4x16x32xf32, #tpu.memory_space<vmem>>, %arg5: memref<1x32xf32, #tpu.memory_space<vmem>>, %arg6: memref<1x32xf32, #tpu.memory_space<vmem>>, %arg7: memref<256x32xf32, #tpu.memory_space<vmem>>, %arg8: memref<256x1024xbf16, #tpu.memory_space<vmem>>, %arg9: memref<4x16x16xf32, #tpu.memory_space<vmem>>, %arg10: memref<1x64xf32, #tpu.memory_space<vmem>>, %arg11: memref<1x64xf32, #tpu.memory_space<vmem>>, %arg12: memref<256x64xf32, #tpu.memory_space<vmem>>, %arg13: memref<16x256xf32, #tpu.memory_space<vmem>>, %arg14: memref<1x2xf32, #tpu.memory_space<vmem>>, %arg15: memref<32x256xf32, #tpu.memory_space<vmem>>, %arg16: memref<16x256xf32, #tpu.memory_space<vmem>>, %arg17: memref<16x256xf32, #tpu.memory_space<vmem>>) attributes {dimension_semantics = [], scalar_prefetch = 0 : i64, scratch_operands = 3 : i64, tpu.core_type = #tpu.core_type<tc>} {
    %c0 = arith.constant 0 : index
    %c0_0 = arith.constant 0 : index
    %0 = vector.load %arg0[%c0, %c0_0] : memref<64x28xf32, #tpu.memory_space<vmem>>, vector<64x28xf32>
    %1 = arith.truncf %0 : vector<64x28xf32> to vector<64x28xbf16>
    %c0_1 = arith.constant 0 : index
    %c0_2 = arith.constant 0 : index
    %2 = vector.load %arg1[%c0_1, %c0_2] : memref<28x1024xbf16, #tpu.memory_space<vmem>>, vector<28x1024xbf16>
    %cst = arith.constant dense<0.000000e+00> : vector<64x1024xf32>
    %3 = tpu.matmul %1, %2, %cst {dimension_numbers = #tpu.dot_dimension_numbers<[1], [0], [0], [1], [0, 0, 1, 1], [], []>} : vector<64x28xbf16>, vector<28x1024xbf16>, vector<64x1024xf32> -> vector<64x1024xf32>
    %cst_3 = arith.constant 0.000000e+00 : f32
    %4 = vector.broadcast %cst_3 : f32 to vector<32x256xf32>
    %c0_4 = arith.constant 0 : index
    %c0_5 = arith.constant 0 : index
    %c0_6 = arith.constant 0 : index
    %5 = vector.load %arg2[%c0_4, %c0_5, %c0_6] : memref<4x32x64xf32, #tpu.memory_space<vmem>>, vector<1x32x64xf32>
    %6 = vector.shape_cast %5 : vector<1x32x64xf32> to vector<32x64xf32>
    %7 = vector.extract_strided_slice %3 {offsets = [0, 0], sizes = [64, 256], strides = [1, 1]} : vector<64x1024xf32> to vector<64x256xf32>
    %cst_7 = arith.constant dense<0.000000e+00> : vector<32x256xf32>
    %8 = tpu.matmul %6, %7, %cst_7 {dimension_numbers = #tpu.dot_dimension_numbers<[1], [0], [0], [1], [0, 0, 1, 1], [], []>} : vector<32x64xf32>, vector<64x256xf32>, vector<32x256xf32> -> vector<32x256xf32>
    %9 = arith.addf %4, %8 : vector<32x256xf32>
    %c1 = arith.constant 1 : index
    %c0_8 = arith.constant 0 : index
    %c0_9 = arith.constant 0 : index
    %10 = vector.load %arg2[%c1, %c0_8, %c0_9] : memref<4x32x64xf32, #tpu.memory_space<vmem>>, vector<1x32x64xf32>
    %11 = vector.shape_cast %10 : vector<1x32x64xf32> to vector<32x64xf32>
    %12 = vector.extract_strided_slice %3 {offsets = [0, 256], sizes = [64, 256], strides = [1, 1]} : vector<64x1024xf32> to vector<64x256xf32>
    %cst_10 = arith.constant dense<0.000000e+00> : vector<32x256xf32>
    %13 = tpu.matmul %11, %12, %cst_10 {dimension_numbers = #tpu.dot_dimension_numbers<[1], [0], [0], [1], [0, 0, 1, 1], [], []>} : vector<32x64xf32>, vector<64x256xf32>, vector<32x256xf32> -> vector<32x256xf32>
    %14 = arith.addf %9, %13 : vector<32x256xf32>
    %c2 = arith.constant 2 : index
    %c0_11 = arith.constant 0 : index
    %c0_12 = arith.constant 0 : index
    %15 = vector.load %arg2[%c2, %c0_11, %c0_12] : memref<4x32x64xf32, #tpu.memory_space<vmem>>, vector<1x32x64xf32>
    %16 = vector.shape_cast %15 : vector<1x32x64xf32> to vector<32x64xf32>
    %17 = vector.extract_strided_slice %3 {offsets = [0, 512], sizes = [64, 256], strides = [1, 1]} : vector<64x1024xf32> to vector<64x256xf32>
    %cst_13 = arith.constant dense<0.000000e+00> : vector<32x256xf32>
    %18 = tpu.matmul %16, %17, %cst_13 {dimension_numbers = #tpu.dot_dimension_numbers<[1], [0], [0], [1], [0, 0, 1, 1], [], []>} : vector<32x64xf32>, vector<64x256xf32>, vector<32x256xf32> -> vector<32x256xf32>
    %19 = arith.addf %14, %18 : vector<32x256xf32>
    %c3 = arith.constant 3 : index
    %c0_14 = arith.constant 0 : index
    %c0_15 = arith.constant 0 : index
    %20 = vector.load %arg2[%c3, %c0_14, %c0_15] : memref<4x32x64xf32, #tpu.memory_space<vmem>>, vector<1x32x64xf32>
    %21 = vector.shape_cast %20 : vector<1x32x64xf32> to vector<32x64xf32>
    %22 = vector.extract_strided_slice %3 {offsets = [0, 768], sizes = [64, 256], strides = [1, 1]} : vector<64x1024xf32> to vector<64x256xf32>
    %cst_16 = arith.constant dense<0.000000e+00> : vector<32x256xf32>
    %23 = tpu.matmul %21, %22, %cst_16 {dimension_numbers = #tpu.dot_dimension_numbers<[1], [0], [0], [1], [0, 0, 1, 1], [], []>} : vector<32x64xf32>, vector<64x256xf32>, vector<32x256xf32> -> vector<32x256xf32>
    %24 = arith.addf %19, %23 : vector<32x256xf32>
    %cst_17 = arith.constant 0.000000e+00 : f32
    %25 = vector.broadcast %cst_17 : f32 to vector<32x256xf32>
    %26 = arith.cmpf oge, %24, %25 : vector<32x256xf32>
    %cst_18 = arith.constant 2.000000e-01 : f32
    %27 = vector.broadcast %cst_18 : f32 to vector<32x256xf32>
    %28 = arith.mulf %27, %24 : vector<32x256xf32>
    %29 = arith.select %26, %24, %28 : vector<32x256xi1>, vector<32x256xf32>
    %c0_19 = arith.constant 0 : index
    %c0_20 = arith.constant 0 : index
    %30 = vector.load %arg15[%c0_19, %c0_20] : memref<32x256xf32, #tpu.memory_space<vmem>>, vector<32x256xf32>
    tpu.vector_store %arg15[%c0_19, %c0_20], %29 {strides = array<i32>} : memref<32x256xf32, #tpu.memory_space<vmem>>, vector<32x256xf32>,
    %c0_21 = arith.constant 0 : index
    %c0_22 = arith.constant 0 : index
    %31 = vector.load %arg15[%c0_21, %c0_22] : memref<32x256xf32, #tpu.memory_space<vmem>>, vector<32x256xf32>
    %32 = arith.truncf %31 : vector<32x256xf32> to vector<32x256xbf16>
    %c0_23 = arith.constant 0 : index
    %c0_24 = arith.constant 0 : index
    %33 = vector.load %arg3[%c0_23, %c0_24] : memref<256x1024xbf16, #tpu.memory_space<vmem>>, vector<256x1024xbf16>
    %cst_25 = arith.constant dense<0.000000e+00> : vector<32x1024xf32>
    %34 = tpu.matmul %32, %33, %cst_25 {dimension_numbers = #tpu.dot_dimension_numbers<[1], [0], [0], [1], [0, 0, 1, 1], [], []>} : vector<32x256xbf16>, vector<256x1024xbf16>, vector<32x1024xf32> -> vector<32x1024xf32>
    %cst_26 = arith.constant 0.000000e+00 : f32
    %35 = vector.broadcast %cst_26 : f32 to vector<16x256xf32>
    %c0_27 = arith.constant 0 : index
    %c0_28 = arith.constant 0 : index
    %c0_29 = arith.constant 0 : index
    %36 = vector.load %arg4[%c0_27, %c0_28, %c0_29] : memref<4x16x32xf32, #tpu.memory_space<vmem>>, vector<1x16x32xf32>
    %37 = vector.shape_cast %36 : vector<1x16x32xf32> to vector<16x32xf32>
    %38 = vector.extract_strided_slice %34 {offsets = [0, 0], sizes = [32, 256], strides = [1, 1]} : vector<32x1024xf32> to vector<32x256xf32>
    %cst_30 = arith.constant dense<0.000000e+00> : vector<16x256xf32>
    %39 = tpu.matmul %37, %38, %cst_30 {dimension_numbers = #tpu.dot_dimension_numbers<[1], [0], [0], [1], [0, 0, 1, 1], [], []>} : vector<16x32xf32>, vector<32x256xf32>, vector<16x256xf32> -> vector<16x256xf32>
    %40 = arith.addf %35, %39 : vector<16x256xf32>
    %c1_31 = arith.constant 1 : index
    %c0_32 = arith.constant 0 : index
    %c0_33 = arith.constant 0 : index
    %41 = vector.load %arg4[%c1_31, %c0_32, %c0_33] : memref<4x16x32xf32, #tpu.memory_space<vmem>>, vector<1x16x32xf32>
    %42 = vector.shape_cast %41 : vector<1x16x32xf32> to vector<16x32xf32>
    %43 = vector.extract_strided_slice %34 {offsets = [0, 256], sizes = [32, 256], strides = [1, 1]} : vector<32x1024xf32> to vector<32x256xf32>
    %cst_34 = arith.constant dense<0.000000e+00> : vector<16x256xf32>
    %44 = tpu.matmul %42, %43, %cst_34 {dimension_numbers = #tpu.dot_dimension_numbers<[1], [0], [0], [1], [0, 0, 1, 1], [], []>} : vector<16x32xf32>, vector<32x256xf32>, vector<16x256xf32> -> vector<16x256xf32>
    %45 = arith.addf %40, %44 : vector<16x256xf32>
    %c2_35 = arith.constant 2 : index
    %c0_36 = arith.constant 0 : index
    %c0_37 = arith.constant 0 : index
    %46 = vector.load %arg4[%c2_35, %c0_36, %c0_37] : memref<4x16x32xf32, #tpu.memory_space<vmem>>, vector<1x16x32xf32>
    %47 = vector.shape_cast %46 : vector<1x16x32xf32> to vector<16x32xf32>
    %48 = vector.extract_strided_slice %34 {offsets = [0, 512], sizes = [32, 256], strides = [1, 1]} : vector<32x1024xf32> to vector<32x256xf32>
    %cst_38 = arith.constant dense<0.000000e+00> : vector<16x256xf32>
    %49 = tpu.matmul %47, %48, %cst_38 {dimension_numbers = #tpu.dot_dimension_numbers<[1], [0], [0], [1], [0, 0, 1, 1], [], []>} : vector<16x32xf32>, vector<32x256xf32>, vector<16x256xf32> -> vector<16x256xf32>
    %50 = arith.addf %45, %49 : vector<16x256xf32>
    %c3_39 = arith.constant 3 : index
    %c0_40 = arith.constant 0 : index
    %c0_41 = arith.constant 0 : index
    %51 = vector.load %arg4[%c3_39, %c0_40, %c0_41] : memref<4x16x32xf32, #tpu.memory_space<vmem>>, vector<1x16x32xf32>
    %52 = vector.shape_cast %51 : vector<1x16x32xf32> to vector<16x32xf32>
    %53 = vector.extract_strided_slice %34 {offsets = [0, 768], sizes = [32, 256], strides = [1, 1]} : vector<32x1024xf32> to vector<32x256xf32>
    %cst_42 = arith.constant dense<0.000000e+00> : vector<16x256xf32>
    %54 = tpu.matmul %52, %53, %cst_42 {dimension_numbers = #tpu.dot_dimension_numbers<[1], [0], [0], [1], [0, 0, 1, 1], [], []>} : vector<16x32xf32>, vector<32x256xf32>, vector<16x256xf32> -> vector<16x256xf32>
    %55 = arith.addf %50, %54 : vector<16x256xf32>
    %cst_43 = arith.constant dense<0.000000e+00> : vector<256xf32>
    %56 = vector.multi_reduction <add>, %55, %cst_43 [0] : vector<16x256xf32> to vector<256xf32>
    %57 = vector.shape_cast %56 : vector<256xf32> to vector<1x256xf32>
    %c0_44 = arith.constant 0 : index
    %c0_45 = arith.constant 0 : index
    %58 = vector.load %arg7[%c0_44, %c0_45] : memref<256x32xf32, #tpu.memory_space<vmem>>, vector<256x32xf32>
    %cst_46 = arith.constant dense<0.000000e+00> : vector<1x32xf32>
    %59 = tpu.matmul %57, %58, %cst_46 {dimension_numbers = #tpu.dot_dimension_numbers<[1], [0], [0], [1], [0, 0, 1, 1], [], []>} : vector<1x256xf32>, vector<256x32xf32>, vector<1x32xf32> -> vector<1x32xf32>
    %60 = arith.mulf %55, %55 : vector<16x256xf32>
    %cst_47 = arith.constant dense<0.000000e+00> : vector<256xf32>
    %61 = vector.multi_reduction <add>, %60, %cst_47 [0] : vector<16x256xf32> to vector<256xf32>
    %62 = vector.shape_cast %61 : vector<256xf32> to vector<1x256xf32>
    %c0_48 = arith.constant 0 : index
    %c0_49 = arith.constant 0 : index
    %63 = vector.load %arg7[%c0_48, %c0_49] : memref<256x32xf32, #tpu.memory_space<vmem>>, vector<256x32xf32>
    %cst_50 = arith.constant dense<0.000000e+00> : vector<1x32xf32>
    %64 = tpu.matmul %62, %63, %cst_50 {dimension_numbers = #tpu.dot_dimension_numbers<[1], [0], [0], [1], [0, 0, 1, 1], [], []>} : vector<1x256xf32>, vector<256x32xf32>, vector<1x32xf32> -> vector<1x32xf32>
    %cst_51 = arith.constant 9.800000e+01 : f32
    %65 = vector.broadcast %cst_51 : f32 to vector<1x32xf32>
    %66 = arith.divf %59, %65 : vector<1x32xf32>
    %cst_52 = arith.constant 9.800000e+01 : f32
    %67 = vector.broadcast %cst_52 : f32 to vector<1x32xf32>
    %68 = arith.divf %64, %67 : vector<1x32xf32>
    %69 = arith.mulf %66, %66 : vector<1x32xf32>
    %70 = arith.subf %68, %69 : vector<1x32xf32>
    %c0_53 = arith.constant 0 : index
    %c0_54 = arith.constant 0 : index
    %71 = vector.load %arg5[%c0_53, %c0_54] : memref<1x32xf32, #tpu.memory_space<vmem>>, vector<1x32xf32>
    %cst_55 = arith.constant 9.99999974E-6 : f32
    %72 = vector.broadcast %cst_55 : f32 to vector<1x32xf32>
    %73 = arith.addf %70, %72 : vector<1x32xf32>
    %74 = math.rsqrt %73 : vector<1x32xf32>
    %75 = arith.mulf %71, %74 : vector<1x32xf32>
    %c0_56 = arith.constant 0 : index
    %c0_57 = arith.constant 0 : index
    %76 = vector.load %arg6[%c0_56, %c0_57] : memref<1x32xf32, #tpu.memory_space<vmem>>, vector<1x32xf32>
    %77 = arith.mulf %66, %75 : vector<1x32xf32>
    %78 = arith.subf %76, %77 : vector<1x32xf32>
    %79 = tpu.concatenate %75, %75, %75, %75, %75, %75, %75, %75 in 1 : vector<1x32xf32>, vector<1x32xf32>, vector<1x32xf32>, vector<1x32xf32>, vector<1x32xf32>, vector<1x32xf32>, vector<1x32xf32>, vector<1x32xf32> -> vector<1x256xf32>
    %80 = tpu.concatenate %78, %78, %78, %78, %78, %78, %78, %78 in 1 : vector<1x32xf32>, vector<1x32xf32>, vector<1x32xf32>, vector<1x32xf32>, vector<1x32xf32>, vector<1x32xf32>, vector<1x32xf32>, vector<1x32xf32> -> vector<1x256xf32>
    %81 = vector.broadcast %79 : vector<1x256xf32> to vector<16x256xf32>
    %82 = arith.mulf %55, %81 : vector<16x256xf32>
    %83 = vector.broadcast %80 : vector<1x256xf32> to vector<16x256xf32>
    %84 = arith.addf %82, %83 : vector<16x256xf32>
    %cst_58 = arith.constant 0.000000e+00 : f32
    %85 = vector.broadcast %cst_58 : f32 to vector<16x256xf32>
    %86 = arith.cmpf oge, %84, %85 : vector<16x256xf32>
    %cst_59 = arith.constant 2.000000e-01 : f32
    %87 = vector.broadcast %cst_59 : f32 to vector<16x256xf32>
    %88 = arith.mulf %87, %84 : vector<16x256xf32>
    %89 = arith.select %86, %84, %88 : vector<16x256xi1>, vector<16x256xf32>
    %c0_60 = arith.constant 0 : index
    %c0_61 = arith.constant 0 : index
    %90 = vector.load %arg16[%c0_60, %c0_61] : memref<16x256xf32, #tpu.memory_space<vmem>>, vector<16x256xf32>
    tpu.vector_store %arg16[%c0_60, %c0_61], %89 {strides = array<i32>} : memref<16x256xf32, #tpu.memory_space<vmem>>, vector<16x256xf32>,
    %c0_62 = arith.constant 0 : index
    %c0_63 = arith.constant 0 : index
    %91 = vector.load %arg16[%c0_62, %c0_63] : memref<16x256xf32, #tpu.memory_space<vmem>>, vector<16x256xf32>
    %92 = arith.truncf %91 : vector<16x256xf32> to vector<16x256xbf16>
    %c0_64 = arith.constant 0 : index
    %c0_65 = arith.constant 0 : index
    %93 = vector.load %arg8[%c0_64, %c0_65] : memref<256x1024xbf16, #tpu.memory_space<vmem>>, vector<256x1024xbf16>
    %cst_66 = arith.constant dense<0.000000e+00> : vector<16x1024xf32>
    %94 = tpu.matmul %92, %93, %cst_66 {dimension_numbers = #tpu.dot_dimension_numbers<[1], [0], [0], [1], [0, 0, 1, 1], [], []>} : vector<16x256xbf16>, vector<256x1024xbf16>, vector<16x1024xf32> -> vector<16x1024xf32>
    %cst_67 = arith.constant 0.000000e+00 : f32
    %95 = vector.broadcast %cst_67 : f32 to vector<16x256xf32>
    %c0_68 = arith.constant 0 : index
    %c0_69 = arith.constant 0 : index
    %c0_70 = arith.constant 0 : index
    %96 = vector.load %arg9[%c0_68, %c0_69, %c0_70] : memref<4x16x16xf32, #tpu.memory_space<vmem>>, vector<1x16x16xf32>
    %97 = vector.shape_cast %96 : vector<1x16x16xf32> to vector<16x16xf32>
    %98 = vector.extract_strided_slice %94 {offsets = [0, 0], sizes = [16, 256], strides = [1, 1]} : vector<16x1024xf32> to vector<16x256xf32>
    %cst_71 = arith.constant dense<0.000000e+00> : vector<16x256xf32>
    %99 = tpu.matmul %97, %98, %cst_71 {dimension_numbers = #tpu.dot_dimension_numbers<[1], [0], [0], [1], [0, 0, 1, 1], [], []>} : vector<16x16xf32>, vector<16x256xf32>, vector<16x256xf32> -> vector<16x256xf32>
    %100 = arith.addf %95, %99 : vector<16x256xf32>
    %c1_72 = arith.constant 1 : index
    %c0_73 = arith.constant 0 : index
    %c0_74 = arith.constant 0 : index
    %101 = vector.load %arg9[%c1_72, %c0_73, %c0_74] : memref<4x16x16xf32, #tpu.memory_space<vmem>>, vector<1x16x16xf32>
    %102 = vector.shape_cast %101 : vector<1x16x16xf32> to vector<16x16xf32>
    %103 = vector.extract_strided_slice %94 {offsets = [0, 256], sizes = [16, 256], strides = [1, 1]} : vector<16x1024xf32> to vector<16x256xf32>
    %cst_75 = arith.constant dense<0.000000e+00> : vector<16x256xf32>
    %104 = tpu.matmul %102, %103, %cst_75 {dimension_numbers = #tpu.dot_dimension_numbers<[1], [0], [0], [1], [0, 0, 1, 1], [], []>} : vector<16x16xf32>, vector<16x256xf32>, vector<16x256xf32> -> vector<16x256xf32>
    %105 = arith.addf %100, %104 : vector<16x256xf32>
    %c2_76 = arith.constant 2 : index
    %c0_77 = arith.constant 0 : index
    %c0_78 = arith.constant 0 : index
    %106 = vector.load %arg9[%c2_76, %c0_77, %c0_78] : memref<4x16x16xf32, #tpu.memory_space<vmem>>, vector<1x16x16xf32>
    %107 = vector.shape_cast %106 : vector<1x16x16xf32> to vector<16x16xf32>
    %108 = vector.extract_strided_slice %94 {offsets = [0, 512], sizes = [16, 256], strides = [1, 1]} : vector<16x1024xf32> to vector<16x256xf32>
    %cst_79 = arith.constant dense<0.000000e+00> : vector<16x256xf32>
    %109 = tpu.matmul %107, %108, %cst_79 {dimension_numbers = #tpu.dot_dimension_numbers<[1], [0], [0], [1], [0, 0, 1, 1], [], []>} : vector<16x16xf32>, vector<16x256xf32>, vector<16x256xf32> -> vector<16x256xf32>
    %110 = arith.addf %105, %109 : vector<16x256xf32>
    %c3_80 = arith.constant 3 : index
    %c0_81 = arith.constant 0 : index
    %c0_82 = arith.constant 0 : index
    %111 = vector.load %arg9[%c3_80, %c0_81, %c0_82] : memref<4x16x16xf32, #tpu.memory_space<vmem>>, vector<1x16x16xf32>
    %112 = vector.shape_cast %111 : vector<1x16x16xf32> to vector<16x16xf32>
    %113 = vector.extract_strided_slice %94 {offsets = [0, 768], sizes = [16, 256], strides = [1, 1]} : vector<16x1024xf32> to vector<16x256xf32>
    %cst_83 = arith.constant dense<0.000000e+00> : vector<16x256xf32>
    %114 = tpu.matmul %112, %113, %cst_83 {dimension_numbers = #tpu.dot_dimension_numbers<[1], [0], [0], [1], [0, 0, 1, 1], [], []>} : vector<16x16xf32>, vector<16x256xf32>, vector<16x256xf32> -> vector<16x256xf32>
    %115 = arith.addf %110, %114 : vector<16x256xf32>
    %cst_84 = arith.constant dense<0.000000e+00> : vector<256xf32>
    %116 = vector.multi_reduction <add>, %115, %cst_84 [0] : vector<16x256xf32> to vector<256xf32>
    %117 = vector.shape_cast %116 : vector<256xf32> to vector<1x256xf32>
    %c0_85 = arith.constant 0 : index
    %c0_86 = arith.constant 0 : index
    %118 = vector.load %arg12[%c0_85, %c0_86] : memref<256x64xf32, #tpu.memory_space<vmem>>, vector<256x64xf32>
    %cst_87 = arith.constant dense<0.000000e+00> : vector<1x64xf32>
    %119 = tpu.matmul %117, %118, %cst_87 {dimension_numbers = #tpu.dot_dimension_numbers<[1], [0], [0], [1], [0, 0, 1, 1], [], []>} : vector<1x256xf32>, vector<256x64xf32>, vector<1x64xf32> -> vector<1x64xf32>
    %120 = arith.mulf %115, %115 : vector<16x256xf32>
    %cst_88 = arith.constant dense<0.000000e+00> : vector<256xf32>
    %121 = vector.multi_reduction <add>, %120, %cst_88 [0] : vector<16x256xf32> to vector<256xf32>
    %122 = vector.shape_cast %121 : vector<256xf32> to vector<1x256xf32>
    %c0_89 = arith.constant 0 : index
    %c0_90 = arith.constant 0 : index
    %123 = vector.load %arg12[%c0_89, %c0_90] : memref<256x64xf32, #tpu.memory_space<vmem>>, vector<256x64xf32>
    %cst_91 = arith.constant dense<0.000000e+00> : vector<1x64xf32>
    %124 = tpu.matmul %122, %123, %cst_91 {dimension_numbers = #tpu.dot_dimension_numbers<[1], [0], [0], [1], [0, 0, 1, 1], [], []>} : vector<1x256xf32>, vector<256x64xf32>, vector<1x64xf32> -> vector<1x64xf32>
    %cst_92 = arith.constant 1.800000e+01 : f32
    %125 = vector.broadcast %cst_92 : f32 to vector<1x64xf32>
    %126 = arith.divf %119, %125 : vector<1x64xf32>
    %cst_93 = arith.constant 1.800000e+01 : f32
    %127 = vector.broadcast %cst_93 : f32 to vector<1x64xf32>
    %128 = arith.divf %124, %127 : vector<1x64xf32>
    %129 = arith.mulf %126, %126 : vector<1x64xf32>
    %130 = arith.subf %128, %129 : vector<1x64xf32>
    %c0_94 = arith.constant 0 : index
    %c0_95 = arith.constant 0 : index
    %131 = vector.load %arg10[%c0_94, %c0_95] : memref<1x64xf32, #tpu.memory_space<vmem>>, vector<1x64xf32>
    %cst_96 = arith.constant 9.99999974E-6 : f32
    %132 = vector.broadcast %cst_96 : f32 to vector<1x64xf32>
    %133 = arith.addf %130, %132 : vector<1x64xf32>
    %134 = math.rsqrt %133 : vector<1x64xf32>
    %135 = arith.mulf %131, %134 : vector<1x64xf32>
    %c0_97 = arith.constant 0 : index
    %c0_98 = arith.constant 0 : index
    %136 = vector.load %arg11[%c0_97, %c0_98] : memref<1x64xf32, #tpu.memory_space<vmem>>, vector<1x64xf32>
    %137 = arith.mulf %126, %135 : vector<1x64xf32>
    %138 = arith.subf %136, %137 : vector<1x64xf32>
    %139 = tpu.concatenate %135, %135, %135, %135 in 1 : vector<1x64xf32>, vector<1x64xf32>, vector<1x64xf32>, vector<1x64xf32> -> vector<1x256xf32>
    %140 = tpu.concatenate %138, %138, %138, %138 in 1 : vector<1x64xf32>, vector<1x64xf32>, vector<1x64xf32>, vector<1x64xf32> -> vector<1x256xf32>
    %141 = vector.broadcast %139 : vector<1x256xf32> to vector<16x256xf32>
    %142 = arith.mulf %115, %141 : vector<16x256xf32>
    %143 = vector.broadcast %140 : vector<1x256xf32> to vector<16x256xf32>
    %144 = arith.addf %142, %143 : vector<16x256xf32>
    %cst_99 = arith.constant 0.000000e+00 : f32
    %145 = vector.broadcast %cst_99 : f32 to vector<16x256xf32>
    %146 = arith.cmpf oge, %144, %145 : vector<16x256xf32>
    %cst_100 = arith.constant 2.000000e-01 : f32
    %147 = vector.broadcast %cst_100 : f32 to vector<16x256xf32>
    %148 = arith.mulf %147, %144 : vector<16x256xf32>
    %149 = arith.select %146, %144, %148 : vector<16x256xi1>, vector<16x256xf32>
    %c0_101 = arith.constant 0 : index
    %c0_102 = arith.constant 0 : index
    %150 = vector.load %arg17[%c0_101, %c0_102] : memref<16x256xf32, #tpu.memory_space<vmem>>, vector<16x256xf32>
    tpu.vector_store %arg17[%c0_101, %c0_102], %149 {strides = array<i32>} : memref<16x256xf32, #tpu.memory_space<vmem>>, vector<16x256xf32>,
    %c0_103 = arith.constant 0 : index
    %c0_104 = arith.constant 0 : index
    %151 = vector.load %arg17[%c0_103, %c0_104] : memref<16x256xf32, #tpu.memory_space<vmem>>, vector<16x256xf32>
    %c0_105 = arith.constant 0 : index
    %c0_106 = arith.constant 0 : index
    %152 = vector.load %arg13[%c0_105, %c0_106] : memref<16x256xf32, #tpu.memory_space<vmem>>, vector<16x256xf32>
    %153 = arith.mulf %151, %152 : vector<16x256xf32>
    %154 = vector.extract_strided_slice %153 {offsets = [0, 0], sizes = [3, 256], strides = [1, 1]} : vector<16x256xf32> to vector<3x256xf32>
    %cst_107 = arith.constant dense<0.000000e+00> : vector<3xf32>
    %155 = vector.multi_reduction <add>, %154, %cst_107 [1] : vector<3x256xf32> to vector<3xf32>
    %156 = vector.shape_cast %155 : vector<3xf32> to vector<3x1xf32>
    %cst_108 = arith.constant dense<0.000000e+00> : vector<1xf32>
    %157 = vector.multi_reduction <add>, %156, %cst_108 [0] : vector<3x1xf32> to vector<1xf32>
    %158 = vector.shape_cast %157 : vector<1xf32> to vector<1x1xf32>
    %cst_109 = arith.constant 0.000000e+00 : f32
    %159 = vector.broadcast %cst_109 : f32 to vector<1x1xf32>
    %160 = arith.subf %159, %158 : vector<1x1xf32>
    %161 = math.exp %160 : vector<1x1xf32>
    %cst_110 = arith.constant 1.000000e+00 : f32
    %162 = vector.broadcast %cst_110 : f32 to vector<1x1xf32>
    %163 = arith.addf %162, %161 : vector<1x1xf32>
    %cst_111 = arith.constant 1.000000e+00 : f32
    %164 = vector.broadcast %cst_111 : f32 to vector<1x1xf32>
    %165 = arith.divf %164, %163 : vector<1x1xf32>
    %166 = vector.extract_strided_slice %153 {offsets = [8, 0], sizes = [3, 256], strides = [1, 1]} : vector<16x256xf32> to vector<3x256xf32>
    %cst_112 = arith.constant dense<0.000000e+00> : vector<3xf32>
    %167 = vector.multi_reduction <add>, %166, %cst_112 [1] : vector<3x256xf32> to vector<3xf32>
    %168 = vector.shape_cast %167 : vector<3xf32> to vector<3x1xf32>
    %cst_113 = arith.constant dense<0.000000e+00> : vector<1xf32>
    %169 = vector.multi_reduction <add>, %168, %cst_113 [0] : vector<3x1xf32> to vector<1xf32>
    %170 = vector.shape_cast %169 : vector<1xf32> to vector<1x1xf32>
    %cst_114 = arith.constant 0.000000e+00 : f32
    %171 = vector.broadcast %cst_114 : f32 to vector<1x1xf32>
    %172 = arith.subf %171, %170 : vector<1x1xf32>
    %173 = math.exp %172 : vector<1x1xf32>
    %cst_115 = arith.constant 1.000000e+00 : f32
    %174 = vector.broadcast %cst_115 : f32 to vector<1x1xf32>
    %175 = arith.addf %174, %173 : vector<1x1xf32>
    %cst_116 = arith.constant 1.000000e+00 : f32
    %176 = vector.broadcast %cst_116 : f32 to vector<1x1xf32>
    %177 = arith.divf %176, %175 : vector<1x1xf32>
    %178 = tpu.concatenate %165, %177 in 1 : vector<1x1xf32>, vector<1x1xf32> -> vector<1x2xf32>
    %c0_117 = arith.constant 0 : index
    %c0_118 = arith.constant 0 : index
    %179 = vector.load %arg14[%c0_117, %c0_118] : memref<1x2xf32, #tpu.memory_space<vmem>>, vector<1x2xf32>
    tpu.vector_store %arg14[%c0_117, %c0_118], %178 {strides = array<i32>} : memref<1x2xf32, #tpu.memory_space<vmem>>, vector<1x2xf32>,
    return
  }
}

</mosaic_0001>

<bundles_post_ra>
// kernel: discriminator_forward.1
= control target key start
LH: loop header
LB: loop body
LE: loop exit
PB: predicated region body
PF: predicated region fallthrough
CT: control target
= control target key end

     0   :  { %v5031_v6 = vmov 0   ;;  %vm162_vm0 = vcmask 1045504   ;;  %vm149_vm1 = vcmask 228352   ;;  %s6705_s0 = inlined_call_operand.vmem [shape: f32[64,28], index: 0, kind: input, shape index: {}]   ;;  %s6706_s1 = inlined_call_operand.vmem [shape: bf16[28,1024], index: 1, kind: input, shape index: {}]   ;;  %s6707_s2 = inlined_call_operand.vmem [shape: f32[4,32,64], index: 2, kind: input, shape index: {}]   ;;  %s6708_s3 = inlined_call_operand.vmem [shape: bf16[256,1024], index: 3, kind: input, shape index: {}]   ;;  %s6709_s4 = inlined_call_operand.vmem [shape: f32[4,16,32], index: 4, kind: input, shape index: {}]   ;;  %s6710_s5 = inlined_call_operand.vmem [shape: f32[1,32], index: 5, kind: input, shape index: {}]   ;;  %s6711_s6 = inlined_call_operand.vmem [shape: f32[1,32], index: 6, kind: input, shape index: {}]   ;;  %s6712_s7 = inlined_call_operand.vmem [shape: f32[256,32], index: 7, kind: input, shape index: {}]   ;;  %s6713_s8 = inlined_call_operand.vmem [shape: bf16[256,1024], index: 8, kind: input, shape index: {}]   ;;  %s6714_s9 = inlined_call_operand.vmem [shape: f32[4,16,16], index: 9, kind: input, shape index: {}]   ;;  %s6715_s10 = inlined_call_operand.vmem [shape: f32[1,64], index: 10, kind: input, shape index: {}]   ;;  %s6716_s11 = inlined_call_operand.vmem [shape: f32[1,64], index: 11, kind: input, shape index: {}]   ;;  %s6717_s12 = inlined_call_operand.vmem [shape: f32[256,64], index: 12, kind: input, shape index: {}]   ;;  %s6718_s13 = inlined_call_operand.vmem [shape: f32[16,256], index: 13, kind: input, shape index: {}]   ;;  %s6719_s14 = inlined_call_operand.hbm [shape: f32[1,2], index: 14, kind: output, shape index: {}]  }
   0x1   :  { %v61_v0 = vld [vmem:[%s6706_s1] sm:$0xff]  ;;  %249 = vmatprep.mubr.bf16.mxu1 %v5031_v6  ;;  %219 = vmatprep.mubr.bf16.mxu0 %v5031_v6  ;;  %v62_v9 = vld [vmem:[%s6706_s1 + $0x8] sm:$0xff]  ;;  %v55_v11 = vld [vmem:[%s6705_s0 + $0x30] sm:$0xff] }
   0x2   :  { %v65_v1 = vld [vmem:[%s6706_s1 + $0x20] sm:$0xff]  ;;  %v66_v10 = vld [vmem:[%s6706_s1 + $0x28] sm:$0xff]  ;;  %v56_v12 = vld [vmem:[%s6705_s0 + $0x38] sm:$0xff] }
   0x3   :  { %v69_v2 = vld [vmem:[%s6706_s1 + $0x40] sm:$0xff]  ;;  %v4210_v3 = vcombine.high %v61_v0, %v65_v1  ;;  %v4209_v4 = vcombine.low %v61_v0, %v65_v1  ;;  %v63_v13 = vld [vmem:[%s6706_s1 + $0x10] sm:$0xff]  ;;  %v4212_v15 = vcombine.high %v62_v9, %v66_v10  ;;  %v70_v16 = vld [vmem:[%s6706_s1 + $0x48] sm:$0xff]  ;;  %v5159_v22 = vpack.c.bf16 %v56_v12, %v55_v11 }
   0x4   :  { %v73_v5 = vld [vmem:[%s6706_s1 + $0x60] sm:$0x33]  ;;  %v67_v17 = vld [vmem:[%s6706_s1 + $0x30] sm:$0xff]  ;;  %v74_v18 = vld [vmem:[%s6706_s1 + $0x68] sm:$0x33]  ;;  %v4211_v23 = vcombine.low %v62_v9, %v66_v10 }
   0x5   :  { %v4218_v7 = vcombine.high %v69_v2, %v73_v5  ;;  %v4217_v8 = vcombine.low %v69_v2, %v73_v5  ;;  %4937 = vmatprep.subr.bf16.mxu1 %v4210_v3  ;;  %187 = vmatprep.subr.bf16.mxu0 %v4210_v3  ;;  %v49_v19 = vld [vmem:[%s6705_s0] sm:$0xff]  ;;  %v50_v20 = vld [vmem:[%s6705_s0 + $0x8] sm:$0xff]  ;;  %v4214_v21 = vcombine.high %v63_v13, %v67_v17  ;;  %v71_v24 = vld [vmem:[%s6706_s1 + $0x50] sm:$0xff] }
   0x6   :  { %4939 = vmatpush1.bf16.msra.mxu1 %v4209_v4  ;;  %188 = vmatpush1.bf16.msra.mxu0 %v4209_v4  ;;  %v75_v25 = vld [vmem:[%s6706_s1 + $0x70] sm:$0x33] }
   0x7   :  { %4938 = vmatprep.subr.msk.bf16.mxu1 %vm162_vm0, %v4218_v7  ;;  %v164_v14 = vsel %vm162_vm0, %v4217_v8, 0  ;;  %4225 = vmatprep.subr.msk.bf16.mxu0 %vm162_vm0, %v4218_v7 }
   0xa   :  { %4940 = vmatpush1.bf16.msra.mxu1 %v164_v14  ;;  %190 = vmatpush1.bf16.msra.mxu0 %v164_v14 }
   0xb   :  { %19 = vsyncpa [#allocation6], 0  ;;  %260 = vmatprep.subr.bf16.mxu1 %v4212_v15  ;;  %v4220_v26 = vcombine.high %v70_v16, %v74_v18  ;;  %v4219_v27 = vcombine.low %v70_v16, %v74_v18  ;;  %v57_v28 = vpack.c.bf16 %v50_v20, %v49_v19  ;;  %333 = vmatprep.subr.bf16.mxu0 %v4214_v21  ;;  %v64_v30 = vld [vmem:[%s6706_s1 + $0x18] sm:$0xff]  ;;  %v51_v36 = vld [vmem:[%s6705_s0 + $0x10] sm:$0xff]  ;;  %v5032_v49 = vmov 0.0   ;;  %s5033_s30 = smov 96  }
   0xc   :  { %v4213_v29 = vcombine.low %v63_v13, %v67_v17  ;;  %v68_v31 = vld [vmem:[%s6706_s1 + $0x38] sm:$0xff]  ;;  %v4222_v32 = vcombine.high %v71_v24, %v75_v25  ;;  %v4221_v33 = vcombine.low %v71_v24, %v75_v25  ;;  %v53_v45 = vld [vmem:[%s6705_s0 + $0x20] sm:$0xff]  ;;  %v54_v46 = vld [vmem:[%s6705_s0 + $0x28] sm:$0xff]  ;;  %vm488_vm2 = vcmask 523264   ;;  %s5034_s15 = smov 32  }
   0xd   :  { %4229 = vmatmul.mubr.msk.bf16.vlgmr.msra.gmra.mrb[0].mxu1 %vm149_vm1, %v5159_v22  ;;  %4226 = vmatmul.mubr.msk.bf16.vlgmr.msra.gmra.mrb[0].mxu0 %vm149_vm1, %v57_v28  ;;  %v170_v34 = vsel %vm162_vm0, %v4219_v27, 0  ;;  %v4216_v35 = vcombine.high %v64_v30, %v68_v31  ;;  %v52_v37 = vld [vmem:[%s6705_s0 + $0x18] sm:$0xff]  ;;  %v4215_v42 = vcombine.low %v64_v30, %v68_v31  ;;  %v59_v48 = vpack.c.bf16 %v54_v46, %v53_v45  ;;  %v963_v50 = vld [vmem:[%s6708_s3] sm:$0xff] }
   0xe   :  { %261 = vmatpush1.bf16.msra.mxu1 %v4211_v23  ;;  %292 = vmatprep.mubr.bf16.mxu1 %v5031_v6  ;;  %v176_v38 = vsel %vm162_vm0, %v4221_v33, 0  ;;  %v72_v39 = vld [vmem:[%s6706_s1 + $0x58] sm:$0xff]  ;;  %v58_v41 = vpack.c.bf16 %v52_v37, %v51_v36  ;;  %v967_v51 = vld [vmem:[%s6708_s3 + $0x20] sm:$0xff]  ;;  %vm1948_vm11 = vcmask 261120   ;;  %vm2527_vm12 = vcmask 785408  }
   0xf   :  { %4230 = vmatprep.subr.msk.bf16.mxu1 %vm162_vm0, %v4220_v26  ;;  %229 = vmatprep.mubr.bf16.mxu0 %v5031_v6  ;;  %v76_v40 = vld [vmem:[%s6706_s1 + $0x78] sm:$0x33]  ;;  %v4273_v52 = vcombine.low %v963_v50, %v967_v51  ;;  %v4274_v53 = vcombine.high %v963_v50, %v967_v51  ;;  %v971_v54 = vld [vmem:[%s6708_s3 + $0x40] sm:$0xff] }
  0x10   :  { %334 = vmatpush1.bf16.msra.mxu0 %v4213_v29  ;;  %v4224_v43 = vcombine.high %v72_v39, %v76_v40  ;;  %v4223_v44 = vcombine.low %v72_v39, %v76_v40  ;;  %v975_v55 = vld [vmem:[%s6708_s3 + $0x60] sm:$0xff] }
  0x11   :  { %4235 = vmatprep.subr.msk.bf16.mxu0 %vm162_vm0, %v4222_v32  ;;  %v4282_v56 = vcombine.high %v971_v54, %v975_v55  ;;  %v979_v57 = vld [vmem:[%s6708_s3 + $0x80] sm:$0xff]  ;;  %v4281_v59 = vcombine.low %v971_v54, %v975_v55 }
  0x12   :  { %263 = vmatpush1.bf16.msra.mxu1 %v170_v34  ;;  %v182_v47 = vsel %vm162_vm0, %v4223_v44, 0  ;;  %v983_v58 = vld [vmem:[%s6708_s3 + $0xa0] sm:$0xff] }
  0x13   :  { %406 = vmatprep.subr.bf16.mxu1 %v4216_v35  ;;  %v4290_v60 = vcombine.high %v979_v57, %v983_v58  ;;  %v987_v61 = vld [vmem:[%s6708_s3 + $0xc0] sm:$0xff]  ;;  %v4289_v63 = vcombine.low %v979_v57, %v983_v58 }
  0x14   :  { %336 = vmatpush1.bf16.msra.mxu0 %v176_v38  ;;  %v991_v62 = vld [vmem:[%s6708_s3 + $0xe0] sm:$0xff] }
  0x15   :  { %4231 = vmatmul.mubr.msk.bf16.vlgmr.msra.gmra.mrb[4].mxu1 %vm149_vm1, %v57_v28  ;;  %4227 = vmatmul.mubr.msk.bf16.gmra.mrb[4].mxu0 %vm149_vm1, %v58_v41  ;;  %v4298_v0 = vcombine.high %v987_v61, %v991_v62  ;;  %v995_v1 = vld [vmem:[%s6708_s3 + $0x100] sm:$0xff]  ;;  %v4297_v3 = vcombine.low %v987_v61, %v991_v62 }
  0x16   :  { %302 = vmatprep.mubr.bf16.mxu1 %v5031_v6  ;;  %239 = vmatprep.mubr.bf16.mxu0 %v5031_v6  ;;  %v999_v2 = vld [vmem:[%s6708_s3 + $0x120] sm:$0xff] }
  0x17   :  { %407 = vmatpush1.bf16.msra.mxu1 %v4215_v42  ;;  %v4306_v4 = vcombine.high %v995_v1, %v999_v2  ;;  %v1003_v5 = vld [vmem:[%s6708_s3 + $0x140] sm:$0xff]  ;;  %v4305_v7 = vcombine.low %v995_v1, %v999_v2 }
  0x18   :  { %4240 = vmatprep.subr.msk.bf16.mxu1 %vm162_vm0, %v4224_v43  ;;  %v1011_v9 = vld [vmem:[%s6708_s3 + $0x180] sm:$0xff] }
  0x19   :  { %v1015_v10 = vld [vmem:[%s6708_s3 + $0x1a0] sm:$0xff] }
  0x1a   :  { %v4322_v12 = vcombine.high %v1011_v9, %v1015_v10  ;;  %v1019_v13 = vld [vmem:[%s6708_s3 + $0x1c0] sm:$0xff]  ;;  %v4321_v15 = vcombine.low %v1011_v9, %v1015_v10 }
  0x1b   :  { %409 = vmatpush1.bf16.msra.mxu1 %v182_v47  ;;  %v1023_v14 = vld [vmem:[%s6708_s3 + $0x1e0] sm:$0xff] }
  0x1c   :  { %1731 = vmatprep.subr.bf16.mxu1 %v4274_v53  ;;  %v4330_v16 = vcombine.high %v1019_v13, %v1023_v14  ;;  %v1027_v19 = vld [vmem:[%s6708_s3 + $0x200] sm:$0xff]  ;;  %v4329_v25 = vcombine.low %v1019_v13, %v1023_v14 }
  0x1d   :  { %4232 = vmatmul.mubr.msk.bf16.gmra.mrb[8].mxu1 %vm149_vm1, %v58_v41  ;;  %4228 = vmatmul.mubr.msk.bf16.gmra.mrb[8].mxu0 %vm149_vm1, %v59_v48  ;;  %v1031_v20 = vld [vmem:[%s6708_s3 + $0x220] sm:$0xff] }
  0x1e   :  { %312 = vmatprep.mubr.bf16.mxu1 %v5031_v6  ;;  %365 = vmatprep.mubr.bf16.mxu0 %v5031_v6  ;;  %v4338_v30 = vcombine.high %v1027_v19, %v1031_v20  ;;  %v1035_v33 = vld [vmem:[%s6708_s3 + $0x240] sm:$0xff]  ;;  %v4337_v35 = vcombine.low %v1027_v19, %v1031_v20 }
  0x1f   :  { %v1039_v34 = vld [vmem:[%s6708_s3 + $0x260] sm:$0xff] }
  0x20   :  { %v4346_v36 = vcombine.high %v1035_v33, %v1039_v34  ;;  %v1043_v39 = vld [vmem:[%s6708_s3 + $0x280] sm:$0xff]  ;;  %v4345_v45 = vcombine.low %v1035_v33, %v1039_v34 }
  0x21   :  { %v1047_v40 = vld [vmem:[%s6708_s3 + $0x2a0] sm:$0xff] }
  0x22   :  { %v4354_v51 = vcombine.high %v1043_v39, %v1047_v40  ;;  %v1051_v54 = vld [vmem:[%s6708_s3 + $0x2c0] sm:$0xff] }
  0x23   :  { %v1055_v55 = vld [vmem:[%s6708_s3 + $0x2e0] sm:$0xff] }
  0x24   :  { %v4362_v57 = vcombine.high %v1051_v54, %v1055_v55  ;;  %v1063_v61 = vld [vmem:[%s6708_s3 + $0x320] sm:$0xff]  ;;  %v4361_v2 = vcombine.low %v1051_v54, %v1055_v55 }
  0x25   :  { %4233 = vmatmul.mubr.msk.bf16.gmra.mrb[12].mxu1 %vm149_vm1, %v59_v48  ;;  %4236 = vmatmul.mubr.msk.bf16.vlgmr.msra.gmra.mrb[12].mxu0 %vm149_vm1, %v57_v28  ;;  %v1067_v10 = vld [vmem:[%s6708_s3 + $0x340] sm:$0xff] }
  0x26   :  { %322 = vmatprep.mubr.bf16.mxu1 %v5031_v6  ;;  %375 = vmatprep.mubr.bf16.mxu0 %v5031_v6 }
  0x2d   :  { %4234 = vmatmul.mubr.msk.bf16.gmra.mrb[16].mxu1 %vm149_vm1, %v5159_v22  ;;  %4237 = vmatmul.mubr.msk.bf16.gmra.mrb[16].mxu0 %vm149_vm1, %v58_v41 }
  0x2e   :  { %385 = vmatprep.mubr.bf16.mxu0 %v5031_v6  ;;  %438 = vmatprep.mubr.bf16.mxu1 %v5031_v6 }
  0x35   :  { %4238 = vmatmul.mubr.msk.bf16.gmra.mrb[20].mxu0 %vm149_vm1, %v59_v48  ;;  %4241 = vmatmul.mubr.msk.bf16.vlgmr.msra.gmra.mrb[20].mxu1 %vm149_vm1, %v57_v28 }
  0x36   :  { %395 = vmatprep.mubr.bf16.mxu0 %v5031_v6  ;;  %448 = vmatprep.mubr.bf16.mxu1 %v5031_v6 }
  0x37   :  { %1732 = vmatpush1.bf16.msra.mxu1 %v4273_v52 }
  0x38   :  { %1733 = vmatprep.subr.bf16.mxu1 %v4282_v56  ;;  %v4353_v56 = vcombine.low %v1043_v39, %v1047_v40 }
  0x3b   :  { %1734 = vmatpush1.bf16.msra.mxu1 %v4281_v59 }
  0x3c   :  { %1735 = vmatprep.subr.bf16.mxu1 %v4290_v60  ;;  %v1059_v60 = vld [vmem:[%s6708_s3 + $0x300] sm:$0xff] }
  0x3d   :  { %4239 = vmatmul.mubr.msk.bf16.gmra.mrb[24].mxu0 %vm149_vm1, %v5159_v22  ;;  %4242 = vmatmul.mubr.msk.bf16.gmra.mrb[24].mxu1 %vm149_vm1, %v58_v41 }
  0x3e   :  { %458 = vmatprep.mubr.bf16.mxu1 %v5031_v6  ;;  %565 = vmatprep.mubr.f32.mxu0 %v5032_v49 }
  0x3f   :  { %1736 = vmatpush1.bf16.msra.mxu1 %v4289_v63 }
  0x40   :  { %1737 = vmatprep.subr.bf16.mxu1 %v4298_v0 }
  0x43   :  { %1738 = vmatpush1.bf16.msra.mxu1 %v4297_v3 }
  0x44   :  { %1739 = vmatprep.subr.bf16.mxu1 %v4306_v4 }
  0x45   :  { %4243 = vmatmul.mubr.msk.bf16.gmra.mrb[28].mxu1 %vm149_vm1, %v59_v48 }
  0x46   :  { %468 = vmatprep.mubr.bf16.mxu1 %v5031_v6  ;;  %v1007_v6 = vld [vmem:[%s6708_s3 + $0x160] sm:$0xff] }
  0x47   :  { %v4314_v8 = vcombine.high %v1003_v5, %v1007_v6  ;;  %1740 = vmatpush1.bf16.msra.mxu1 %v4305_v7  ;;  %v4313_v11 = vcombine.low %v1003_v5, %v1007_v6  ;;  %v4370_v7 = vcombine.high %v1059_v60, %v1063_v61 }
  0x49   :  { %1741 = vmatprep.subr.bf16.mxu1 %v4314_v8 }
  0x4b   :  { %1742 = vmatpush1.bf16.msra.mxu1 %v4313_v11  ;;  %v1071_v11 = vld [vmem:[%s6708_s3 + $0x360] sm:$0xff] }
  0x4c   :  { %1743 = vmatprep.subr.bf16.mxu1 %v4322_v12  ;;  %v4369_v12 = vcombine.low %v1059_v60, %v1063_v61  ;;  %v4378_v13 = vcombine.high %v1067_v10, %v1071_v11 }
  0x4d   :  { %4244 = vmatmul.mubr.msk.bf16.gmra.mrb[32].mxu1 %vm149_vm1, %v5159_v22  ;;  %vm3529_vm1 = vcmask 130048  }
  0x4f   :  { %1744 = vmatpush1.bf16.msra.mxu1 %v4321_v15 }
  0x50   :  { %1745 = vmatprep.subr.bf16.mxu1 %v4330_v16 }
  0x53   :  { %1746 = vmatpush1.bf16.msra.mxu1 %v4329_v25 }
  0x54   :  { %1747 = vmatprep.subr.bf16.mxu1 %v4338_v30  ;;  %v4377_v30 = vcombine.low %v1067_v10, %v1071_v11 }
  0x57   :  { %1748 = vmatpush1.bf16.msra.mxu1 %v4337_v35 }
  0x58   :  { %1749 = vmatprep.subr.bf16.mxu1 %v4346_v36 }
  0x5b   :  { %1750 = vmatpush1.bf16.msra.mxu1 %v4345_v45 }
  0x5c   :  { %1751 = vmatprep.subr.bf16.mxu1 %v4354_v51 }
  0x5f   :  { %1752 = vmatpush1.bf16.msra.mxu1 %v4353_v56 }
  0x60   :  { %1753 = vmatprep.subr.bf16.mxu1 %v4362_v57 }
  0x63   :  { %1754 = vmatpush1.bf16.msra.mxu1 %v4361_v2 }
  0x64   :  { %1755 = vmatprep.subr.bf16.mxu1 %v4370_v7 }
  0x67   :  { %1756 = vmatpush1.bf16.msra.mxu1 %v4369_v12 }
  0x68   :  { %1757 = vmatprep.subr.bf16.mxu1 %v4378_v13 }
  0x6b   :  { %1758 = vmatpush1.bf16.msra.mxu1 %v4377_v30  ;;  %v4257_v30 = vld [vmem:[%s6707_s2 + $0x40] sm:$0xff] }
  0xe0   :  { %v5280_v17 = vpop.f32.mrb[0].mxu1  ;;  %v5282_v18 = vpop.f32.mrb[0].mxu0 }
  0xe1   :  { %v5290_v21 = vpop.f32.mrb[1].mxu1  ;;  %v5292_v22 = vpop.f32.mrb[1].mxu0 }
  0xe2   :  { %v5294_v23 = vpop.f32.mrb[2].mxu1  ;;  %v5296_v24 = vpop.f32.mrb[2].mxu0 }
  0xe3   :  { %v4727_v26 = vpack.c.bf16 %v5294_v23, %v5280_v17  ;;  %v5300_v27 = vpop.f32.mrb[3].mxu1  ;;  %v4715_v28 = vpack.c.bf16 %v5296_v24, %v5282_v18  ;;  %v5304_v29 = vpop.f32.mrb[3].mxu0  ;;  %v4247_v24 = vld [vmem:[%s6707_s2 + $0x30] sm:$0xff]  ;;  %v480_v17 = vld [vmem:[%s6707_s2 + $0x8] sm:$0xff] }
  0xe4   :  { %v4725_v31 = vpack.c.bf16 %v5300_v27, %v5290_v21  ;;  %v4713_v32 = vpack.c.bf16 %v5304_v29, %v5292_v22  ;;  %v4246_v22 = vld [vmem:[%s6707_s2 + $0x28] sm:$0xff] }
  0xe8   :  { %v294_v37 = vpop.f32.mrb[4].mxu1  ;;  %v5316_v38 = vpop.f32.mrb[4].mxu0 }
  0xe9   :  { %v296_v41 = vpop.f32.mrb[5].mxu1  ;;  %v5324_v42 = vpop.f32.mrb[5].mxu0 }
  0xea   :  { %v298_v43 = vpop.f32.mrb[6].mxu1  ;;  %v5326_v44 = vpop.f32.mrb[6].mxu0 }
  0xeb   :  { %v4699_v46 = vpack.c.bf16 %v298_v43, %v294_v37  ;;  %v300_v47 = vpop.f32.mrb[7].mxu1  ;;  %v4719_v48 = vpack.c.bf16 %v5326_v44, %v5316_v38  ;;  %v5330_v50 = vpop.f32.mrb[7].mxu0  ;;  %v4248_v38 = vld [vmem:[%s6707_s2 + $0x38] sm:$0xff] }
  0xec   :  { %v4697_v52 = vpack.c.bf16 %v300_v47, %v296_v41  ;;  %v4717_v53 = vpack.c.bf16 %v5330_v50, %v5324_v42 }
  0xee   :  { %4698 = vmatprep.subr.bf16.mxu0 %v4697_v52 }
  0xef   :  { %4700 = vmatpush1.bf16.msra.mxu0 %v4699_v46 }
  0xf0   :  { %v304_v58 = vpop.f32.mrb[8].mxu1  ;;  %v5340_v59 = vpop.f32.mrb[8].mxu0 }
  0xf1   :  { %v306_v62 = vpop.f32.mrb[9].mxu1  ;;  %v5348_v63 = vpop.f32.mrb[9].mxu0 }
  0xf2   :  { %v308_v0 = vpop.f32.mrb[10].mxu1  ;;  %v5350_v1 = vpop.f32.mrb[10].mxu0 }
  0xf3   :  { %v4703_v3 = vpack.c.bf16 %v308_v0, %v304_v58  ;;  %v310_v4 = vpop.f32.mrb[11].mxu1  ;;  %v4723_v5 = vpack.c.bf16 %v5350_v1, %v5340_v59  ;;  %v5354_v6 = vpop.f32.mrb[11].mxu0  ;;  %v4245_v58 = vld [vmem:[%s6707_s2 + $0x20] sm:$0xff] }
  0xf4   :  { %v4701_v8 = vpack.c.bf16 %v310_v4, %v306_v62  ;;  %v4721_v9 = vpack.c.bf16 %v5354_v6, %v5348_v63  ;;  %v479_v59 = vld [vmem:[%s6707_s2] sm:$0xff] }
  0xf6   :  { %4702 = vmatprep.subr.bf16.mxu0 %v4701_v8 }
  0xf7   :  { %4704 = vmatpush1.bf16.msra.mxu0 %v4703_v3 }
  0xf8   :  { %v314_v14 = vpop.f32.mrb[12].mxu1  ;;  %v5364_v15 = vpop.f32.mrb[12].mxu0 }
  0xf9   :  { %v316_v16 = vpop.f32.mrb[13].mxu1  ;;  %v5366_v19 = vpop.f32.mrb[13].mxu0 }
  0xfa   :  { %v318_v20 = vpop.f32.mrb[14].mxu1  ;;  %v5368_v25 = vpop.f32.mrb[14].mxu0 }
  0xfb   :  { %v4707_v33 = vpack.c.bf16 %v318_v20, %v314_v14  ;;  %v320_v34 = vpop.f32.mrb[15].mxu1  ;;  %v4731_v35 = vpack.c.bf16 %v5368_v25, %v5364_v15  ;;  %v5372_v36 = vpop.f32.mrb[15].mxu0 }
  0xfc   :  { %v4705_v37 = vpack.c.bf16 %v320_v34, %v316_v16  ;;  %v4729_v39 = vpack.c.bf16 %v5372_v36, %v5366_v19  ;;  %v482_v16 = vld [vmem:[%s6707_s2 + $0x18] sm:$0xff]  ;;  %v4259_v34 = vld [vmem:[%s6707_s2 + $0x50] sm:$0xff] }
  0xfd   :  { %v969_v36 = vld [vmem:[%s6708_s3 + $0x30] sm:$0xff] }
  0xfe   :  { %4706 = vmatprep.subr.bf16.mxu0 %v4705_v37  ;;  %v4260_v37 = vld [vmem:[%s6707_s2 + $0x58] sm:$0xff] }
  0xff   :  { %4708 = vmatpush1.bf16.msra.mxu0 %v4707_v33  ;;  %v4258_v33 = vld [vmem:[%s6707_s2 + $0x48] sm:$0xff] }
 0x100   :  { %v324_v40 = vpop.f32.mrb[16].mxu1  ;;  %v5376_v41 = vpop.f32.mrb[16].mxu0 }
 0x101   :  { %v326_v43 = vpop.f32.mrb[17].mxu1  ;;  %v5378_v45 = vpop.f32.mrb[17].mxu0 }
 0x102   :  { %v328_v46 = vpop.f32.mrb[18].mxu1  ;;  %v5380_v47 = vpop.f32.mrb[18].mxu0 }
 0x103   :  { %v4711_v51 = vpack.c.bf16 %v328_v46, %v324_v40  ;;  %v330_v52 = vpop.f32.mrb[19].mxu1  ;;  %v4735_v54 = vpack.c.bf16 %v5380_v47, %v5376_v41  ;;  %v383_v55 = vpop.f32.mrb[19].mxu0  ;;  %v973_v40 = vld [vmem:[%s6708_s3 + $0x50] sm:$0xff] }
 0x104   :  { %v4709_v56 = vpack.c.bf16 %v330_v52, %v326_v43  ;;  %v4733_v57 = vpack.c.bf16 %v383_v55, %v5378_v45  ;;  %v977_v41 = vld [vmem:[%s6708_s3 + $0x70] sm:$0xff]  ;;  %v4265_v43 = vld [vmem:[%s6707_s2 + $0x60] sm:$0xff]  ;;  %v4266_v52 = vld [vmem:[%s6707_s2 + $0x68] sm:$0xff] }
 0x105   :  { %v4286_v46 = vcombine.high %v973_v40, %v977_v41  ;;  %v981_v47 = vld [vmem:[%s6708_s3 + $0x90] sm:$0xff] }
 0x106   :  { %4710 = vmatprep.subr.bf16.mxu0 %v4709_v56  ;;  %v989_v56 = vld [vmem:[%s6708_s3 + $0xd0] sm:$0xff] }
 0x107   :  { %4712 = vmatpush1.bf16.msra.mxu0 %v4711_v51  ;;  %v985_v51 = vld [vmem:[%s6708_s3 + $0xb0] sm:$0xff] }
 0x108   :  { %4714 = vmatprep.subr.bf16.mxu0 %v4713_v32  ;;  %v5391_v60 = vpop.f32.mrb[20].mxu0  ;;  %v5393_v61 = vpop.f32.mrb[20].mxu1  ;;  %v4294_v55 = vcombine.high %v981_v47, %v985_v51 }
 0x109   :  { %v389_v62 = vpop.f32.mrb[21].mxu0  ;;  %v5395_v0 = vpop.f32.mrb[21].mxu1 }
 0x10a   :  { %4249 = vmatmul.mubr.msk.f32.vlgmr.msra.gmra.mrb[28].mxu0 %vm488_vm2, %v4245_v58  ;;  %v391_v2 = vpop.f32.mrb[22].mxu0  ;;  %v5398_v3 = vpop.f32.mrb[22].mxu1  ;;  %v4267_v58 = vld [vmem:[%s6707_s2 + $0x70] sm:$0xff] }
 0x10b   :  { %4716 = vmatpush1.bf16.msra.mxu0 %v4715_v28  ;;  %571 = vmatprep.mubr.f32.mxu0 %v5032_v49  ;;  %v4739_v29 = vpack.c.bf16 %v391_v2, %v5391_v60  ;;  %v4747_v32 = vpack.c.bf16 %v5398_v3, %v5393_v61  ;;  %v393_v4 = vpop.f32.mrb[23].mxu0  ;;  %v446_v7 = vpop.f32.mrb[23].mxu1  ;;  %v4293_v60 = vcombine.low %v981_v47, %v985_v51  ;;  %v4268_v2 = vld [vmem:[%s6707_s2 + $0x78] sm:$0xff]  ;;  %v1085_v47 = vld [vmem:[%s6708_s3 + $0x3d0] sm:$0xff] }
 0x10c   :  { %4718 = vmatprep.subr.bf16.mxu0 %v4717_v53  ;;  %v4737_v8 = vpack.c.bf16 %v393_v4, %v389_v62  ;;  %v4745_v18 = vpack.c.bf16 %v446_v7, %v5395_v0  ;;  %v997_v62 = vld [vmem:[%s6708_s3 + $0x110] sm:$0xff] }
 0x10d   :  { %v1001_v0 = vld [vmem:[%s6708_s3 + $0x130] sm:$0xff] }
 0x10e   :  { %4250 = vmatmul.mubr.msk.f32.gmra.mrb[30].mxu0 %vm488_vm2, %v4246_v22  ;;  %v4310_v22 = vcombine.high %v997_v62, %v1001_v0  ;;  %v4309_v4 = vcombine.low %v997_v62, %v1001_v0  ;;  %v1089_v51 = vld [vmem:[%s6708_s3 + $0x3f0] sm:$0xff] }
 0x10f   :  { %4720 = vmatpush1.bf16.msra.mxu0 %v4719_v48  ;;  %577 = vmatprep.mubr.f32.mxu0 %v5032_v49 }
 0x110   :  { %4722 = vmatprep.subr.bf16.mxu0 %v4721_v9  ;;  %v397_v28 = vpop.f32.mrb[24].mxu0  ;;  %v450_v42 = vpop.f32.mrb[24].mxu1 }
 0x111   :  { %v399_v50 = vpop.f32.mrb[25].mxu0  ;;  %v452_v53 = vpop.f32.mrb[25].mxu1 }
 0x112   :  { %4251 = vmatmul.mubr.msk.f32.gmra.mrb[32].mxu0 %vm488_vm2, %v4247_v24  ;;  %v401_v10 = vpop.f32.mrb[26].mxu0  ;;  %v454_v11 = vpop.f32.mrb[26].mxu1 }
 0x113   :  { %4724 = vmatpush1.bf16.msra.mxu0 %v4723_v5  ;;  %583 = vmatprep.mubr.f32.mxu0 %v5032_v49  ;;  %v4743_v44 = vpack.c.bf16 %v401_v10, %v397_v28  ;;  %v4751_v48 = vpack.c.bf16 %v454_v11, %v450_v42  ;;  %v403_v63 = vpop.f32.mrb[27].mxu0  ;;  %v456_v6 = vpop.f32.mrb[27].mxu1  ;;  %v481_v5 = vld [vmem:[%s6707_s2 + $0x10] sm:$0xff] }
 0x114   :  { %4726 = vmatprep.subr.bf16.mxu0 %v4725_v31  ;;  %v4741_v9 = vpack.c.bf16 %v403_v63, %v399_v50  ;;  %v4749_v12 = vpack.c.bf16 %v456_v6, %v452_v53  ;;  %v1021_v42 = vld [vmem:[%s6708_s3 + $0x1d0] sm:$0xff] }
 0x115   :  { %v1025_v50 = vld [vmem:[%s6708_s3 + $0x1f0] sm:$0xff] }
 0x116   :  { %4252 = vmatmul.mubr.msk.f32.gmra.mrb[34].mxu0 %vm488_vm2, %v4248_v38  ;;  %v4334_v10 = vcombine.high %v1021_v42, %v1025_v50  ;;  %v1029_v11 = vld [vmem:[%s6708_s3 + $0x210] sm:$0xff] }
 0x117   :  { %4728 = vmatpush1.bf16.msra.mxu0 %v4727_v26  ;;  %666 = vmatprep.mubr.f32.mxu0 %v5032_v49  ;;  %v1033_v38 = vld [vmem:[%s6708_s3 + $0x230] sm:$0xff] }
 0x118   :  { %4730 = vmatprep.subr.bf16.mxu0 %v4729_v39  ;;  %v460_v21 = vpop.f32.mrb[28].mxu1  ;;  %v1037_v63 = vld [vmem:[%s6708_s3 + $0x250] sm:$0xff] }
 0x119   :  { %v462_v27 = vpop.f32.mrb[29].mxu1  ;;  %v1041_v6 = vld [vmem:[%s6708_s3 + $0x270] sm:$0xff] }
 0x11a   :  { %4253 = vmatmul.mubr.msk.f32.vlgmr.msra.gmra.mrb[28].mxu0 %vm488_vm2, %v479_v59  ;;  %v464_v31 = vpop.f32.mrb[30].mxu1  ;;  %v1045_v59 = vld [vmem:[%s6708_s3 + $0x290] sm:$0xff] }
 0x11b   :  { %4732 = vmatpush1.bf16.msra.mxu0 %v4731_v35  ;;  %672 = vmatprep.mubr.f32.mxu0 %v5032_v49  ;;  %v4755_v23 = vpack.c.bf16 %v464_v31, %v460_v21  ;;  %v466_v26 = vpop.f32.mrb[31].mxu1  ;;  %v965_v35 = vld [vmem:[%s6708_s3 + $0x10] sm:$0xff] }
 0x11c   :  { %4734 = vmatprep.subr.bf16.mxu0 %v4733_v57  ;;  %v4753_v1 = vpack.c.bf16 %v466_v26, %v462_v27  ;;  %v4278_v39 = vcombine.high %v965_v35, %v969_v36  ;;  %v4277_v45 = vcombine.low %v965_v35, %v969_v36  ;;  %v993_v57 = vld [vmem:[%s6708_s3 + $0xf0] sm:$0xff]  ;;  %v4349_v27 = vcombine.low %v1037_v63, %v1041_v6 }
 0x11d   :  { %v4302_v61 = vcombine.high %v989_v56, %v993_v57  ;;  %v4301_v3 = vcombine.low %v989_v56, %v993_v57  ;;  %v1049_v21 = vld [vmem:[%s6708_s3 + $0x2b0] sm:$0xff]  ;;  %v964_v56 = vld [vmem:[%s6708_s3 + $0x8] sm:$0xff] }
 0x11e   :  { %4254 = vmatmul.mubr.msk.f32.gmra.mrb[30].mxu0 %vm488_vm2, %v480_v17  ;;  %v4358_v31 = vcombine.high %v1045_v59, %v1049_v21  ;;  %v1053_v17 = vld [vmem:[%s6708_s3 + $0x2d0] sm:$0xff]  ;;  %v4357_v26 = vcombine.low %v1045_v59, %v1049_v21  ;;  %v968_v57 = vld [vmem:[%s6708_s3 + $0x28] sm:$0xff] }
 0x11f   :  { %4736 = vmatpush1.bf16.msra.mxu0 %v4735_v54  ;;  %678 = vmatprep.mubr.f32.mxu0 %v5032_v49  ;;  %v4285_v54 = vcombine.low %v973_v40, %v977_v41  ;;  %v1077_v36 = vld [vmem:[%s6708_s3 + $0x390] sm:$0xff] }
 0x120   :  { %4738 = vmatprep.subr.bf16.mxu0 %v4737_v8  ;;  %v470_v13 = vpop.f32.mrb[32].mxu1  ;;  %v1013_v8 = vld [vmem:[%s6708_s3 + $0x190] sm:$0xff] }
 0x121   :  { %v472_v14 = vpop.f32.mrb[33].mxu1 }
 0x122   :  { %4255 = vmatmul.mubr.msk.f32.gmra.mrb[32].mxu0 %vm488_vm2, %v481_v5  ;;  %v474_v15 = vpop.f32.mrb[34].mxu1  ;;  %v1061_v5 = vld [vmem:[%s6708_s3 + $0x310] sm:$0xff] }
 0x123   :  { %4740 = vmatpush1.bf16.msra.mxu0 %v4739_v29  ;;  %684 = vmatprep.mubr.f32.mxu0 %v5032_v49  ;;  %v4759_v19 = vpack.c.bf16 %v474_v15, %v470_v13  ;;  %v476_v20 = vpop.f32.mrb[35].mxu1  ;;  %v1005_v29 = vld [vmem:[%s6708_s3 + $0x150] sm:$0xff] }
 0x124   :  { %4742 = vmatprep.subr.bf16.mxu0 %v4741_v9  ;;  %v4757_v25 = vpack.c.bf16 %v476_v20, %v472_v14  ;;  %v4341_v9 = vcombine.low %v1029_v11, %v1033_v38  ;;  %v1065_v13 = vld [vmem:[%s6708_s3 + $0x330] sm:$0xff] }
 0x125   :  { %v4374_v15 = vcombine.high %v1061_v5, %v1065_v13  ;;  %v1073_v20 = vld [vmem:[%s6708_s3 + $0x370] sm:$0xff] }
 0x126   :  { %4256 = vmatmul.mubr.msk.f32.gmra.mrb[34].mxu0 %vm488_vm2, %v482_v16  ;;  %v4373_v16 = vcombine.low %v1061_v5, %v1065_v13 }
 0x127   :  { %4744 = vmatpush1.bf16.msra.mxu0 %v4743_v44  ;;  %772 = vmatprep.mubr.f32.mxu0 %v5032_v49  ;;  %v4333_v44 = vcombine.low %v1021_v42, %v1025_v50 }
 0x128   :  { %4746 = vmatprep.subr.bf16.mxu0 %v4745_v18  ;;  %v1017_v18 = vld [vmem:[%s6708_s3 + $0x1b0] sm:$0xff] }
 0x129   :  { %v4326_v28 = vcombine.high %v1013_v8, %v1017_v18  ;;  %v4325_v53 = vcombine.low %v1013_v8, %v1017_v18  ;;  %v972_v8 = vld [vmem:[%s6708_s3 + $0x48] sm:$0xff] }
 0x12a   :  { %4261 = vmatmul.mubr.msk.f32.vlgmr.msra.gmra.mrb[28].mxu0 %vm488_vm2, %v4257_v30  ;;  %v976_v18 = vld [vmem:[%s6708_s3 + $0x68] sm:$0xff] }
 0x12b   :  { %4748 = vmatpush1.bf16.msra.mxu0 %v4747_v32  ;;  %778 = vmatprep.mubr.f32.mxu0 %v5032_v49  ;;  %v1009_v32 = vld [vmem:[%s6708_s3 + $0x170] sm:$0xff]  ;;  %v4283_v59 = vcombine.low %v972_v8, %v976_v18 }
 0x12c   :  { %4750 = vmatprep.subr.bf16.mxu0 %v4749_v12  ;;  %v4318_v7 = vcombine.high %v1005_v29, %v1009_v32  ;;  %v4317_v24 = vcombine.low %v1005_v29, %v1009_v32  ;;  %v4350_v12 = vcombine.high %v1037_v63, %v1041_v6 }
 0x12e   :  { %4262 = vmatmul.mubr.msk.f32.gmra.mrb[30].mxu0 %vm488_vm2, %v4258_v33  ;;  %v1075_v33 = vld [vmem:[%s6708_s3 + $0x380] sm:$0xff] }
 0x12f   :  { %4752 = vmatpush1.bf16.msra.mxu0 %v4751_v48  ;;  %784 = vmatprep.mubr.f32.mxu0 %v5032_v49  ;;  %v4342_v48 = vcombine.high %v1029_v11, %v1033_v38  ;;  %v4284_v11 = vcombine.high %v972_v8, %v976_v18 }
 0x130   :  { %4754 = vmatprep.subr.bf16.mxu0 %v4753_v1 }
 0x132   :  { %4263 = vmatmul.mubr.msk.f32.gmra.mrb[32].mxu0 %vm488_vm2, %v4259_v34  ;;  %v1079_v34 = vld [vmem:[%s6708_s3 + $0x3a0] sm:$0xff] }
 0x133   :  { %4756 = vmatpush1.bf16.msra.mxu0 %v4755_v23  ;;  %790 = vmatprep.mubr.f32.mxu0 %v5032_v49  ;;  %v1057_v23 = vld [vmem:[%s6708_s3 + $0x2f0] sm:$0xff]  ;;  %v4386_v35 = vcombine.high %v1075_v33, %v1079_v34 }
 0x134   :  { %4758 = vmatprep.subr.bf16.mxu0 %v4757_v25  ;;  %v4366_v1 = vcombine.high %v1053_v17, %v1057_v23  ;;  %v4365_v14 = vcombine.low %v1053_v17, %v1057_v23  ;;  %v988_v23 = vld [vmem:[%s6708_s3 + $0xc8] sm:$0xff] }
 0x135   :  { %1759 = vmatprep.subr.bf16.mxu1 %v4386_v35 }
 0x136   :  { %4264 = vmatmul.mubr.msk.f32.gmra.mrb[34].mxu0 %vm488_vm2, %v4260_v37  ;;  %v1081_v37 = vld [vmem:[%s6708_s3 + $0x3b0] sm:$0xff] }
 0x137   :  { %4760 = vmatpush1.bf16.msra.mxu0 %v4759_v19  ;;  %886 = vmatprep.mubr.f32.mxu0 %v5032_v49  ;;  %v1069_v19 = vld [vmem:[%s6708_s3 + $0x350] sm:$0xff]  ;;  %v4390_v40 = vcombine.high %v1077_v36, %v1081_v37  ;;  %v4389_v41 = vcombine.low %v1077_v36, %v1081_v37  ;;  %v1012_v37 = vld [vmem:[%s6708_s3 + $0x188] sm:$0xff] }
 0x138   :  { %1837 = vmatprep.subr.bf16.mxu0 %v4278_v39  ;;  %v4382_v25 = vcombine.high %v1069_v19, %v1073_v20  ;;  %v4381_v30 = vcombine.low %v1069_v19, %v1073_v20  ;;  %v4385_v39 = vcombine.low %v1075_v33, %v1079_v34  ;;  %v996_v19 = vld [vmem:[%s6708_s3 + $0x108] sm:$0xff] }
 0x139   :  { %v1000_v20 = vld [vmem:[%s6708_s3 + $0x128] sm:$0xff] }
 0x13a   :  { %4269 = vmatmul.mubr.msk.f32.vlgmr.msra.gmra.mrb[28].mxu0 %vm488_vm2, %v4265_v43  ;;  %1760 = vmatpush1.bf16.msra.mxu1 %v4385_v39  ;;  %v1083_v43 = vld [vmem:[%s6708_s3 + $0x3c0] sm:$0xff]  ;;  %v1004_v33 = vld [vmem:[%s6708_s3 + $0x148] sm:$0xff]  ;;  %v4307_v35 = vcombine.low %v996_v19, %v1000_v20 }
 0x13b   :  { %892 = vmatprep.mubr.f32.mxu0 %v5032_v49  ;;  %1838 = vmatpush1.bf16.msra.mxu0 %v4277_v45  ;;  %v1087_v45 = vld [vmem:[%s6708_s3 + $0x3e0] sm:$0xff]  ;;  %v1008_v34 = vld [vmem:[%s6708_s3 + $0x168] sm:$0xff] }
 0x13c   :  { %1839 = vmatprep.subr.bf16.mxu0 %v4286_v46  ;;  %v4394_v46 = vcombine.high %v1083_v43, %v1087_v45  ;;  %v4316_v36 = vcombine.high %v1004_v33, %v1008_v34  ;;  %v1016_v39 = vld [vmem:[%s6708_s3 + $0x1a8] sm:$0xff] }
 0x13e   :  { %4270 = vmatmul.mubr.msk.f32.gmra.mrb[30].mxu0 %vm488_vm2, %v4266_v52  ;;  %v4393_v52 = vcombine.low %v1083_v43, %v1087_v45  ;;  %1761 = vmatprep.subr.bf16.mxu1 %v4394_v46  ;;  %v1020_v43 = vld [vmem:[%s6708_s3 + $0x1c8] sm:$0xff]  ;;  %v4323_v46 = vcombine.low %v1012_v37, %v1016_v39 }
 0x13f   :  { %898 = vmatprep.mubr.f32.mxu0 %v5032_v49  ;;  %1840 = vmatpush1.bf16.msra.mxu0 %v4285_v54  ;;  %v4398_v54 = vcombine.high %v1085_v47, %v1089_v51  ;;  %v1024_v45 = vld [vmem:[%s6708_s3 + $0x1e8] sm:$0xff] }
 0x140   :  { %1841 = vmatprep.subr.bf16.mxu0 %v4294_v55  ;;  %v4397_v55 = vcombine.low %v1085_v47, %v1089_v51  ;;  %1762 = vmatpush1.bf16.msra.mxu1 %v4393_v52  ;;  %v4332_v47 = vcombine.high %v1020_v43, %v1024_v45  ;;  %v1028_v51 = vld [vmem:[%s6708_s3 + $0x208] sm:$0xff] }
 0x141   :  { %v1032_v52 = vld [vmem:[%s6708_s3 + $0x228] sm:$0xff] }
 0x142   :  { %4271 = vmatmul.mubr.msk.f32.gmra.mrb[32].mxu0 %vm488_vm2, %v4267_v58  ;;  %v4276_v58 = vcombine.high %v964_v56, %v968_v57 }
 0x143   :  { %904 = vmatprep.mubr.f32.mxu0 %v5032_v49  ;;  %1842 = vmatpush1.bf16.msra.mxu0 %v4293_v60  ;;  %v4275_v60 = vcombine.low %v964_v56, %v968_v57  ;;  %v1036_v56 = vld [vmem:[%s6708_s3 + $0x248] sm:$0xff] }
 0x144   :  { %1843 = vmatprep.subr.bf16.mxu0 %v4302_v61  ;;  %1784 = vmatprep.subr.bf16.mxu1 %v4276_v58  ;;  %v1040_v57 = vld [vmem:[%s6708_s3 + $0x268] sm:$0xff]  ;;  %v4339_v58 = vcombine.low %v1028_v51, %v1032_v52 }
 0x146   :  { %4272 = vmatmul.mubr.msk.f32.gmra.mrb[34].mxu0 %vm488_vm2, %v4268_v2 }
 0x147   :  { %1844 = vmatpush1.bf16.msra.mxu0 %v4301_v3 }
 0x148   :  { %1845 = vmatprep.subr.bf16.mxu0 %v4310_v22 }
 0x14b   :  { %1846 = vmatpush1.bf16.msra.mxu0 %v4309_v4 }
 0x14c   :  { %1847 = vmatprep.subr.bf16.mxu0 %v4318_v7 }
 0x14f   :  { %1848 = vmatpush1.bf16.msra.mxu0 %v4317_v24 }
 0x150   :  { %1849 = vmatprep.subr.bf16.mxu0 %v4326_v28 }
 0x153   :  { %1850 = vmatpush1.bf16.msra.mxu0 %v4325_v53 }
 0x154   :  { %1851 = vmatprep.subr.bf16.mxu0 %v4334_v10 }
 0x157   :  { %1852 = vmatpush1.bf16.msra.mxu0 %v4333_v44  ;;  %v980_v44 = vld [vmem:[%s6708_s3 + $0x88] sm:$0xff] }
 0x158   :  { %1853 = vmatprep.subr.bf16.mxu0 %v4342_v48  ;;  %v984_v48 = vld [vmem:[%s6708_s3 + $0xa8] sm:$0xff] }
 0x15b   :  { %1854 = vmatpush1.bf16.msra.mxu0 %v4341_v9 }
 0x15c   :  { %1855 = vmatprep.subr.bf16.mxu0 %v4350_v12 }
 0x15f   :  { %1856 = vmatpush1.bf16.msra.mxu0 %v4349_v27  ;;  %v4292_v27 = vcombine.high %v980_v44, %v984_v48 }
 0x160   :  { %1857 = vmatprep.subr.bf16.mxu0 %v4358_v31 }
 0x163   :  { %1858 = vmatpush1.bf16.msra.mxu0 %v4357_v26  ;;  %v992_v26 = vld [vmem:[%s6708_s3 + $0xe8] sm:$0xff] }
 0x164   :  { %1859 = vmatprep.subr.bf16.mxu0 %v4366_v1 }
 0x167   :  { %1860 = vmatpush1.bf16.msra.mxu0 %v4365_v14 }
 0x168   :  { %1861 = vmatprep.subr.bf16.mxu0 %v4374_v15  ;;  %v4291_v15 = vcombine.low %v980_v44, %v984_v48 }
 0x16b   :  { %1862 = vmatpush1.bf16.msra.mxu0 %v4373_v16  ;;  %v4300_v16 = vcombine.high %v988_v23, %v992_v26 }
 0x16c   :  { %1863 = vmatprep.subr.bf16.mxu0 %v4382_v25  ;;  %v4299_v25 = vcombine.low %v988_v23, %v992_v26  ;;  %v978_v23 = vld [vmem:[%s6708_s3 + $0x78] sm:$0xff] }
 0x16f   :  { %1864 = vmatpush1.bf16.msra.mxu0 %v4381_v30  ;;  %v4308_v30 = vcombine.high %v996_v19, %v1000_v20  ;;  %v990_v20 = vld [vmem:[%s6708_s3 + $0xd8] sm:$0xff] }
 0x170   :  { %1865 = vmatprep.subr.bf16.mxu0 %v4390_v40  ;;  %v4315_v40 = vcombine.low %v1004_v33, %v1008_v34  ;;  %v998_v34 = vld [vmem:[%s6708_s3 + $0x118] sm:$0xff] }
 0x173   :  { %1866 = vmatpush1.bf16.msra.mxu0 %v4389_v41  ;;  %v4324_v41 = vcombine.high %v1012_v37, %v1016_v39  ;;  %v1006_v39 = vld [vmem:[%s6708_s3 + $0x158] sm:$0xff] }
 0x174   :  { %1867 = vmatprep.subr.bf16.mxu0 %v4398_v54  ;;  %v4331_v54 = vcombine.low %v1020_v43, %v1024_v45  ;;  %v1014_v45 = vld [vmem:[%s6708_s3 + $0x198] sm:$0xff] }
 0x177   :  { %1868 = vmatpush1.bf16.msra.mxu0 %v4397_v55  ;;  %v4340_v55 = vcombine.high %v1028_v51, %v1032_v52  ;;  %v1022_v51 = vld [vmem:[%s6708_s3 + $0x1d8] sm:$0xff] }
 0x178   :  { %v1026_v52 = vld [vmem:[%s6708_s3 + $0x1f8] sm:$0xff] }
 0x20d   :  { %v888_v61 = vpop.f32.mrb[28].mxu0 }
 0x20e   :  { %v890_v62 = vpop.f32.mrb[29].mxu0  ;;  %v927_v0 = vmul.f32 0.2, %v888_v61  ;;  %vm919_vm3 = vcmp.ge.f32.partialorder %v888_v61, 0.0 }
 0x20f   :  { %v928_v2 = vmul.f32 0.2, %v890_v62  ;;  %vm920_vm4 = vcmp.ge.f32.partialorder %v890_v62, 0.0 }
 0x210   :  { %v935_v4 = vsel %vm919_vm3, %v888_v61, %v927_v0  ;;  %v1044_v61 = vld [vmem:[%s6708_s3 + $0x288] sm:$0xff]  ;;  %v4347_v0 = vcombine.low %v1036_v56, %v1040_v57 }
 0x211   :  { %v894_v3 = vpop.f32.mrb[30].mxu0  ;;  %v936_v24 = vsel %vm920_vm4, %v890_v62, %v928_v2  ;;  %v1048_v62 = vld [vmem:[%s6708_s3 + $0x2a8] sm:$0xff] }
 0x212   :  { %vm921_vm5 = vcmp.ge.f32.partialorder %v894_v3, 0.0  ;;  %v929_v22 = vmul.f32 0.2, %v894_v3  ;;  %v896_v29 = vpop.f32.mrb[31].mxu0  ;;  %v4356_v2 = vcombine.high %v1044_v61, %v1048_v62 }
 0x213   :  { %vm922_vm6 = vcmp.ge.f32.partialorder %v896_v29, 0.0  ;;  %v930_v32 = vmul.f32 0.2, %v896_v29 }
 0x214   :  { %v937_v7 = vsel %vm921_vm5, %v894_v3, %v929_v22  ;;  %v1052_v3 = vld [vmem:[%s6708_s3 + $0x2c8] sm:$0xff] }
 0x215   :  { %v5632_v28 = vpack.c.bf16 %v937_v7, %v935_v4  ;;  %v938_v42 = vsel %vm922_vm6, %v896_v29, %v930_v32  ;;  %v900_v50 = vpop.f32.mrb[32].mxu0  ;;  %v1056_v22 = vld [vmem:[%s6708_s3 + $0x2e8] sm:$0xff]  ;;  %v4355_v29 = vcombine.low %v1044_v61, %v1048_v62  ;;  %v1038_v61 = vld [vmem:[%s6708_s3 + $0x258] sm:$0xff]  ;;  %vm4154_vm6 = vcmask 1042432  }
 0x216   :  { %v5634_v53 = vpack.c.bf16 %v938_v42, %v936_v24  ;;  %v902_v10 = vpop.f32.mrb[33].mxu0  ;;  %v931_v38 = vmul.f32 0.2, %v900_v50  ;;  %vm923_vm7 = vcmp.ge.f32.partialorder %v900_v50, 0.0  ;;  %v4364_v32 = vcombine.high %v1052_v3, %v1056_v22  ;;  %v1060_v4 = vld [vmem:[%s6708_s3 + $0x308] sm:$0xff]  ;;  %v1042_v62 = vld [vmem:[%s6708_s3 + $0x278] sm:$0xff] }
 0x217   :  { %v932_v63 = vmul.f32 0.2, %v902_v10  ;;  %vm924_vm8 = vcmp.ge.f32.partialorder %v902_v10, 0.0  ;;  %v1064_v7 = vld [vmem:[%s6708_s3 + $0x328] sm:$0xff]  ;;  %v4363_v8 = vcombine.low %v1052_v3, %v1056_v22  ;;  %v1046_v3 = vld [vmem:[%s6708_s3 + $0x298] sm:$0xff] }
 0x218   :  { %1763 = vmatprep.mubr.bf16.mxu1 %v5634_v53  ;;  %1869 = vmatprep.mubr.bf16.mxu0 %v5634_v53  ;;  %v939_v31 = vsel %vm923_vm7, %v900_v50, %v931_v38  ;;  %v4372_v18 = vcombine.high %v1060_v4, %v1064_v7  ;;  %v1068_v24 = vld [vmem:[%s6708_s3 + $0x348] sm:$0xff]  ;;  %v4371_v50 = vcombine.low %v1060_v4, %v1064_v7  ;;  %v1050_v22 = vld [vmem:[%s6708_s3 + $0x2b8] sm:$0xff]  ;;  %vm4191_vm7 = vcmask 7168  }
 0x219   :  { %v906_v6 = vpop.f32.mrb[34].mxu0  ;;  %1764 = vmatmul.mubr.bf16.vlgmr.msra.gmra.mrb[36].mxu1 %v5632_v28  ;;  %1870 = vmatmul.mubr.bf16.vlgmr.msra.gmra.mrb[36].mxu0 %v5632_v28  ;;  %v940_v1 = vsel %vm924_vm8, %v902_v10, %v932_v63  ;;  %v1072_v42 = vld [vmem:[%s6708_s3 + $0x368] sm:$0xff]  ;;  %v1054_v4 = vld [vmem:[%s6708_s3 + $0x2d8] sm:$0xff]  ;;  %vm4193_vm8 = vcmask 8192  }
 0x21a   :  { %vm925_vm9 = vcmp.ge.f32.partialorder %v906_v6, 0.0  ;;  %v933_v9 = vmul.f32 0.2, %v906_v6  ;;  %1785 = vmatpush1.bf16.msra.mxu1 %v4275_v60  ;;  %v908_v12 = vpop.f32.mrb[35].mxu0  ;;  %v4348_v60 = vcombine.high %v1036_v56, %v1040_v57  ;;  %v4380_v10 = vcombine.high %v1068_v24, %v1072_v42  ;;  %v1080_v38 = vld [vmem:[%s6708_s3 + $0x3a8] sm:$0xff]  ;;  %v1030_v56 = vld [vmem:[%s6708_s3 + $0x218] sm:$0xff] }
 0x21b   :  { %vm926_vm10 = vcmp.ge.f32.partialorder %v908_v12, 0.0  ;;  %v934_v21 = vmul.f32 0.2, %v908_v12  ;;  %1786 = vmatprep.subr.bf16.mxu1 %v4284_v11  ;;  %v1076_v11 = vld [vmem:[%s6708_s3 + $0x388] sm:$0xff]  ;;  %v4379_v44 = vcombine.low %v1068_v24, %v1072_v42  ;;  %v1034_v57 = vld [vmem:[%s6708_s3 + $0x238] sm:$0xff] }
 0x21c   :  { %v941_v17 = vsel %vm925_vm9, %v906_v6, %v933_v9  ;;  %v4388_v48 = vcombine.high %v1076_v11, %v1080_v38  ;;  %v1084_v63 = vld [vmem:[%s6708_s3 + $0x3c8] sm:$0xff]  ;;  %v4387_v9 = vcombine.low %v1076_v11, %v1080_v38  ;;  %v1058_v7 = vld [vmem:[%s6708_s3 + $0x2f8] sm:$0xff] }
 0x21d   :  { %v5652_v5 = vpack.c.bf16 %v941_v17, %v939_v31  ;;  %v942_v13 = vsel %vm926_vm10, %v908_v12, %v934_v21  ;;  %v1088_v6 = vld [vmem:[%s6708_s3 + $0x3e8] sm:$0xff]  ;;  %v970_v21 = vld [vmem:[%s6708_s3 + $0x38] sm:$0xff] }
 0x21e   :  { %v5654_v14 = vpack.c.bf16 %v942_v13, %v940_v1  ;;  %1787 = vmatpush1.bf16.msra.mxu1 %v4283_v59  ;;  %v4396_v12 = vcombine.high %v1084_v63, %v1088_v6  ;;  %v966_v59 = vld [vmem:[%s6708_s3 + $0x18] sm:$0xff] }
 0x21f   :  { %1788 = vmatprep.subr.bf16.mxu1 %v4292_v27  ;;  %v4395_v27 = vcombine.low %v1084_v63, %v1088_v6  ;;  %v4280_v31 = vcombine.high %v966_v59, %v970_v21  ;;  %v974_v17 = vld [vmem:[%s6708_s3 + $0x58] sm:$0xff]  ;;  %v4279_v26 = vcombine.low %v966_v59, %v970_v21 }
 0x220   :  { %1773 = vmatprep.mubr.bf16.mxu1 %v5654_v14  ;;  %1879 = vmatprep.mubr.bf16.mxu0 %v5654_v14  ;;  %v4288_v1 = vcombine.high %v974_v17, %v978_v23  ;;  %v982_v13 = vld [vmem:[%s6708_s3 + $0x98] sm:$0xff] }
 0x221   :  { %1774 = vmatmul.mubr.bf16.gmra.mrb[40].mxu1 %v5652_v5  ;;  %1880 = vmatmul.mubr.bf16.gmra.mrb[40].mxu0 %v5652_v5  ;;  %v1062_v24 = vld [vmem:[%s6708_s3 + $0x318] sm:$0xff] }
 0x222   :  { %1789 = vmatpush1.bf16.msra.mxu1 %v4291_v15  ;;  %1816 = vmatprep.mubr.bf16.mxu1 %v5634_v53  ;;  %v986_v15 = vld [vmem:[%s6708_s3 + $0xb8] sm:$0xff] }
 0x223   :  { %1790 = vmatprep.subr.bf16.mxu1 %v4300_v16  ;;  %2019 = vmatprep.mubr.f32.mxu0 %v5032_v49  ;;  %v4287_v16 = vcombine.low %v974_v17, %v978_v23  ;;  %v4296_v19 = vcombine.high %v982_v13, %v986_v15  ;;  %v1066_v42 = vld [vmem:[%s6708_s3 + $0x338] sm:$0xff] }
 0x224   :  { %v1070_v11 = vld [vmem:[%s6708_s3 + $0x358] sm:$0xff] }
 0x225   :  { %v1074_v38 = vld [vmem:[%s6708_s3 + $0x378] sm:$0xff] }
 0x226   :  { %1791 = vmatpush1.bf16.msra.mxu1 %v4299_v25  ;;  %v994_v25 = vld [vmem:[%s6708_s3 + $0xf8] sm:$0xff] }
 0x227   :  { %1792 = vmatprep.subr.bf16.mxu1 %v4308_v30  ;;  %v4295_v30 = vcombine.low %v982_v13, %v986_v15  ;;  %v4304_v33 = vcombine.high %v990_v20, %v994_v25  ;;  %v1078_v63 = vld [vmem:[%s6708_s3 + $0x398] sm:$0xff] }
 0x228   :  { %v1082_v6 = vld [vmem:[%s6708_s3 + $0x3b8] sm:$0xff] }
 0x229   :  { %v1086_v59 = vld [vmem:[%s6708_s3 + $0x3d8] sm:$0xff] }
 0x22a   :  { %1793 = vmatpush1.bf16.msra.mxu1 %v4307_v35  ;;  %v1002_v35 = vld [vmem:[%s6708_s3 + $0x138] sm:$0xff] }
 0x22b   :  { %1794 = vmatprep.subr.bf16.mxu1 %v4316_v36  ;;  %v4303_v36 = vcombine.low %v990_v20, %v994_v25  ;;  %v4312_v37 = vcombine.high %v998_v34, %v1002_v35  ;;  %v1090_v21 = vld [vmem:[%s6708_s3 + $0x3f8] sm:$0xff] }
 0x22c   :  { %v4399_v17 = vcombine.low %v1086_v59, %v1090_v21 }
 0x22e   :  { %1795 = vmatpush1.bf16.msra.mxu1 %v4315_v40  ;;  %v1010_v40 = vld [vmem:[%s6708_s3 + $0x178] sm:$0xff] }
 0x22f   :  { %1796 = vmatprep.subr.bf16.mxu1 %v4324_v41  ;;  %v4311_v41 = vcombine.low %v998_v34, %v1002_v35  ;;  %v4320_v43 = vcombine.high %v1006_v39, %v1010_v40 }
 0x232   :  { %1797 = vmatpush1.bf16.msra.mxu1 %v4323_v46  ;;  %v4319_v46 = vcombine.low %v1006_v39, %v1010_v40 }
 0x233   :  { %1798 = vmatprep.subr.bf16.mxu1 %v4332_v47 }
 0x236   :  { %1799 = vmatpush1.bf16.msra.mxu1 %v4331_v54 }
 0x237   :  { %1800 = vmatprep.subr.bf16.mxu1 %v4340_v55  ;;  %v4336_v55 = vcombine.high %v1022_v51, %v1026_v52 }
 0x23a   :  { %1801 = vmatpush1.bf16.msra.mxu1 %v4339_v58  ;;  %v4335_v58 = vcombine.low %v1022_v51, %v1026_v52  ;;  %v2309_v51 = vld [vmem:[%s6712_s7] sm:$0xff] }
 0x23b   :  { %1802 = vmatprep.subr.bf16.mxu1 %v4348_v60  ;;  %v4344_v60 = vcombine.high %v1030_v56, %v1034_v57 }
 0x23e   :  { %1803 = vmatpush1.bf16.msra.mxu1 %v4347_v0  ;;  %v4343_v0 = vcombine.low %v1030_v56, %v1034_v57  ;;  %v2328_v56 = vld [vmem:[%s6712_s7 + $0x98] sm:$0xff] }
 0x23f   :  { %1804 = vmatprep.subr.bf16.mxu1 %v4356_v2  ;;  %v4352_v2 = vcombine.high %v1038_v61, %v1042_v62 }
 0x242   :  { %1805 = vmatpush1.bf16.msra.mxu1 %v4355_v29  ;;  %v4351_v29 = vcombine.low %v1038_v61, %v1042_v62  ;;  %v2312_v61 = vld [vmem:[%s6712_s7 + $0x18] sm:$0xff]  ;;  %v2329_v62 = vld [vmem:[%s6712_s7 + $0xa0] sm:$0xff] }
 0x243   :  { %1806 = vmatprep.subr.bf16.mxu1 %v4364_v32  ;;  %v4360_v32 = vcombine.high %v1046_v3, %v1050_v22 }
 0x246   :  { %1807 = vmatpush1.bf16.msra.mxu1 %v4363_v8  ;;  %v4359_v8 = vcombine.low %v1046_v3, %v1050_v22  ;;  %v2313_v22 = vld [vmem:[%s6712_s7 + $0x20] sm:$0xff] }
 0x247   :  { %1808 = vmatprep.subr.bf16.mxu1 %v4372_v18  ;;  %v4368_v18 = vcombine.high %v1054_v4, %v1058_v7 }
 0x24a   :  { %1809 = vmatpush1.bf16.msra.mxu1 %v4371_v50  ;;  %v4367_v50 = vcombine.low %v1054_v4, %v1058_v7 }
 0x24b   :  { %1810 = vmatprep.subr.bf16.mxu1 %v4380_v10  ;;  %v4376_v10 = vcombine.high %v1062_v24, %v1066_v42 }
 0x24e   :  { %1811 = vmatpush1.bf16.msra.mxu1 %v4379_v44  ;;  %v4375_v44 = vcombine.low %v1062_v24, %v1066_v42 }
 0x24f   :  { %1812 = vmatprep.subr.bf16.mxu1 %v4388_v48  ;;  %v4384_v48 = vcombine.high %v1070_v11, %v1074_v38 }
 0x252   :  { %1813 = vmatpush1.bf16.msra.mxu1 %v4387_v9  ;;  %v4383_v9 = vcombine.low %v1070_v11, %v1074_v38 }
 0x253   :  { %1814 = vmatprep.subr.bf16.mxu1 %v4396_v12  ;;  %v4392_v12 = vcombine.high %v1078_v63, %v1082_v6 }
 0x256   :  { %1815 = vmatpush1.bf16.msra.mxu1 %v4395_v27  ;;  %v4391_v27 = vcombine.low %v1078_v63, %v1082_v6  ;;  %v4401_v63 = vld [vmem:[%s6709_s4 + $0x10] sm:$0xff]  ;;  %v4402_v6 = vld [vmem:[%s6709_s4 + $0x18] sm:$0xff] }
 0x257   :  { %1890 = vmatprep.subr.bf16.mxu1 %v4280_v31  ;;  %v4400_v31 = vcombine.high %v1086_v59, %v1090_v21  ;;  %v4407_v59 = vld [vmem:[%s6709_s4 + $0x20] sm:$0xff]  ;;  %v4408_v21 = vld [vmem:[%s6709_s4 + $0x28] sm:$0xff] }
 0x259   :  { %1817 = vmatmul.mubr.bf16.vlgmr.msra.gmra.mrb[44].mxu1 %v5632_v28 }
 0x25a   :  { %1826 = vmatprep.mubr.bf16.mxu1 %v5654_v14  ;;  %1891 = vmatpush1.bf16.msra.mxu1 %v4279_v26 }
 0x25b   :  { %1892 = vmatprep.subr.bf16.mxu1 %v4288_v1 }
 0x25e   :  { %1893 = vmatpush1.bf16.msra.mxu1 %v4287_v16 }
 0x25f   :  { %1894 = vmatprep.subr.bf16.mxu1 %v4296_v19 }
 0x261   :  { %1827 = vmatmul.mubr.bf16.gmra.mrb[48].mxu1 %v5652_v5 }
 0x262   :  { %1895 = vmatpush1.bf16.msra.mxu1 %v4295_v30  ;;  %1922 = vmatprep.mubr.bf16.mxu1 %v5634_v53  ;;  %v1018_v53 = vld [vmem:[%s6708_s3 + $0x1b8] sm:$0xff] }
 0x263   :  { %1896 = vmatprep.subr.bf16.mxu1 %v4304_v33  ;;  %v4328_v47 = vcombine.high %v1014_v45, %v1018_v53  ;;  %v4327_v54 = vcombine.low %v1014_v45, %v1018_v53 }
 0x266   :  { %1897 = vmatpush1.bf16.msra.mxu1 %v4303_v36 }
 0x267   :  { %1898 = vmatprep.subr.bf16.mxu1 %v4312_v37 }
 0x26a   :  { %1899 = vmatpush1.bf16.msra.mxu1 %v4311_v41 }
 0x26b   :  { %1900 = vmatprep.subr.bf16.mxu1 %v4320_v43 }
 0x26e   :  { %1901 = vmatpush1.bf16.msra.mxu1 %v4319_v46  ;;  %v2325_v46 = vld [vmem:[%s6712_s7 + $0x80] sm:$0xff] }
 0x26f   :  { %1902 = vmatprep.subr.bf16.mxu1 %v4328_v47  ;;  %v2326_v47 = vld [vmem:[%s6712_s7 + $0x88] sm:$0xff] }
 0x270   :  { %v5876_v52 = vpack.c.bf16 %v2326_v47, %v2325_v46  ;;  %v2336_v46 = vld [vmem:[%s6712_s7 + $0xd8] sm:$0xff] }
 0x272   :  { %1903 = vmatpush1.bf16.msra.mxu1 %v4327_v54  ;;  %v2310_v54 = vld [vmem:[%s6712_s7 + $0x8] sm:$0xff] }
 0x273   :  { %1904 = vmatprep.subr.bf16.mxu1 %v4336_v55  ;;  %v2327_v55 = vld [vmem:[%s6712_s7 + $0x90] sm:$0xff]  ;;  %v5887_v57 = vpack.c.bf16 %v2310_v54, %v2309_v51 }
 0x274   :  { %v2319_v51 = vld [vmem:[%s6712_s7 + $0x50] sm:$0xff] }
 0x276   :  { %1905 = vmatpush1.bf16.msra.mxu1 %v4335_v58  ;;  %v5890_v58 = vpack.c.bf16 %v2328_v56, %v2327_v55  ;;  %v2337_v55 = vld [vmem:[%s6712_s7 + $0xe0] sm:$0xff]  ;;  %v2338_v56 = vld [vmem:[%s6712_s7 + $0xe8] sm:$0xff] }
 0x277   :  { %1906 = vmatprep.subr.bf16.mxu1 %v4344_v60  ;;  %v2311_v60 = vld [vmem:[%s6712_s7 + $0x10] sm:$0xff] }
 0x27a   :  { %1907 = vmatpush1.bf16.msra.mxu1 %v4343_v0  ;;  %v2330_v0 = vld [vmem:[%s6712_s7 + $0xa8] sm:$0xff] }
 0x27b   :  { %1908 = vmatprep.subr.bf16.mxu1 %v4352_v2  ;;  %v5906_v2 = vpack.c.bf16 %v2312_v61, %v2311_v60  ;;  %v5908_v3 = vpack.c.bf16 %v2330_v0, %v2329_v62  ;;  %v2322_v60 = vld [vmem:[%s6712_s7 + $0x68] sm:$0xff]  ;;  %v2339_v62 = vld [vmem:[%s6712_s7 + $0xf0] sm:$0xff]  ;;  %v2340_v0 = vld [vmem:[%s6712_s7 + $0xf8] sm:$0xff] }
 0x27e   :  { %1909 = vmatpush1.bf16.msra.mxu1 %v4351_v29  ;;  %v2314_v29 = vld [vmem:[%s6712_s7 + $0x28] sm:$0xff] }
 0x27f   :  { %1910 = vmatprep.subr.bf16.mxu1 %v4360_v32  ;;  %v5918_v32 = vpack.c.bf16 %v2314_v29, %v2313_v22  ;;  %v2324_v22 = vld [vmem:[%s6712_s7 + $0x78] sm:$0xff] }
 0x282   :  { %1911 = vmatpush1.bf16.msra.mxu1 %v4359_v8 }
 0x283   :  { %1912 = vmatprep.subr.bf16.mxu1 %v4368_v18 }
 0x286   :  { %1913 = vmatpush1.bf16.msra.mxu1 %v4367_v50 }
 0x287   :  { %1914 = vmatprep.subr.bf16.mxu1 %v4376_v10 }
 0x28a   :  { %1915 = vmatpush1.bf16.msra.mxu1 %v4375_v44 }
 0x28b   :  { %1916 = vmatprep.subr.bf16.mxu1 %v4384_v48 }
 0x28e   :  { %1917 = vmatpush1.bf16.msra.mxu1 %v4383_v9  ;;  %v1943_v9 = vld [vmem:[%s6709_s4] sm:$0xff] }
 0x28f   :  { %1918 = vmatprep.subr.bf16.mxu1 %v4392_v12  ;;  %v1944_v12 = vld [vmem:[%s6709_s4 + $0x8] sm:$0xff] }
 0x292   :  { %1919 = vmatpush1.bf16.msra.mxu1 %v4391_v27 }
 0x293   :  { %1920 = vmatprep.subr.bf16.mxu1 %v4400_v31 }
 0x296   :  { %1921 = vmatpush1.bf16.msra.mxu1 %v4399_v17 }
 0x297   :  { %4826 = vmatprep.subr.bf16.mxu1 %v5876_v52 }
 0x299   :  { %1923 = vmatmul.mubr.bf16.vlgmr.msra.gmra.mrb[52].mxu1 %v5632_v28 }
 0x29a   :  { %1932 = vmatprep.mubr.bf16.mxu1 %v5654_v14  ;;  %4828 = vmatpush3.bf16.msra.mxu1 %v5887_v57 }
 0x29b   :  { %4830 = vmatprep.subr.bf16.mxu1 %v5890_v58 }
 0x29e   :  { %4832 = vmatpush3.bf16.msra.mxu1 %v5906_v2 }
 0x29f   :  { %4834 = vmatprep.subr.bf16.mxu1 %v5908_v3 }
 0x2a1   :  { %1933 = vmatmul.mubr.bf16.gmra.mrb[56].mxu1 %v5652_v5 }
 0x2a2   :  { %4836 = vmatpush3.bf16.msra.mxu1 %v5918_v32 }
 0x2ec   :  { %v5837_v23 = vpop.f32.mrb[36].mxu1  ;;  %v5839_v26 = vpop.f32.mrb[36].mxu0 }
 0x2ed   :  { %v5841_v1 = vpop.f32.mrb[37].mxu1  ;;  %v5843_v13 = vpop.f32.mrb[37].mxu0 }
 0x2ee   :  { %v5845_v15 = vpop.f32.mrb[38].mxu1  ;;  %v5847_v16 = vpop.f32.mrb[38].mxu0 }
 0x2ef   :  { %v4771_v19 = vpack.c.bf16 %v5845_v15, %v5837_v23  ;;  %v4779_v28 = vpack.c.bf16 %v5847_v16, %v5839_v26  ;;  %v1771_v14 = vpop.f32.mrb[39].mxu1  ;;  %v5853_v5 = vpop.f32.mrb[39].mxu0 }
 0x2f0   :  { %v4769_v20 = vpack.c.bf16 %v1771_v14, %v5841_v1  ;;  %v4777_v25 = vpack.c.bf16 %v5853_v5, %v5843_v13  ;;  %v4411_v5 = vld [vmem:[%s6709_s4 + $0x30] sm:$0xff] }
 0x2f4   :  { %v1775_v30 = vpop.f32.mrb[40].mxu1  ;;  %v5858_v33 = vpop.f32.mrb[40].mxu0 }
 0x2f5   :  { %v1777_v34 = vpop.f32.mrb[41].mxu1  ;;  %v5860_v35 = vpop.f32.mrb[41].mxu0 }
 0x2f6   :  { %v1779_v36 = vpop.f32.mrb[42].mxu1  ;;  %v5862_v37 = vpop.f32.mrb[42].mxu0 }
 0x2f7   :  { %v4775_v39 = vpack.c.bf16 %v1779_v36, %v1775_v30  ;;  %v4783_v40 = vpack.c.bf16 %v5862_v37, %v5858_v33  ;;  %v1781_v41 = vpop.f32.mrb[43].mxu1  ;;  %v1887_v43 = vpop.f32.mrb[43].mxu0  ;;  %v2332_v30 = vld [vmem:[%s6712_s7 + $0xb8] sm:$0xff]  ;;  %v2333_v37 = vld [vmem:[%s6712_s7 + $0xc0] sm:$0xff] }
 0x2f8   :  { %v4773_v45 = vpack.c.bf16 %v1781_v41, %v1777_v34  ;;  %v4781_v53 = vpack.c.bf16 %v1887_v43, %v5860_v35  ;;  %v2315_v34 = vld [vmem:[%s6712_s7 + $0x30] sm:$0xff]  ;;  %v2316_v35 = vld [vmem:[%s6712_s7 + $0x38] sm:$0xff]  ;;  %v2317_v41 = vld [vmem:[%s6712_s7 + $0x40] sm:$0xff] }
 0x2f9   :  { %v4807_v36 = vpack.c.bf16 %v2316_v35, %v2315_v34  ;;  %v2318_v43 = vld [vmem:[%s6712_s7 + $0x48] sm:$0xff]  ;;  %v2584_v34 = vld [vmem:[%s6713_s8] sm:$0xff] }
 0x2fa   :  { %v2588_v35 = vld [vmem:[%s6713_s8 + $0x20] sm:$0xff] }
 0x32c   :  { %v1818_v4 = vpop.f32.mrb[44].mxu1 }
 0x32d   :  { %v1820_v7 = vpop.f32.mrb[45].mxu1 }
 0x32e   :  { %v1822_v8 = vpop.f32.mrb[46].mxu1 }
 0x32f   :  { %v4763_v18 = vpack.c.bf16 %v1822_v8, %v1818_v4  ;;  %v1824_v24 = vpop.f32.mrb[47].mxu1 }
 0x330   :  { %v4761_v42 = vpack.c.bf16 %v1824_v24, %v1820_v7 }
 0x332   :  { %4762 = vmatprep.subr.bf16.mxu0 %v4761_v42 }
 0x333   :  { %4764 = vmatpush1.bf16.msra.mxu0 %v4763_v18 }
 0x334   :  { %v1828_v50 = vpop.f32.mrb[48].mxu1 }
 0x335   :  { %v1830_v10 = vpop.f32.mrb[49].mxu1 }
 0x336   :  { %v1832_v11 = vpop.f32.mrb[50].mxu1 }
 0x337   :  { %v4767_v38 = vpack.c.bf16 %v1832_v11, %v1828_v50  ;;  %v1834_v44 = vpop.f32.mrb[51].mxu1 }
 0x338   :  { %v4765_v48 = vpack.c.bf16 %v1834_v44, %v1830_v10 }
 0x33a   :  { %4766 = vmatprep.subr.bf16.mxu0 %v4765_v48 }
 0x33b   :  { %4768 = vmatpush1.bf16.msra.mxu0 %v4767_v38 }
 0x33c   :  { %4770 = vmatprep.subr.bf16.mxu0 %v4769_v20  ;;  %v4412_v20 = vld [vmem:[%s6709_s4 + $0x38] sm:$0xff] }
 0x33e   :  { %4403 = vmatmul.mubr.msk.f32.vlgmr.msra.gmra.mrb[44].mxu0 %vm1948_vm11, %v4401_v63 }
 0x33f   :  { %4772 = vmatpush1.bf16.msra.mxu0 %v4771_v19  ;;  %2025 = vmatprep.mubr.f32.mxu0 %v5032_v49 }
 0x340   :  { %4774 = vmatprep.subr.bf16.mxu0 %v4773_v45  ;;  %v4811_v45 = vpack.c.bf16 %v2318_v43, %v2317_v41  ;;  %v2592_v41 = vld [vmem:[%s6713_s8 + $0x40] sm:$0xff] }
 0x341   :  { %v2596_v43 = vld [vmem:[%s6713_s8 + $0x60] sm:$0xff] }
 0x342   :  { %4404 = vmatmul.mubr.msk.f32.gmra.mrb[46].mxu0 %vm1948_vm11, %v4402_v6 }
 0x343   :  { %4776 = vmatpush1.bf16.msra.mxu0 %v4775_v39  ;;  %2102 = vmatprep.mubr.f32.mxu0 %v5032_v49  ;;  %v2334_v39 = vld [vmem:[%s6712_s7 + $0xc8] sm:$0xff] }
 0x344   :  { %4778 = vmatprep.subr.bf16.mxu0 %v4777_v25  ;;  %v2331_v25 = vld [vmem:[%s6712_s7 + $0xb0] sm:$0xff] }
 0x345   :  { %v4805_v33 = vpack.c.bf16 %v2332_v30, %v2331_v25 }
 0x346   :  { %4405 = vmatmul.mubr.msk.f32.vlgmr.msra.gmra.mrb[44].mxu0 %vm1948_vm11, %v1943_v9 }
 0x347   :  { %4780 = vmatpush1.bf16.msra.mxu0 %v4779_v28  ;;  %2108 = vmatprep.mubr.f32.mxu0 %v5032_v49 }
 0x348   :  { %4782 = vmatprep.subr.bf16.mxu0 %v4781_v53  ;;  %4838 = vmatprep.subr.bf16.mxu1 %v4805_v33  ;;  %v2335_v53 = vld [vmem:[%s6712_s7 + $0xd0] sm:$0xff] }
 0x349   :  { %4840 = vmatpush3.bf16.msra.mxu1 %v4807_v36  ;;  %v4813_v47 = vpack.c.bf16 %v2336_v46, %v2335_v53  ;;  %v4424_v46 = vcombine.high %v2592_v41, %v2596_v43 }
 0x34a   :  { %4406 = vmatmul.mubr.msk.f32.gmra.mrb[46].mxu0 %vm1948_vm11, %v1944_v12 }
 0x34b   :  { %4784 = vmatpush1.bf16.msra.mxu0 %v4783_v40  ;;  %2188 = vmatprep.mubr.f32.mxu0 %v5032_v49  ;;  %v4809_v40 = vpack.c.bf16 %v2334_v39, %v2333_v37  ;;  %v4415_v37 = vcombine.low %v2584_v34, %v2588_v35  ;;  %v4416_v39 = vcombine.high %v2584_v34, %v2588_v35 }
 0x34d   :  { %4842 = vmatprep.subr.bf16.mxu1 %v4809_v40 }
 0x34e   :  { %4409 = vmatmul.mubr.msk.f32.vlgmr.msra.gmra.mrb[44].mxu0 %vm1948_vm11, %v4407_v59  ;;  %4844 = vmatpush3.bf16.msra.mxu1 %v4811_v45 }
 0x34f   :  { %2194 = vmatprep.mubr.f32.mxu0 %v5032_v49  ;;  %4846 = vmatprep.subr.bf16.mxu1 %v4813_v47 }
 0x352   :  { %4410 = vmatmul.mubr.msk.f32.gmra.mrb[46].mxu0 %vm1948_vm11, %v4408_v21 }
 0x353   :  { %2278 = vmatprep.mubr.f32.mxu0 %v5032_v49 }
 0x36c   :  { %v1924_v27 = vpop.f32.mrb[52].mxu1 }
 0x36d   :  { %v1926_v31 = vpop.f32.mrb[53].mxu1 }
 0x36e   :  { %v1928_v17 = vpop.f32.mrb[54].mxu1 }
 0x36f   :  { %v4787_v23 = vpack.c.bf16 %v1928_v17, %v1924_v27  ;;  %v1930_v26 = vpop.f32.mrb[55].mxu1 }
 0x370   :  { %v4785_v1 = vpack.c.bf16 %v1930_v26, %v1926_v31 }
 0x372   :  { %4786 = vmatprep.subr.bf16.mxu0 %v4785_v1 }
 0x373   :  { %4788 = vmatpush1.bf16.msra.mxu0 %v4787_v23 }
 0x374   :  { %v1934_v13 = vpop.f32.mrb[56].mxu1 }
 0x375   :  { %v1936_v15 = vpop.f32.mrb[57].mxu1 }
 0x376   :  { %v1938_v16 = vpop.f32.mrb[58].mxu1 }
 0x377   :  { %v4791_v19 = vpack.c.bf16 %v1938_v16, %v1934_v13  ;;  %v1940_v28 = vpop.f32.mrb[59].mxu1 }
 0x378   :  { %v4789_v14 = vpack.c.bf16 %v1940_v28, %v1936_v15 }
 0x37a   :  { %4790 = vmatprep.subr.bf16.mxu0 %v4789_v14 }
 0x37b   :  { %4792 = vmatpush1.bf16.msra.mxu0 %v4791_v19 }
 0x37c   :  { %4794 = vmatprep.subr.bf16.mxu0 %v5876_v52  ;;  %v2320_v52 = vld [vmem:[%s6712_s7 + $0x58] sm:$0xff] }
 0x37d   :  { %v4815_v54 = vpack.c.bf16 %v2320_v52, %v2319_v51  ;;  %v2597_v51 = vld [vmem:[%s6713_s8 + $0x68] sm:$0xff]  ;;  %v2600_v52 = vld [vmem:[%s6713_s8 + $0x80] sm:$0xff] }
 0x37e   :  { %4413 = vmatmul.mubr.msk.f32.vlgmr.msra.gmra.mrb[44].mxu0 %vm1948_vm11, %v4411_v5 }
 0x37f   :  { %2284 = vmatprep.mubr.f32.mxu0 %v5032_v49  ;;  %4796 = vmatpush3.bf16.msra.mxu0 %v5887_v57  ;;  %v4817_v57 = vpack.c.bf16 %v2338_v56, %v2337_v55  ;;  %v2604_v55 = vld [vmem:[%s6713_s8 + $0xa0] sm:$0xff]  ;;  %v2601_v56 = vld [vmem:[%s6713_s8 + $0x88] sm:$0xff] }
 0x380   :  { %4798 = vmatprep.subr.bf16.mxu0 %v5890_v58  ;;  %4848 = vmatpush3.bf16.msra.mxu1 %v4815_v54  ;;  %v2321_v58 = vld [vmem:[%s6712_s7 + $0x60] sm:$0xff] }
 0x381   :  { %v4819_v61 = vpack.c.bf16 %v2322_v60, %v2321_v58  ;;  %4850 = vmatprep.subr.bf16.mxu1 %v4817_v57  ;;  %v4423_v58 = vcombine.low %v2592_v41, %v2596_v43  ;;  %v2653_v41 = vld [vmem:[%s6713_s8 + $0x228] sm:$0xff] }
 0x382   :  { %4414 = vmatmul.mubr.msk.f32.gmra.mrb[46].mxu0 %vm1948_vm11, %v4412_v20 }
 0x383   :  { %4800 = vmatpush3.bf16.msra.mxu0 %v5906_v2  ;;  %v4821_v2 = vpack.c.bf16 %v2340_v0, %v2339_v62  ;;  %v2608_v0 = vld [vmem:[%s6713_s8 + $0xc0] sm:$0xff] }
 0x384   :  { %4802 = vmatprep.subr.bf16.mxu0 %v5908_v3  ;;  %4852 = vmatpush3.bf16.msra.mxu1 %v4819_v61  ;;  %v2323_v3 = vld [vmem:[%s6712_s7 + $0x70] sm:$0xff]  ;;  %s5035_s7 = smov 64  }
 0x385   :  { %v4823_v29 = vpack.c.bf16 %v2324_v22, %v2323_v3  ;;  %4854 = vmatprep.subr.bf16.mxu1 %v4821_v2  ;;  %v2609_v3 = vld [vmem:[%s6713_s8 + $0xc8] sm:$0xff] }
 0x386   :  { %v2613_v22 = vld [vmem:[%s6713_s8 + $0xe8] sm:$0xff] }
 0x387   :  { %4804 = vmatpush3.bf16.msra.mxu0 %v5918_v32 }
 0x388   :  { %4806 = vmatprep.subr.bf16.mxu0 %v4805_v33  ;;  %4856 = vmatpush3.bf16.msra.mxu1 %v4823_v29 }
 0x38b   :  { %4808 = vmatpush3.bf16.msra.mxu0 %v4807_v36  ;;  %v2585_v36 = vld [vmem:[%s6713_s8 + $0x8] sm:$0xff] }
 0x38c   :  { %4810 = vmatprep.subr.bf16.mxu0 %v4809_v40  ;;  %v2589_v40 = vld [vmem:[%s6713_s8 + $0x28] sm:$0xff] }
 0x38d   :  { %v4418_v53 = vcombine.high %v2585_v36, %v2589_v40 }
 0x38f   :  { %4812 = vmatpush3.bf16.msra.mxu0 %v4811_v45  ;;  %v4417_v45 = vcombine.low %v2585_v36, %v2589_v40  ;;  %3395 = vmatprep.subr.bf16.mxu1 %v4418_v53  ;;  %v2649_v40 = vld [vmem:[%s6713_s8 + $0x208] sm:$0xff] }
 0x390   :  { %4814 = vmatprep.subr.bf16.mxu0 %v4813_v47  ;;  %v2593_v47 = vld [vmem:[%s6713_s8 + $0x48] sm:$0xff] }
 0x391   :  { %v4425_v60 = vcombine.low %v2593_v47, %v2597_v51 }
 0x393   :  { %4816 = vmatpush3.bf16.msra.mxu0 %v4815_v54  ;;  %v4426_v54 = vcombine.high %v2593_v47, %v2597_v51  ;;  %v2656_v47 = vld [vmem:[%s6713_s8 + $0x240] sm:$0xff] }
 0x394   :  { %4818 = vmatprep.subr.bf16.mxu0 %v4817_v57  ;;  %v2605_v57 = vld [vmem:[%s6713_s8 + $0xa8] sm:$0xff]  ;;  %v2660_v51 = vld [vmem:[%s6713_s8 + $0x260] sm:$0xff] }
 0x395   :  { %v4434_v62 = vcombine.high %v2601_v56, %v2605_v57 }
 0x397   :  { %4820 = vmatpush3.bf16.msra.mxu0 %v4819_v61  ;;  %v4432_v61 = vcombine.high %v2600_v52, %v2604_v55 }
 0x398   :  { %4822 = vmatprep.subr.bf16.mxu0 %v4821_v2  ;;  %v2612_v2 = vld [vmem:[%s6713_s8 + $0xe0] sm:$0xff] }
 0x39b   :  { %4824 = vmatpush3.bf16.msra.mxu0 %v4823_v29  ;;  %v4431_v29 = vcombine.low %v2600_v52, %v2604_v55  ;;  %v2657_v52 = vld [vmem:[%s6713_s8 + $0x248] sm:$0xff] }
 0x39c   :  { %3352 = vmatprep.subr.bf16.mxu0 %v4416_v39  ;;  %v2652_v39 = vld [vmem:[%s6713_s8 + $0x220] sm:$0xff] }
 0x451   :  { %v6035_v32 = vpop.f32.mrb[44].mxu0 }
 0x452   :  { %v6037_v4 = vpop.f32.mrb[45].mxu0  ;;  %v2411_v8 = vmul.f32 %v6035_v32, %v6035_v32 }
 0x453   :  { %v2412_v50 = vmul.f32 %v6037_v4, %v6037_v4 }
 0x455   :  { %v6039_v7 = vpop.f32.mrb[46].mxu0 }
 0x456   :  { %v2295_v18 = vadd.f32 %v6039_v7, %v6035_v32  ;;  %v2413_v24 = vmul.f32 %v6039_v7, %v6039_v7  ;;  %v6047_v42 = vpop.f32.mrb[47].mxu0 }
 0x457   :  { %v2302_v10 = vadd.f32 %v6047_v42, %v6037_v4  ;;  %v2414_v11 = vmul.f32 %v6047_v42, %v6047_v42 }
 0x458   :  { %v2296_v38 = vrot.slane %v2295_v18, 4  ;;  %v2415_v44 = vadd.f32 %v2413_v24, %v2411_v8  ;;  %v4433_v8 = vcombine.low %v2601_v56, %v2605_v57  ;;  %v4442_v24 = vcombine.high %v2609_v3, %v2613_v22 }
 0x459   :  { %v2303_v48 = vrot.slane %v2302_v10, 4  ;;  %v2422_v63 = vadd.f32 %v2414_v11, %v2412_v50  ;;  %v2616_v50 = vld [vmem:[%s6713_s8 + $0x100] sm:$0xff]  ;;  %v2617_v11 = vld [vmem:[%s6713_s8 + $0x108] sm:$0xff]  ;;  %v4481_v56 = vcombine.low %v2649_v40, %v2653_v41  ;;  %v4488_v57 = vcombine.high %v2656_v47, %v2660_v51 }
 0x45a   :  { %v2297_v6 = vadd.f32 %v2296_v38, %v2295_v18  ;;  %v2416_v9 = vrot.slane %v2415_v44, 4  ;;  %v4440_v18 = vcombine.high %v2608_v0, %v2612_v2  ;;  %v2621_v38 = vld [vmem:[%s6713_s8 + $0x128] sm:$0xff] }
 0x45b   :  { %v2304_v12 = vadd.f32 %v2303_v48, %v2302_v10  ;;  %v2423_v59 = vrot.slane %v2422_v63, 4  ;;  %v2620_v10 = vld [vmem:[%s6713_s8 + $0x120] sm:$0xff]  ;;  %v4441_v48 = vcombine.low %v2609_v3, %v2613_v22 }
 0x45c   :  { %v2298_v21 = vrot.slane %v2297_v6, 2  ;;  %v2417_v27 = vadd.f32 %v2416_v9, %v2415_v44  ;;  %v4439_v44 = vcombine.low %v2608_v0, %v2612_v2  ;;  %v2624_v9 = vld [vmem:[%s6713_s8 + $0x140] sm:$0xff]  ;;  %v2669_v0 = vld [vmem:[%s6713_s8 + $0x2a8] sm:$0xff]  ;;  %v4487_v2 = vcombine.low %v2656_v47, %v2660_v51 }
 0x45d   :  { %v2305_v31 = vrot.slane %v2304_v12, 2  ;;  %v2424_v17 = vadd.f32 %v2423_v59, %v2422_v63  ;;  %v4448_v63 = vcombine.high %v2616_v50, %v2620_v10  ;;  %v2625_v59 = vld [vmem:[%s6713_s8 + $0x148] sm:$0xff]  ;;  %v2696_v47 = vld [vmem:[%s6713_s8 + $0x380] sm:$0xff] }
 0x45e   :  { %v2299_v23 = vadd.f32 %v2298_v21, %v2297_v6  ;;  %v2418_v26 = vrot.slane %v2417_v27, 2  ;;  %v4450_v6 = vcombine.high %v2617_v11, %v2621_v38  ;;  %v2629_v21 = vld [vmem:[%s6713_s8 + $0x168] sm:$0xff]  ;;  %v2700_v51 = vld [vmem:[%s6713_s8 + $0x3a0] sm:$0xff] }
 0x45f   :  { %v2306_v1 = vadd.f32 %v2305_v31, %v2304_v12  ;;  %v2425_v13 = vrot.slane %v2424_v17, 2  ;;  %v2628_v12 = vld [vmem:[%s6713_s8 + $0x160] sm:$0xff]  ;;  %v4449_v31 = vcombine.low %v2617_v11, %v2621_v38 }
 0x460   :  { %v2300_v15 = vrot.slane %v2299_v23, 1  ;;  %v2419_v16 = vadd.f32 %v2418_v26, %v2417_v27  ;;  %v4447_v27 = vcombine.low %v2616_v50, %v2620_v10  ;;  %v2632_v26 = vld [vmem:[%s6713_s8 + $0x180] sm:$0xff]  ;;  %v2677_v50 = vld [vmem:[%s6713_s8 + $0x2e8] sm:$0xff] }
 0x461   :  { %v2307_v19 = vrot.slane %v2306_v1, 1  ;;  %v2426_v28 = vadd.f32 %v2425_v13, %v2424_v17  ;;  %v4456_v17 = vcombine.high %v2624_v9, %v2628_v12  ;;  %v2633_v13 = vld [vmem:[%s6713_s8 + $0x188] sm:$0xff] }
 0x462   :  { %v2420_v14 = vrot.slane %v2419_v16, 1  ;;  %v2301_v25 = vadd.f32 %v2300_v15, %v2299_v23  ;;  %v4458_v23 = vcombine.high %v2625_v59, %v2629_v21  ;;  %v2637_v15 = vld [vmem:[%s6713_s8 + $0x1a8] sm:$0xff] }
 0x463   :  { %v2308_v5 = vadd.f32 %v2307_v19, %v2306_v1  ;;  %v2427_v20 = vrot.slane %v2426_v28, 1  ;;  %v2636_v1 = vld [vmem:[%s6713_s8 + $0x1a0] sm:$0xff]  ;;  %v4457_v19 = vcombine.low %v2625_v59, %v2629_v21  ;;  %v4465_v34 = vcombine.low %v2633_v13, %v2637_v15 }
 0x464   :  { %v2421_v33 = vadd.f32 %v2420_v14, %v2419_v16  ;;  %v4455_v16 = vcombine.low %v2624_v9, %v2628_v12  ;;  %v4466_v14 = vcombine.high %v2633_v13, %v2637_v15  ;;  %v2512_v13 = vlaneseq  ;;  %v2680_v15 = vld [vmem:[%s6713_s8 + $0x300] sm:$0xff] }
 0x465   :  { %2405 = vmatprep.mubr.f32.mxu0 %v2308_v5  ;;  %v2428_v30 = vadd.f32 %v2427_v20, %v2426_v28  ;;  %v4464_v28 = vcombine.high %v2632_v26, %v2636_v1  ;;  %v2640_v5 = vld [vmem:[%s6713_s8 + $0x1c0] sm:$0xff] }
 0x466   :  { %2406 = vmatmul.mubr.f32.vlgmr.msra.gmra.mrb[48].mxu0 %v2301_v25  ;;  %v2644_v20 = vld [vmem:[%s6713_s8 + $0x1e0] sm:$0xff]  ;;  %v2641_v25 = vld [vmem:[%s6713_s8 + $0x1c8] sm:$0xff] }
 0x467   :  { %2493 = vmatprep.mubr.f32.mxu1 %v2428_v30  ;;  %3353 = vmatpush1.bf16.msra.mxu0 %v4415_v37  ;;  %v2645_v30 = vld [vmem:[%s6713_s8 + $0x1e8] sm:$0xff]  ;;  %v4472_v35 = vcombine.high %v2640_v5, %v2644_v20  ;;  %v2648_v37 = vld [vmem:[%s6713_s8 + $0x200] sm:$0xff]  ;;  %v4471_v43 = vcombine.low %v2640_v5, %v2644_v20 }
 0x468   :  { %2494 = vmatmul.mubr.f32.vlgmr.msra.gmra.mrb[60].mxu1 %v2421_v33  ;;  %3354 = vmatprep.subr.bf16.mxu0 %v4424_v46  ;;  %v4463_v33 = vcombine.low %v2632_v26, %v2636_v1  ;;  %v4474_v36 = vcombine.high %v2641_v25, %v2645_v30  ;;  %v4480_v53 = vcombine.high %v2648_v37, %v2652_v39  ;;  %v2685_v5 = vld [vmem:[%s6713_s8 + $0x328] sm:$0xff] }
 0x469   :  { %3396 = vmatpush1.bf16.msra.mxu1 %v4417_v45  ;;  %v4473_v45 = vcombine.low %v2641_v25, %v2645_v30  ;;  %v4482_v46 = vcombine.high %v2649_v40, %v2653_v41  ;;  %v4479_v55 = vcombine.low %v2648_v37, %v2652_v39  ;;  %v2513_v30 = vshrl.u32 %v2512_v13, 7  ;;  %v2693_v37 = vld [vmem:[%s6713_s8 + $0x368] sm:$0xff]  ;;  %v2504_v39 = vld [vmem:[%s6710_s5] sm:$0x1] }
 0x46a   :  { %3397 = vmatprep.subr.bf16.mxu1 %v4426_v54  ;;  %v2661_v54 = vld [vmem:[%s6713_s8 + $0x268] sm:$0xff] }
 0x46b   :  { %3355 = vmatpush1.bf16.msra.mxu0 %v4423_v58  ;;  %v4490_v58 = vcombine.high %v2657_v52, %v2661_v54  ;;  %v4489_v3 = vcombine.low %v2657_v52, %v2661_v54  ;;  %v2697_v52 = vld [vmem:[%s6713_s8 + $0x388] sm:$0xff]  ;;  %v2508_v54 = vld [vmem:[%s6711_s6] sm:$0x1] }
 0x46c   :  { %3356 = vmatprep.subr.bf16.mxu0 %v4432_v61  ;;  %v2668_v61 = vld [vmem:[%s6713_s8 + $0x2a0] sm:$0xff] }
 0x46d   :  { %3398 = vmatpush1.bf16.msra.mxu1 %v4425_v60  ;;  %v2664_v60 = vld [vmem:[%s6713_s8 + $0x280] sm:$0xff] }
 0x46e   :  { %3399 = vmatprep.subr.bf16.mxu1 %v4434_v62  ;;  %v2665_v62 = vld [vmem:[%s6713_s8 + $0x288] sm:$0xff]  ;;  %v4496_v22 = vcombine.high %v2664_v60, %v2668_v61  ;;  %v4495_v10 = vcombine.low %v2664_v60, %v2668_v61  ;;  %v4527_v60 = vcombine.low %v2696_v47, %v2700_v51 }
 0x46f   :  { %3357 = vmatpush1.bf16.msra.mxu0 %v4431_v29  ;;  %v4498_v29 = vcombine.high %v2665_v62, %v2669_v0  ;;  %v4497_v11 = vcombine.low %v2665_v62, %v2669_v0  ;;  %v2704_v0 = vld [vmem:[%s6713_s8 + $0x3c0] sm:$0xff] }
 0x470   :  { %3358 = vmatprep.subr.bf16.mxu0 %v4440_v18  ;;  %v2676_v18 = vld [vmem:[%s6713_s8 + $0x2e0] sm:$0xff] }
 0x471   :  { %3400 = vmatpush1.bf16.msra.mxu1 %v4433_v8  ;;  %v2672_v8 = vld [vmem:[%s6713_s8 + $0x2c0] sm:$0xff] }
 0x472   :  { %3401 = vmatprep.subr.bf16.mxu1 %v4442_v24  ;;  %v2673_v24 = vld [vmem:[%s6713_s8 + $0x2c8] sm:$0xff]  ;;  %v4504_v38 = vcombine.high %v2672_v8, %v2676_v18 }
 0x473   :  { %3359 = vmatpush1.bf16.msra.mxu0 %v4439_v44  ;;  %v4506_v44 = vcombine.high %v2673_v24, %v2677_v50 }
 0x474   :  { %3360 = vmatprep.subr.bf16.mxu0 %v4448_v63  ;;  %v4505_v63 = vcombine.low %v2673_v24, %v2677_v50 }
 0x475   :  { %3402 = vmatpush1.bf16.msra.mxu1 %v4441_v48  ;;  %v4503_v48 = vcombine.low %v2672_v8, %v2676_v18  ;;  %v2709_v8 = vld [vmem:[%s6713_s8 + $0x3e8] sm:$0xff] }
 0x476   :  { %3403 = vmatprep.subr.bf16.mxu1 %v4450_v6 }
 0x477   :  { %3361 = vmatpush1.bf16.msra.mxu0 %v4447_v27 }
 0x478   :  { %3362 = vmatprep.subr.bf16.mxu0 %v4456_v17 }
 0x479   :  { %3404 = vmatpush1.bf16.msra.mxu1 %v4449_v31 }
 0x47a   :  { %3405 = vmatprep.subr.bf16.mxu1 %v4458_v23 }
 0x47b   :  { %3363 = vmatpush1.bf16.msra.mxu0 %v4455_v16  ;;  %v2684_v16 = vld [vmem:[%s6713_s8 + $0x320] sm:$0xff] }
 0x47c   :  { %3364 = vmatprep.subr.bf16.mxu0 %v4464_v28  ;;  %v4511_v28 = vcombine.low %v2680_v15, %v2684_v16 }
 0x47d   :  { %3406 = vmatpush1.bf16.msra.mxu1 %v4457_v19  ;;  %v2681_v19 = vld [vmem:[%s6713_s8 + $0x308] sm:$0xff] }
 0x47e   :  { %3407 = vmatprep.subr.bf16.mxu1 %v4466_v14  ;;  %v4512_v14 = vcombine.high %v2680_v15, %v2684_v16  ;;  %v4513_v20 = vcombine.low %v2681_v19, %v2685_v5  ;;  %v4514_v25 = vcombine.high %v2681_v19, %v2685_v5 }
 0x47f   :  { %3365 = vmatpush1.bf16.msra.mxu0 %v4463_v33  ;;  %v2688_v33 = vld [vmem:[%s6713_s8 + $0x340] sm:$0xff] }
 0x480   :  { %3366 = vmatprep.subr.bf16.mxu0 %v4472_v35  ;;  %v2689_v35 = vld [vmem:[%s6713_s8 + $0x348] sm:$0xff] }
 0x481   :  { %3408 = vmatpush1.bf16.msra.mxu1 %v4465_v34  ;;  %v2692_v34 = vld [vmem:[%s6713_s8 + $0x360] sm:$0xff]  ;;  %v4521_v41 = vcombine.low %v2689_v35, %v2693_v37 }
 0x482   :  { %3409 = vmatprep.subr.bf16.mxu1 %v4474_v36  ;;  %v4520_v36 = vcombine.high %v2688_v33, %v2692_v34  ;;  %v4519_v40 = vcombine.low %v2688_v33, %v2692_v34 }
 0x483   :  { %3367 = vmatpush1.bf16.msra.mxu0 %v4471_v43  ;;  %v4522_v43 = vcombine.high %v2689_v35, %v2693_v37 }
 0x484   :  { %3368 = vmatprep.subr.bf16.mxu0 %v4480_v53 }
 0x485   :  { %3410 = vmatpush1.bf16.msra.mxu1 %v4473_v45  ;;  %v6226_v45 = vsub.s32 0, %v2513_v30 }
 0x486   :  { %3411 = vmatprep.subr.bf16.mxu1 %v4482_v46 }
 0x487   :  { %3369 = vmatpush1.bf16.msra.mxu0 %v4479_v55  ;;  %v4528_v55 = vcombine.high %v2696_v47, %v2700_v51 }
 0x488   :  { %3370 = vmatprep.subr.bf16.mxu0 %v4488_v57 }
 0x489   :  { %3412 = vmatpush1.bf16.msra.mxu1 %v4481_v56  ;;  %v2701_v56 = vld [vmem:[%s6713_s8 + $0x3a8] sm:$0xff] }
 0x48a   :  { %3413 = vmatprep.subr.bf16.mxu1 %v4490_v58  ;;  %v4529_v61 = vcombine.low %v2697_v52, %v2701_v56  ;;  %v4530_v62 = vcombine.high %v2697_v52, %v2701_v56 }
 0x48b   :  { %3371 = vmatpush1.bf16.msra.mxu0 %v4487_v2  ;;  %v2708_v2 = vld [vmem:[%s6713_s8 + $0x3e0] sm:$0xff] }
 0x48c   :  { %3372 = vmatprep.subr.bf16.mxu0 %v4496_v22  ;;  %v4535_v18 = vcombine.low %v2704_v0, %v2708_v2 }
 0x48d   :  { %3414 = vmatpush1.bf16.msra.mxu1 %v4489_v3  ;;  %v2705_v3 = vld [vmem:[%s6713_s8 + $0x3c8] sm:$0xff] }
 0x48e   :  { %3415 = vmatprep.subr.bf16.mxu1 %v4498_v29  ;;  %v4536_v29 = vcombine.high %v2704_v0, %v2708_v2  ;;  %v4538_v24 = vcombine.high %v2705_v3, %v2709_v8 }
 0x48f   :  { %3373 = vmatpush1.bf16.msra.mxu0 %v4495_v10  ;;  %v4537_v10 = vcombine.low %v2705_v3, %v2709_v8  ;;  %v2610_v3 = vld [vmem:[%s6713_s8 + $0xd0] sm:$0xff]  ;;  %v2615_v8 = vld [vmem:[%s6713_s8 + $0xf8] sm:$0xff] }
 0x490   :  { %3374 = vmatprep.subr.bf16.mxu0 %v4504_v38  ;;  %v6267_v38 = vld [vmem:[%s6713_s8 + $0x30] sm:$0xff] }
 0x491   :  { %3416 = vmatpush1.bf16.msra.mxu1 %v4497_v11  ;;  %v6262_v11 = vld [vmem:[%s6713_s8 + $0x10] sm:$0xff] }
 0x492   :  { %3417 = vmatprep.subr.bf16.mxu1 %v4506_v44  ;;  %v4420_v44 = vcombine.high %v6262_v11, %v6267_v38 }
 0x493   :  { %3375 = vmatpush1.bf16.msra.mxu0 %v4503_v48  ;;  %v2587_v48 = vld [vmem:[%s6713_s8 + $0x18] sm:$0xff] }
 0x494   :  { %3376 = vmatprep.subr.bf16.mxu0 %v4512_v14 }
 0x495   :  { %3418 = vmatpush1.bf16.msra.mxu1 %v4505_v63  ;;  %v2591_v63 = vld [vmem:[%s6713_s8 + $0x38] sm:$0xff] }
 0x496   :  { %3419 = vmatprep.subr.bf16.mxu1 %v4514_v25 }
 0x497   :  { %3377 = vmatpush1.bf16.msra.mxu0 %v4511_v28 }
 0x498   :  { %3378 = vmatprep.subr.bf16.mxu0 %v4520_v36 }
 0x499   :  { %3420 = vmatpush1.bf16.msra.mxu1 %v4513_v20 }
 0x49a   :  { %3421 = vmatprep.subr.bf16.mxu1 %v4522_v43  ;;  %v2595_v43 = vld [vmem:[%s6713_s8 + $0x58] sm:$0xff] }
 0x49b   :  { %3379 = vmatpush1.bf16.msra.mxu0 %v4519_v40 }
 0x49c   :  { %3380 = vmatprep.subr.bf16.mxu0 %v4528_v55 }
 0x49d   :  { %3422 = vmatpush1.bf16.msra.mxu1 %v4521_v41  ;;  %v2598_v41 = vld [vmem:[%s6713_s8 + $0x70] sm:$0xff] }
 0x49e   :  { %3423 = vmatprep.subr.bf16.mxu1 %v4530_v62 }
 0x49f   :  { %3381 = vmatpush1.bf16.msra.mxu0 %v4527_v60  ;;  %v2607_v60 = vld [vmem:[%s6713_s8 + $0xb8] sm:$0xff] }
 0x4a0   :  { %3382 = vmatprep.subr.bf16.mxu0 %v4536_v29  ;;  %v2611_v29 = vld [vmem:[%s6713_s8 + $0xd8] sm:$0xff] }
 0x4a1   :  { %3424 = vmatpush1.bf16.msra.mxu1 %v4529_v61 }
 0x4a2   :  { %3425 = vmatprep.subr.bf16.mxu1 %v4538_v24 }
 0x4a3   :  { %3383 = vmatpush1.bf16.msra.mxu0 %v4535_v18 }
 0x4a4   :  { %3438 = vmatprep.subr.bf16.mxu0 %v4420_v44  ;;  %v2619_v44 = vld [vmem:[%s6713_s8 + $0x118] sm:$0xff] }
 0x4a5   :  { %3426 = vmatpush1.bf16.msra.mxu1 %v4537_v10  ;;  %v4446_v10 = vcombine.high %v2611_v29, %v2615_v8 }
 0x539   :  { %v4589_v6 = vpop.f32.mrb[48].mxu0 }
 0x53a   :  { %v4590_v9 = vpop.f32.mrb[49].mxu0 }
 0x53b   :  { %v4591_v12 = vadd.f32 %v4590_v9, %v4589_v6  ;;  %v4624_v59 = vpop.f32.mrb[60].mxu1  ;;  %v4419_v6 = vcombine.low %v6262_v11, %v6267_v38  ;;  %v4421_v9 = vcombine.low %v2587_v48, %v2591_v63  ;;  %v2618_v11 = vld [vmem:[%s6713_s8 + $0x110] sm:$0xff] }
 0x53c   :  { %v4625_v21 = vpop.f32.mrb[61].mxu1  ;;  %v2622_v38 = vld [vmem:[%s6713_s8 + $0x130] sm:$0xff] }
 0x53d   :  { %v2500_v27 = vmul.f32 0.010204081, %v4591_v12  ;;  %v4626_v31 = vadd.f32 %v4625_v21, %v4624_v59  ;;  %v4422_v12 = vcombine.high %v2587_v48, %v2591_v63  ;;  %v2623_v48 = vld [vmem:[%s6713_s8 + $0x138] sm:$0xff] }
 0x53f   :  { %v2502_v17 = vmul.f32 %v2500_v27, %v2500_v27  ;;  %v2501_v23 = vmul.f32 0.010204081, %v4626_v31  ;;  %3481 = vmatprep.subr.bf16.mxu1 %v4422_v12  ;;  %v4454_v12 = vcombine.high %v2619_v44, %v2623_v48 }
 0x541   :  { %v2503_v26 = vsub.f32 %v2501_v23, %v2502_v17 }
 0x543   :  { %v2505_v1 = vadd.f32 1e-05, %v2503_v26 }
 0x545   :  { %4995 = vrsqrt.f32 %v2505_v1 }
 0x54f   :  { %v4996_v53 = vpop.eup %4995 }
 0x550   :  { %v2507_v46 = vmul.f32 %v4996_v53, %v2504_v39  ;;  %v2599_v53 = vld [vmem:[%s6713_s8 + $0x78] sm:$0xff] }
 0x551   :  { %v4430_v56 = vcombine.high %v2595_v43, %v2599_v53  ;;  %v4429_v62 = vcombine.low %v2595_v43, %v2599_v53 }
 0x552   :  { %v2515_v57 = vrot.slane %v2507_v46, %v6226_v45  ;;  %v2509_v58 = vmul.f32 %v2507_v46, %v2500_v27 }
 0x554   :  { %2522 = vrot.lane.b32.xlu1 %v2515_v57, %s5033_s30  ;;  %2516 = vrot.lane.b32.xlu0 %v2515_v57, %s5034_s15  ;;  %v2510_v22 = vsub.f32 %v2508_v54, %v2509_v58  ;;  %v2602_v54 = vld [vmem:[%s6713_s8 + $0x90] sm:$0xff]  ;;  %v2603_v58 = vld [vmem:[%s6713_s8 + $0x98] sm:$0xff] }
 0x555   :  { %v4438_v2 = vcombine.high %v2603_v58, %v2607_v60  ;;  %v4437_v24 = vcombine.low %v2603_v58, %v2607_v60  ;;  %v2666_v60 = vld [vmem:[%s6713_s8 + $0x290] sm:$0xff] }
 0x556   :  { %v2533_v50 = vrot.slane %v2510_v22, %v6226_v45 }
 0x558   :  { %2519 = vrot.lane.b32.xlu0 %v2515_v57, %s5035_s7  ;;  %2534 = vrot.lane.b32.xlu1 %v2533_v50, %s5034_s15  ;;  %v2606_v57 = vld [vmem:[%s6713_s8 + $0xb0] sm:$0xff] }
 0x559   :  { %v4436_v0 = vcombine.high %v2602_v54, %v2606_v57  ;;  %v4435_v18 = vcombine.low %v2602_v54, %v2606_v57  ;;  %v2663_v54 = vld [vmem:[%s6713_s8 + $0x278] sm:$0xff] }
 0x55c   :  { %2537 = vrot.lane.b32.xlu0 %v2533_v50, %s5035_s7  ;;  %2540 = vrot.lane.b32.xlu1 %v2533_v50, %s5033_s30 }
 0x5c6   :  { %v2523_v59 = vpop.permute.xlu1 %2522  ;;  %v2517_v21 = vpop.permute.xlu0 %2516 }
 0x5c7   :  { %v2525_v27 = vsel %vm1948_vm11, %v2507_v46, %v2517_v21  ;;  %v2630_v21 = vld [vmem:[%s6713_s8 + $0x170] sm:$0xff] }
 0x5ca   :  { %v2520_v31 = vpop.permute.xlu0 %2519  ;;  %v2535_v17 = vpop.permute.xlu1 %2534 }
 0x5cb   :  { %v2526_v23 = vsel %vm488_vm2, %v2525_v27, %v2520_v31  ;;  %v2543_v13 = vsel %vm1948_vm11, %v2510_v22, %v2535_v17  ;;  %v2614_v22 = vld [vmem:[%s6713_s8 + $0xf0] sm:$0xff]  ;;  %v2627_v27 = vld [vmem:[%s6713_s8 + $0x158] sm:$0xff]  ;;  %v4451_v17 = vcombine.low %v2618_v11, %v2622_v38 }
 0x5cc   :  { %v2528_v26 = vsel %vm2527_vm12, %v2526_v23, %v2523_v59  ;;  %v4444_v50 = vcombine.high %v2610_v3, %v2614_v22  ;;  %v4443_v63 = vcombine.low %v2610_v3, %v2614_v22  ;;  %v2626_v59 = vld [vmem:[%s6713_s8 + $0x150] sm:$0xff]  ;;  %v2631_v31 = vld [vmem:[%s6713_s8 + $0x178] sm:$0xff]  ;;  %v4453_v23 = vcombine.low %v2619_v44, %v2623_v48 }
 0x5cd   :  { %v2549_v1 = vrot.slane %v2528_v26, %v6226_v45  ;;  %v4460_v26 = vcombine.high %v2626_v59, %v2630_v21  ;;  %v2682_v48 = vld [vmem:[%s6713_s8 + $0x310] sm:$0xff] }
 0x5ce   :  { %v2538_v15 = vpop.permute.xlu0 %2537  ;;  %v2541_v16 = vpop.permute.xlu1 %2540 }
 0x5cf   :  { %v2544_v19 = vsel %vm488_vm2, %v2543_v13, %v2538_v15  ;;  %v2550_v28 = vmul.f32 %v2549_v1, %v6035_v32  ;;  %v2551_v5 = vmul.f32 %v2549_v1, %v6037_v4  ;;  %v2552_v20 = vmul.f32 %v2549_v1, %v6039_v7  ;;  %v2594_v32 = vld [vmem:[%s6713_s8 + $0x50] sm:$0xff] }
 0x5d0   :  { %v2545_v14 = vsel %vm2527_vm12, %v2544_v19, %v2541_v16  ;;  %v2553_v25 = vmul.f32 %v2549_v1, %v6047_v42  ;;  %v4428_v55 = vcombine.high %v2594_v32, %v2598_v41  ;;  %v4427_v61 = vcombine.low %v2594_v32, %v2598_v41  ;;  %v2634_v13 = vld [vmem:[%s6713_s8 + $0x190] sm:$0xff]  ;;  %v2635_v16 = vld [vmem:[%s6713_s8 + $0x198] sm:$0xff] }
 0x5d1   :  { %v2557_v30 = vrot.slane %v2545_v14, %v6226_v45  ;;  %v4462_v1 = vcombine.high %v2627_v27, %v2631_v31  ;;  %v2638_v15 = vld [vmem:[%s6713_s8 + $0x1b0] sm:$0xff]  ;;  %v2639_v19 = vld [vmem:[%s6713_s8 + $0x1b8] sm:$0xff]  ;;  %v4461_v14 = vcombine.low %v2627_v27, %v2631_v31 }
 0x5d2   :  { %v2650_v32 = vld [vmem:[%s6713_s8 + $0x210] sm:$0xff] }
 0x5d3   :  { %v2558_v33 = vadd.f32 %v2557_v30, %v2550_v28  ;;  %v2559_v34 = vadd.f32 %v2557_v30, %v2551_v5  ;;  %v2560_v35 = vadd.f32 %v2557_v30, %v2552_v20  ;;  %v2561_v36 = vadd.f32 %v2557_v30, %v2553_v25  ;;  %v2642_v25 = vld [vmem:[%s6713_s8 + $0x1d0] sm:$0xff] }
 0x5d4   :  { %v4459_v28 = vcombine.low %v2626_v59, %v2630_v21  ;;  %v4468_v5 = vcombine.high %v2634_v13, %v2638_v15  ;;  %v4470_v20 = vcombine.high %v2635_v16, %v2639_v19  ;;  %v2646_v30 = vld [vmem:[%s6713_s8 + $0x1f0] sm:$0xff] }
 0x5d5   :  { %vm2563_vm13 = vcmp.ge.f32.partialorder %v2559_v34, 0.0  ;;  %vm2565_vm14 = vcmp.ge.f32.partialorder %v2561_v36, 0.0  ;;  %v2567_v37 = vmul.f32 0.2, %v2559_v34  ;;  %v2569_v39 = vmul.f32 0.2, %v2561_v36 }
 0x5d6   :  { %vm2562_vm15 = vcmp.ge.f32.partialorder %v2558_v33, 0.0  ;;  %vm2564_vm0 = vcmp.ge.f32.partialorder %v2560_v35, 0.0  ;;  %v2566_v4 = vmul.f32 0.2, %v2558_v33  ;;  %v2568_v7 = vmul.f32 0.2, %v2560_v35 }
 0x5d7   :  { %v2571_v40 = vsel %vm2563_vm13, %v2559_v34, %v2567_v37  ;;  %v2573_v42 = vsel %vm2565_vm14, %v2561_v36, %v2569_v39  ;;  %v2647_v34 = vld [vmem:[%s6713_s8 + $0x1f8] sm:$0xff]  ;;  %v4469_v36 = vcombine.low %v2635_v16, %v2639_v19  ;;  %v4476_v37 = vcombine.high %v2642_v25, %v2646_v30  ;;  %v2690_v31 = vld [vmem:[%s6713_s8 + $0x350] sm:$0xff] }
 0x5d8   :  { %v2583_v46 = vpack.c.bf16 %v2573_v42, %v2571_v40  ;;  %v2570_v47 = vsel %vm2562_vm15, %v2558_v33, %v2566_v4  ;;  %v2572_v51 = vsel %vm2564_vm0, %v2560_v35, %v2568_v7  ;;  %v2643_v33 = vld [vmem:[%s6713_s8 + $0x1d8] sm:$0xff]  ;;  %v4467_v35 = vcombine.low %v2634_v13, %v2638_v15  ;;  %v2654_v4 = vld [vmem:[%s6713_s8 + $0x230] sm:$0xff] }
 0x5d9   :  { %v6303_v52 = vpack.c.bf16 %v2572_v51, %v2570_v47  ;;  %v4478_v39 = vcombine.high %v2643_v33, %v2647_v34  ;;  %v2651_v7 = vld [vmem:[%s6713_s8 + $0x218] sm:$0xff]  ;;  %v4475_v42 = vcombine.low %v2642_v25, %v2646_v30  ;;  %v4477_v41 = vcombine.low %v2643_v33, %v2647_v34  ;;  %v2662_v47 = vld [vmem:[%s6713_s8 + $0x270] sm:$0xff] }
 0x5da   :  { %3384 = vmatprep.mubr.bf16.mxu0 %v2583_v46  ;;  %3427 = vmatprep.mubr.bf16.mxu1 %v2583_v46  ;;  %v2655_v40 = vld [vmem:[%s6713_s8 + $0x238] sm:$0xff]  ;;  %v4484_v43 = vcombine.high %v2650_v32, %v2654_v4  ;;  %v2698_v19 = vld [vmem:[%s6713_s8 + $0x390] sm:$0xff] }
 0x5db   :  { %3385 = vmatmul.mubr.bf16.vlgmr.msra.gmra.mrb[52].mxu0 %v6303_v52  ;;  %3428 = vmatmul.mubr.bf16.vlgmr.msra.gmra.mrb[64].mxu1 %v6303_v52  ;;  %v4486_v53 = vcombine.high %v2651_v7, %v2655_v40  ;;  %v2659_v51 = vld [vmem:[%s6713_s8 + $0x258] sm:$0xff]  ;;  %v2706_v34 = vld [vmem:[%s6713_s8 + $0x3d0] sm:$0xff] }
 0x5dc   :  { %3439 = vmatpush1.bf16.msra.mxu0 %v4419_v6  ;;  %3482 = vmatpush1.bf16.msra.mxu1 %v4421_v9  ;;  %v4445_v6 = vcombine.low %v2611_v29, %v2615_v8  ;;  %v4452_v9 = vcombine.high %v2618_v11, %v2622_v38  ;;  %v4494_v58 = vcombine.high %v2659_v51, %v2663_v54  ;;  %v2674_v8 = vld [vmem:[%s6713_s8 + $0x2d0] sm:$0xff] }
 0x5dd   :  { %3470 = vmatprep.mubr.bf16.mxu0 %v2583_v46  ;;  %3513 = vmatprep.mubr.bf16.mxu1 %v2583_v46  ;;  %v2658_v46 = vld [vmem:[%s6713_s8 + $0x250] sm:$0xff]  ;;  %v4493_v3 = vcombine.low %v2659_v51, %v2663_v54  ;;  %v3909_v51 = vld [vmem:[%s6717_s12 + $0x98] sm:$0xff] }
 0x5de   :  { %3440 = vmatprep.subr.bf16.mxu0 %v4428_v55  ;;  %3483 = vmatprep.subr.bf16.mxu1 %v4430_v56  ;;  %v4483_v55 = vcombine.low %v2650_v32, %v2654_v4  ;;  %v4485_v56 = vcombine.low %v2651_v7, %v2655_v40  ;;  %v4492_v57 = vcombine.high %v2658_v46, %v2662_v47 }
 0x5e0   :  { %3441 = vmatpush1.bf16.msra.mxu0 %v4427_v61  ;;  %3484 = vmatpush1.bf16.msra.mxu1 %v4429_v62  ;;  %v2670_v61 = vld [vmem:[%s6713_s8 + $0x2b0] sm:$0xff]  ;;  %v2667_v62 = vld [vmem:[%s6713_s8 + $0x298] sm:$0xff] }
 0x5e1   :  { %3442 = vmatprep.subr.bf16.mxu0 %v4436_v0  ;;  %3485 = vmatprep.subr.bf16.mxu1 %v4438_v2  ;;  %v2671_v0 = vld [vmem:[%s6713_s8 + $0x2b8] sm:$0xff]  ;;  %v4491_v2 = vcombine.low %v2658_v46, %v2662_v47  ;;  %v4500_v22 = vcombine.high %v2666_v60, %v2670_v61  ;;  %v3908_v47 = vld [vmem:[%s6717_s12 + $0x90] sm:$0xff] }
 0x5e2   :  { %v4502_v29 = vcombine.high %v2667_v62, %v2671_v0  ;;  %v4501_v11 = vcombine.low %v2667_v62, %v2671_v0  ;;  %v3894_v0 = vld [vmem:[%s6717_s12 + $0x20] sm:$0xff] }
 0x5e4   :  { %3443 = vmatpush1.bf16.msra.mxu0 %v4435_v18  ;;  %3486 = vmatpush1.bf16.msra.mxu1 %v4437_v24  ;;  %v2678_v18 = vld [vmem:[%s6713_s8 + $0x2f0] sm:$0xff]  ;;  %v2675_v24 = vld [vmem:[%s6713_s8 + $0x2d8] sm:$0xff] }
 0x5e5   :  { %3444 = vmatprep.subr.bf16.mxu0 %v4444_v50  ;;  %3487 = vmatprep.subr.bf16.mxu1 %v4446_v10  ;;  %v2679_v50 = vld [vmem:[%s6713_s8 + $0x2f8] sm:$0xff]  ;;  %v4499_v10 = vcombine.low %v2666_v60, %v2670_v61  ;;  %v4508_v38 = vcombine.high %v2674_v8, %v2678_v18  ;;  %v3911_v60 = vld [vmem:[%s6717_s12 + $0xa8] sm:$0xff] }
 0x5e6   :  { %v4510_v44 = vcombine.high %v2675_v24, %v2679_v50  ;;  %v4509_v59 = vcombine.low %v2675_v24, %v2679_v50 }
 0x5e8   :  { %3445 = vmatpush1.bf16.msra.mxu0 %v4443_v63  ;;  %3488 = vmatpush1.bf16.msra.mxu1 %v4445_v6  ;;  %v2686_v63 = vld [vmem:[%s6713_s8 + $0x330] sm:$0xff]  ;;  %v2683_v6 = vld [vmem:[%s6713_s8 + $0x318] sm:$0xff] }
 0x5e9   :  { %3446 = vmatprep.subr.bf16.mxu0 %v4452_v9  ;;  %3489 = vmatprep.subr.bf16.mxu1 %v4454_v12  ;;  %v2687_v9 = vld [vmem:[%s6713_s8 + $0x338] sm:$0xff]  ;;  %v4507_v12 = vcombine.low %v2674_v8, %v2678_v18  ;;  %v4516_v21 = vcombine.high %v2682_v48, %v2686_v63 }
 0x5ea   :  { %v4518_v27 = vcombine.high %v2683_v6, %v2687_v9  ;;  %v4517_v13 = vcombine.low %v2683_v6, %v2687_v9  ;;  %v4543_v6 = vld [vmem:[%s6714_s9 + $0x10] sm:$0xff]  ;;  %v4544_v9 = vld [vmem:[%s6714_s9 + $0x18] sm:$0xff] }
 0x5ec   :  { %3447 = vmatpush1.bf16.msra.mxu0 %v4451_v17  ;;  %3490 = vmatpush1.bf16.msra.mxu1 %v4453_v23  ;;  %v2694_v17 = vld [vmem:[%s6713_s8 + $0x370] sm:$0xff]  ;;  %v2691_v23 = vld [vmem:[%s6713_s8 + $0x358] sm:$0xff] }
 0x5ed   :  { %3448 = vmatprep.subr.bf16.mxu0 %v4460_v26  ;;  %3491 = vmatprep.subr.bf16.mxu1 %v4462_v1  ;;  %v2695_v26 = vld [vmem:[%s6713_s8 + $0x378] sm:$0xff]  ;;  %v4515_v1 = vcombine.low %v2682_v48, %v2686_v63  ;;  %v4524_v15 = vcombine.high %v2690_v31, %v2694_v17 }
 0x5ee   :  { %v4526_v16 = vcombine.high %v2691_v23, %v2695_v26  ;;  %v4525_v25 = vcombine.low %v2691_v23, %v2695_v26 }
 0x5f0   :  { %3449 = vmatpush1.bf16.msra.mxu0 %v4459_v28  ;;  %3492 = vmatpush1.bf16.msra.mxu1 %v4461_v14  ;;  %v2702_v28 = vld [vmem:[%s6713_s8 + $0x3b0] sm:$0xff]  ;;  %v2699_v14 = vld [vmem:[%s6713_s8 + $0x398] sm:$0xff] }
 0x5f1   :  { %3450 = vmatprep.subr.bf16.mxu0 %v4468_v5  ;;  %3493 = vmatprep.subr.bf16.mxu1 %v4470_v20  ;;  %v2703_v5 = vld [vmem:[%s6713_s8 + $0x3b8] sm:$0xff]  ;;  %v4523_v20 = vcombine.low %v2690_v31, %v2694_v17  ;;  %v4532_v30 = vcombine.high %v2698_v19, %v2702_v28 }
 0x5f2   :  { %v4534_v33 = vcombine.high %v2699_v14, %v2703_v5  ;;  %v4533_v32 = vcombine.low %v2699_v14, %v2703_v5  ;;  %v4549_v14 = vld [vmem:[%s6714_s9 + $0x20] sm:$0xff]  ;;  %v4550_v5 = vld [vmem:[%s6714_s9 + $0x28] sm:$0xff] }
 0x5f4   :  { %3451 = vmatpush1.bf16.msra.mxu0 %v4467_v35  ;;  %3494 = vmatpush1.bf16.msra.mxu1 %v4469_v36  ;;  %v2710_v35 = vld [vmem:[%s6713_s8 + $0x3f0] sm:$0xff]  ;;  %v2707_v36 = vld [vmem:[%s6713_s8 + $0x3d8] sm:$0xff] }
 0x5f5   :  { %3452 = vmatprep.subr.bf16.mxu0 %v4476_v37  ;;  %3495 = vmatprep.subr.bf16.mxu1 %v4478_v39  ;;  %v2711_v37 = vld [vmem:[%s6713_s8 + $0x3f8] sm:$0xff]  ;;  %v4531_v39 = vcombine.low %v2698_v19, %v2702_v28  ;;  %v4540_v4 = vcombine.high %v2706_v34, %v2710_v35  ;;  %v4539_v40 = vcombine.low %v2706_v34, %v2710_v35  ;;  %v3896_v34 = vld [vmem:[%s6717_s12 + $0x30] sm:$0xff] }
 0x5f6   :  { %v4542_v7 = vcombine.high %v2707_v36, %v2711_v37  ;;  %v3897_v35 = vld [vmem:[%s6717_s12 + $0x38] sm:$0xff] }
 0x5f8   :  { %3453 = vmatpush1.bf16.msra.mxu0 %v4475_v42  ;;  %3496 = vmatpush1.bf16.msra.mxu1 %v4477_v41  ;;  %v4541_v42 = vcombine.low %v2707_v36, %v2711_v37  ;;  %v3906_v41 = vld [vmem:[%s6717_s12 + $0x80] sm:$0xff]  ;;  %v4887_v36 = vpack.c.bf16 %v3897_v35, %v3896_v34 }
 0x5f9   :  { %3454 = vmatprep.subr.bf16.mxu0 %v4484_v43  ;;  %3497 = vmatprep.subr.bf16.mxu1 %v4486_v53  ;;  %v3907_v43 = vld [vmem:[%s6717_s12 + $0x88] sm:$0xff]  ;;  %v3890_v53 = vld [vmem:[%s6717_s12] sm:$0xff] }
 0x5fa   :  { %v6487_v46 = vpack.c.bf16 %v3907_v43, %v3906_v41  ;;  %v3914_v37 = vld [vmem:[%s6717_s12 + $0xc0] sm:$0xff]  ;;  %v3917_v41 = vld [vmem:[%s6717_s12 + $0xd8] sm:$0xff] }
 0x5fc   :  { %3455 = vmatpush1.bf16.msra.mxu0 %v4483_v55  ;;  %3498 = vmatpush1.bf16.msra.mxu1 %v4485_v56  ;;  %v6500_v55 = vpack.c.bf16 %v3909_v51, %v3908_v47  ;;  %v3892_v56 = vld [vmem:[%s6717_s12 + $0x10] sm:$0xff]  ;;  %v3918_v47 = vld [vmem:[%s6717_s12 + $0xe0] sm:$0xff]  ;;  %v3919_v51 = vld [vmem:[%s6717_s12 + $0xe8] sm:$0xff] }
 0x5fd   :  { %3456 = vmatprep.subr.bf16.mxu0 %v4492_v57  ;;  %3499 = vmatprep.subr.bf16.mxu1 %v4494_v58  ;;  %v3893_v57 = vld [vmem:[%s6717_s12 + $0x18] sm:$0xff]  ;;  %v3910_v58 = vld [vmem:[%s6717_s12 + $0xa0] sm:$0xff] }
 0x5fe   :  { %v6516_v61 = vpack.c.bf16 %v3893_v57, %v3892_v56  ;;  %v6519_v62 = vpack.c.bf16 %v3911_v60, %v3910_v58  ;;  %v3903_v56 = vld [vmem:[%s6717_s12 + $0x68] sm:$0xff]  ;;  %v3920_v58 = vld [vmem:[%s6717_s12 + $0xf0] sm:$0xff]  ;;  %v3921_v60 = vld [vmem:[%s6717_s12 + $0xf8] sm:$0xff] }
 0x600   :  { %3457 = vmatpush1.bf16.msra.mxu0 %v4491_v2  ;;  %3500 = vmatpush1.bf16.msra.mxu1 %v4493_v3  ;;  %v3895_v2 = vld [vmem:[%s6717_s12 + $0x28] sm:$0xff] }
 0x601   :  { %3458 = vmatprep.subr.bf16.mxu0 %v4500_v22  ;;  %3501 = vmatprep.subr.bf16.mxu1 %v4502_v29  ;;  %v6528_v3 = vpack.c.bf16 %v3895_v2, %v3894_v0  ;;  %v3905_v0 = vld [vmem:[%s6717_s12 + $0x78] sm:$0xff] }
 0x604   :  { %3459 = vmatpush1.bf16.msra.mxu0 %v4499_v10  ;;  %3502 = vmatpush1.bf16.msra.mxu1 %v4501_v11 }
 0x605   :  { %3460 = vmatprep.subr.bf16.mxu0 %v4508_v38  ;;  %3503 = vmatprep.subr.bf16.mxu1 %v4510_v44 }
 0x608   :  { %3461 = vmatpush1.bf16.msra.mxu0 %v4507_v12  ;;  %3504 = vmatpush1.bf16.msra.mxu1 %v4509_v59  ;;  %v3524_v12 = vld [vmem:[%s6714_s9] sm:$0xff]  ;;  %v3525_v59 = vld [vmem:[%s6714_s9 + $0x8] sm:$0xff] }
 0x609   :  { %3462 = vmatprep.subr.bf16.mxu0 %v4516_v21  ;;  %3505 = vmatprep.subr.bf16.mxu1 %v4518_v27 }
 0x60c   :  { %3463 = vmatpush1.bf16.msra.mxu0 %v4515_v1  ;;  %3506 = vmatpush1.bf16.msra.mxu1 %v4517_v13 }
 0x60d   :  { %3464 = vmatprep.subr.bf16.mxu0 %v4524_v15  ;;  %3507 = vmatprep.subr.bf16.mxu1 %v4526_v16 }
 0x610   :  { %3465 = vmatpush1.bf16.msra.mxu0 %v4523_v20  ;;  %3508 = vmatpush1.bf16.msra.mxu1 %v4525_v25  ;;  %v4553_v20 = vld [vmem:[%s6714_s9 + $0x30] sm:$0xff]  ;;  %v4554_v25 = vld [vmem:[%s6714_s9 + $0x38] sm:$0xff] }
 0x611   :  { %3466 = vmatprep.subr.bf16.mxu0 %v4532_v30  ;;  %3509 = vmatprep.subr.bf16.mxu1 %v4534_v33  ;;  %v3913_v30 = vld [vmem:[%s6717_s12 + $0xb8] sm:$0xff] }
 0x614   :  { %3467 = vmatpush1.bf16.msra.mxu0 %v4531_v39  ;;  %3510 = vmatpush1.bf16.msra.mxu1 %v4533_v32  ;;  %v3915_v39 = vld [vmem:[%s6717_s12 + $0xc8] sm:$0xff] }
 0x615   :  { %3468 = vmatprep.subr.bf16.mxu0 %v4540_v4  ;;  %3511 = vmatprep.subr.bf16.mxu1 %v4542_v7  ;;  %v4889_v32 = vpack.c.bf16 %v3915_v39, %v3914_v37  ;;  %v3898_v4 = vld [vmem:[%s6717_s12 + $0x40] sm:$0xff]  ;;  %v3899_v7 = vld [vmem:[%s6717_s12 + $0x48] sm:$0xff] }
 0x618   :  { %3469 = vmatpush1.bf16.msra.mxu0 %v4539_v40  ;;  %3512 = vmatpush1.bf16.msra.mxu1 %v4541_v42  ;;  %v4891_v40 = vpack.c.bf16 %v3899_v7, %v3898_v4  ;;  %v3916_v42 = vld [vmem:[%s6717_s12 + $0xd0] sm:$0xff] }
 0x619   :  { %4874 = vmatprep.subr.bf16.mxu1 %v6487_v46  ;;  %v4893_v43 = vpack.c.bf16 %v3917_v41, %v3916_v42 }
 0x61b   :  { %3471 = vmatmul.mubr.bf16.vlgmr.msra.gmra.mrb[56].mxu0 %v6303_v52  ;;  %3514 = vmatmul.mubr.bf16.vlgmr.msra.gmra.mrb[68].mxu1 %v6303_v52  ;;  %v3891_v52 = vld [vmem:[%s6717_s12 + $0x8] sm:$0xff] }
 0x61c   :  { %3600 = vmatprep.mubr.f32.mxu0 %v5032_v49  ;;  %v6498_v54 = vpack.c.bf16 %v3891_v52, %v3890_v53  ;;  %v3900_v53 = vld [vmem:[%s6717_s12 + $0x50] sm:$0xff] }
 0x61e   :  { %4876 = vmatpush3.bf16.msra.mxu1 %v6498_v54 }
 0x61f   :  { %4878 = vmatprep.subr.bf16.mxu1 %v6500_v55 }
 0x622   :  { %4880 = vmatpush3.bf16.msra.mxu1 %v6516_v61 }
 0x623   :  { %4882 = vmatprep.subr.bf16.mxu1 %v6519_v62 }
 0x626   :  { %4884 = vmatpush3.bf16.msra.mxu1 %v6528_v3 }
 0x6ae   :  { %v3386_v22 = vpop.f32.mrb[52].mxu0  ;;  %v3429_v29 = vpop.f32.mrb[64].mxu1 }
 0x6af   :  { %v3388_v8 = vpop.f32.mrb[53].mxu0  ;;  %v3431_v18 = vpop.f32.mrb[65].mxu1 }
 0x6b0   :  { %v3390_v24 = vpop.f32.mrb[54].mxu0  ;;  %v3433_v50 = vpop.f32.mrb[66].mxu1 }
 0x6b1   :  { %v4863_v10 = vpack.c.bf16 %v3390_v24, %v3386_v22  ;;  %v4859_v11 = vpack.c.bf16 %v3433_v50, %v3429_v29  ;;  %v3392_v38 = vpop.f32.mrb[55].mxu0  ;;  %v3435_v44 = vpop.f32.mrb[67].mxu1 }
 0x6b2   :  { %v4861_v48 = vpack.c.bf16 %v3392_v38, %v3388_v8  ;;  %v4857_v63 = vpack.c.bf16 %v3435_v44, %v3431_v18 }
 0x6b4   :  { %4858 = vmatprep.subr.bf16.mxu0 %v4857_v63 }
 0x6b5   :  { %4860 = vmatpush1.bf16.msra.mxu0 %v4859_v11 }
 0x6b6   :  { %4862 = vmatprep.subr.bf16.mxu0 %v4861_v48 }
 0x6b8   :  { %4545 = vmatmul.mubr.msk.f32.vlgmr.msra.gmra.mrb[50].mxu0 %vm3529_vm1, %v4543_v6 }
 0x6b9   :  { %4864 = vmatpush1.bf16.msra.mxu0 %v4863_v10  ;;  %3606 = vmatprep.mubr.f32.mxu0 %v5032_v49 }
 0x6bc   :  { %4546 = vmatmul.mubr.msk.f32.gmra.mrb[60].mxu0 %vm3529_vm1, %v4544_v9 }
 0x6bd   :  { %3683 = vmatprep.mubr.f32.mxu0 %v5032_v49 }
 0x6c0   :  { %4547 = vmatmul.mubr.msk.f32.vlgmr.msra.gmra.mrb[50].mxu0 %vm3529_vm1, %v3524_v12 }
 0x6c1   :  { %3689 = vmatprep.mubr.f32.mxu0 %v5032_v49 }
 0x6c4   :  { %4548 = vmatmul.mubr.msk.f32.gmra.mrb[60].mxu0 %vm3529_vm1, %v3525_v59 }
 0x6c5   :  { %3769 = vmatprep.mubr.f32.mxu0 %v5032_v49 }
 0x6ee   :  { %v3472_v21 = vpop.f32.mrb[56].mxu0  ;;  %v3515_v27 = vpop.f32.mrb[68].mxu1 }
 0x6ef   :  { %v3474_v31 = vpop.f32.mrb[57].mxu0  ;;  %v3517_v17 = vpop.f32.mrb[69].mxu1 }
 0x6f0   :  { %v3476_v23 = vpop.f32.mrb[58].mxu0  ;;  %v3519_v26 = vpop.f32.mrb[70].mxu1 }
 0x6f1   :  { %v4867_v1 = vpack.c.bf16 %v3476_v23, %v3472_v21  ;;  %v4871_v13 = vpack.c.bf16 %v3519_v26, %v3515_v27  ;;  %v3478_v15 = vpop.f32.mrb[59].mxu0  ;;  %v3521_v16 = vpop.f32.mrb[71].mxu1 }
 0x6f2   :  { %v4865_v19 = vpack.c.bf16 %v3478_v15, %v3474_v31  ;;  %v4869_v28 = vpack.c.bf16 %v3521_v16, %v3517_v17 }
 0x6f4   :  { %4866 = vmatprep.subr.bf16.mxu0 %v4865_v19 }
 0x6f5   :  { %4868 = vmatpush1.bf16.msra.mxu0 %v4867_v1 }
 0x6f6   :  { %4870 = vmatprep.subr.bf16.mxu0 %v4869_v28 }
 0x6f8   :  { %4551 = vmatmul.mubr.msk.f32.vlgmr.msra.gmra.mrb[50].mxu0 %vm3529_vm1, %v4549_v14 }
 0x6f9   :  { %4872 = vmatpush1.bf16.msra.mxu0 %v4871_v13  ;;  %3775 = vmatprep.mubr.f32.mxu0 %v5032_v49 }
 0x6fa   :  { %4906 = vmatprep.subr.bf16.mxu0 %v6487_v46  ;;  %v3901_v46 = vld [vmem:[%s6717_s12 + $0x58] sm:$0xff] }
 0x6fb   :  { %v4895_v52 = vpack.c.bf16 %v3901_v46, %v3900_v53 }
 0x6fc   :  { %4552 = vmatmul.mubr.msk.f32.gmra.mrb[60].mxu0 %vm3529_vm1, %v4550_v5 }
 0x6fd   :  { %3859 = vmatprep.mubr.f32.mxu0 %v5032_v49 }
 0x700   :  { %4555 = vmatmul.mubr.msk.f32.vlgmr.msra.gmra.mrb[50].mxu0 %vm3529_vm1, %v4553_v20 }
 0x701   :  { %3865 = vmatprep.mubr.f32.mxu0 %v5032_v49  ;;  %4908 = vmatpush3.bf16.msra.mxu0 %v6498_v54  ;;  %v3912_v49 = vld [vmem:[%s6717_s12 + $0xb0] sm:$0xff]  ;;  %v4897_v54 = vpack.c.bf16 %v3919_v51, %v3918_v47 }
 0x702   :  { %4910 = vmatprep.subr.bf16.mxu0 %v6500_v55  ;;  %v4885_v33 = vpack.c.bf16 %v3913_v30, %v3912_v49  ;;  %v3902_v55 = vld [vmem:[%s6717_s12 + $0x60] sm:$0xff] }
 0x703   :  { %v4899_v57 = vpack.c.bf16 %v3903_v56, %v3902_v55 }
 0x704   :  { %4556 = vmatmul.mubr.msk.f32.gmra.mrb[60].mxu0 %vm3529_vm1, %v4554_v25  ;;  %4886 = vmatprep.subr.bf16.mxu1 %v4885_v33 }
 0x705   :  { %4912 = vmatpush3.bf16.msra.mxu0 %v6516_v61  ;;  %4888 = vmatpush3.bf16.msra.mxu1 %v4887_v36  ;;  %v4901_v61 = vpack.c.bf16 %v3921_v60, %v3920_v58 }
 0x706   :  { %4914 = vmatprep.subr.bf16.mxu0 %v6519_v62  ;;  %4890 = vmatprep.subr.bf16.mxu1 %v4889_v32  ;;  %v3904_v62 = vld [vmem:[%s6717_s12 + $0x70] sm:$0xff] }
 0x707   :  { %v4903_v2 = vpack.c.bf16 %v3905_v0, %v3904_v62 }
 0x709   :  { %4916 = vmatpush3.bf16.msra.mxu0 %v6528_v3  ;;  %4892 = vmatpush3.bf16.msra.mxu1 %v4891_v40 }
 0x70a   :  { %4918 = vmatprep.subr.bf16.mxu0 %v4885_v33  ;;  %4894 = vmatprep.subr.bf16.mxu1 %v4893_v43 }
 0x70d   :  { %4920 = vmatpush3.bf16.msra.mxu0 %v4887_v36  ;;  %4896 = vmatpush3.bf16.msra.mxu1 %v4895_v52 }
 0x70e   :  { %4922 = vmatprep.subr.bf16.mxu0 %v4889_v32  ;;  %4898 = vmatprep.subr.bf16.mxu1 %v4897_v54 }
 0x711   :  { %4924 = vmatpush3.bf16.msra.mxu0 %v4891_v40  ;;  %4900 = vmatpush3.bf16.msra.mxu1 %v4899_v57 }
 0x712   :  { %4926 = vmatprep.subr.bf16.mxu0 %v4893_v43  ;;  %4902 = vmatprep.subr.bf16.mxu1 %v4901_v61  ;;  %v4085_v43 = vld [vmem:[%s6715_s10] sm:$0x1] }
 0x715   :  { %4928 = vmatpush3.bf16.msra.mxu0 %v4895_v52  ;;  %4904 = vmatpush3.bf16.msra.mxu1 %v4903_v2  ;;  %v4089_v52 = vld [vmem:[%s6716_s11] sm:$0x1] }
 0x716   :  { %4930 = vmatprep.subr.bf16.mxu0 %v4897_v54 }
 0x719   :  { %4932 = vmatpush3.bf16.msra.mxu0 %v4899_v57 }
 0x71a   :  { %4934 = vmatprep.subr.bf16.mxu0 %v4901_v61 }
 0x71d   :  { %4936 = vmatpush3.bf16.msra.mxu0 %v4903_v2 }
 0x7d3   :  { %v6637_v3 = vpop.f32.mrb[50].mxu0 }
 0x7d4   :  { %v6639_v22 = vpop.f32.mrb[51].mxu0  ;;  %v3992_v8 = vmul.f32 %v6637_v3, %v6637_v3 }
 0x7d5   :  { %v3993_v10 = vmul.f32 %v6639_v22, %v6639_v22 }
 0x7d7   :  { %v6641_v29 = vpop.f32.mrb[60].mxu0 }
 0x7d8   :  { %v3876_v18 = vadd.f32 %v6641_v29, %v6637_v3  ;;  %v3994_v24 = vmul.f32 %v6641_v29, %v6641_v29  ;;  %v6649_v50 = vpop.f32.mrb[61].mxu0 }
 0x7d9   :  { %v3883_v11 = vadd.f32 %v6649_v50, %v6639_v22  ;;  %v3995_v38 = vmul.f32 %v6649_v50, %v6649_v50 }
 0x7da   :  { %v3877_v44 = vrot.slane %v3876_v18, 4  ;;  %v3996_v48 = vadd.f32 %v3994_v24, %v3992_v8 }
 0x7db   :  { %v3884_v63 = vrot.slane %v3883_v11, 4  ;;  %v4003_v6 = vadd.f32 %v3995_v38, %v3993_v10 }
 0x7dc   :  { %v3878_v9 = vadd.f32 %v3877_v44, %v3876_v18  ;;  %v3997_v12 = vrot.slane %v3996_v48, 4 }
 0x7dd   :  { %v3885_v59 = vadd.f32 %v3884_v63, %v3883_v11  ;;  %v4004_v21 = vrot.slane %v4003_v6, 4  ;;  %v4148_v11 = vld [vmem:[%s6718_s13 + $0x10] sm:$0xff] }
 0x7de   :  { %v3879_v27 = vrot.slane %v3878_v9, 2  ;;  %v3998_v31 = vadd.f32 %v3997_v12, %v3996_v48 }
 0x7df   :  { %v3886_v17 = vrot.slane %v3885_v59, 2  ;;  %v4005_v23 = vadd.f32 %v4004_v21, %v4003_v6 }
 0x7e0   :  { %v3880_v26 = vadd.f32 %v3879_v27, %v3878_v9  ;;  %v3999_v1 = vrot.slane %v3998_v31, 2 }
 0x7e1   :  { %v3887_v13 = vadd.f32 %v3886_v17, %v3885_v59  ;;  %v4006_v15 = vrot.slane %v4005_v23, 2 }
 0x7e2   :  { %v4000_v16 = vadd.f32 %v3999_v1, %v3998_v31  ;;  %v3881_v19 = vrot.slane %v3880_v26, 1 }
 0x7e3   :  { %v3888_v28 = vrot.slane %v3887_v13, 1  ;;  %v4007_v14 = vadd.f32 %v4006_v15, %v4005_v23 }
 0x7e4   :  { %v4001_v5 = vrot.slane %v4000_v16, 1  ;;  %v3882_v49 = vadd.f32 %v3881_v19, %v3880_v26 }
 0x7e5   :  { %v3889_v20 = vadd.f32 %v3888_v28, %v3887_v13  ;;  %v4008_v25 = vrot.slane %v4007_v14, 1 }
 0x7e6   :  { %v4002_v33 = vadd.f32 %v4001_v5, %v4000_v16 }
 0x7e7   :  { %3986 = vmatprep.mubr.f32.mxu1 %v3889_v20  ;;  %v4009_v30 = vadd.f32 %v4008_v25, %v4007_v14 }
 0x7e8   :  { %3987 = vmatmul.mubr.f32.vlgmr.msra.gmra.mrb[62].mxu1 %v3882_v49 }
 0x7e9   :  { %4074 = vmatprep.mubr.f32.mxu0 %v4009_v30 }
 0x7ea   :  { %4075 = vmatmul.mubr.f32.vlgmr.msra.gmra.mrb[62].mxu0 %v4002_v33 }
 0x8bb   :  { %v4659_v34 = vpop.f32.mrb[62].mxu1 }
 0x8bc   :  { %v4660_v35 = vpop.f32.mrb[63].mxu1 }
 0x8bd   :  { %v4661_v36 = vadd.f32 %v4660_v35, %v4659_v34  ;;  %v4694_v37 = vpop.f32.mrb[62].mxu0 }
 0x8be   :  { %v4695_v39 = vpop.f32.mrb[63].mxu0 }
 0x8bf   :  { %v4081_v32 = vmul.f32 0.055555556, %v4661_v36  ;;  %v4696_v4 = vadd.f32 %v4695_v39, %v4694_v37 }
 0x8c1   :  { %v4083_v7 = vmul.f32 %v4081_v32, %v4081_v32  ;;  %v4082_v40 = vmul.f32 0.055555556, %v4696_v4 }
 0x8c3   :  { %v4084_v42 = vsub.f32 %v4082_v40, %v4083_v7 }
 0x8c5   :  { %v4086_v41 = vadd.f32 1e-05, %v4084_v42 }
 0x8c7   :  { %4997 = vrsqrt.f32 %v4086_v41 }
 0x8d1   :  { %v4998_v53 = vpop.eup %4997 }
 0x8d2   :  { %v4088_v46 = vmul.f32 %v4998_v53, %v4085_v43 }
 0x8d4   :  { %v4096_v47 = vrot.slane %v4088_v46, %v6226_v45  ;;  %v4090_v51 = vmul.f32 %v4088_v46, %v4081_v32 }
 0x8d6   :  { %4097 = vrot.lane.b32.xlu0 %v4096_v47, %s5035_s7  ;;  %v4091_v54 = vsub.f32 %v4089_v52, %v4090_v51 }
 0x8d8   :  { %v4105_v55 = vrot.slane %v4091_v54, %v6226_v45 }
 0x8da   :  { %4106 = vrot.lane.b32.xlu1 %v4105_v55, %s5035_s7 }
 0x948   :  { %v4098_v56 = vpop.permute.xlu0 %4097 }
 0x949   :  { %v4100_v57 = vsel %vm488_vm2, %v4088_v46, %v4098_v56 }
 0x94a   :  { %v4113_v58 = vrot.slane %v4100_v57, %v6226_v45 }
 0x94c   :  { %v4107_v60 = vpop.permute.xlu1 %4106  ;;  %v4114_v61 = vmul.f32 %v4113_v58, %v6637_v3  ;;  %v4115_v0 = vmul.f32 %v4113_v58, %v6639_v22  ;;  %v4116_v2 = vmul.f32 %v4113_v58, %v6641_v29  ;;  %v4117_v8 = vmul.f32 %v4113_v58, %v6649_v50  ;;  %v4149_v3 = vld [vmem:[%s6718_s13 + $0x18] sm:$0xff]  ;;  %v4146_v22 = vld [vmem:[%s6718_s13] sm:$0xff] }
 0x94d   :  { %v4109_v62 = vsel %vm488_vm2, %v4091_v54, %v4107_v60 }
 0x94e   :  { %v4121_v18 = vrot.slane %v4109_v62, %v6226_v45  ;;  %v4147_v45 = vld [vmem:[%s6718_s13 + $0x8] sm:$0xff]  ;;  %s5036_s13 = smov [#allocation5]  }
 0x94f   :  { %s4201_s19 = sshll.u32 %s5036_s13, 4  ;;  %s4202_s19 = int_to_ptr.vmem [resolvable:$true] %s4201_s19 }
 0x950   :  { %v4124_v24 = vadd.f32 %v4121_v18, %v4116_v2  ;;  %v4125_v10 = vadd.f32 %v4121_v18, %v4117_v8  ;;  %v4122_v38 = vadd.f32 %v4121_v18, %v4114_v61  ;;  %v4123_v44 = vadd.f32 %v4121_v18, %v4115_v0  ;;  %s5007_s20 = scalar_lea.vmem %s4202_s19, 16  ;;  %s5011_s21 = scalar_lea.vmem %s4202_s19, 32 }
 0x951   :  { %p5008_p0 = scmp.ne.s32.totalorder %s4202_s19, %s5007_s20  ;;  %p5012_p1 = scmp.lt.s32.totalorder %s4202_s19, %s4202_s19 }
 0x952   :  { %vm4128_vm2 = vcmp.ge.f32.partialorder %v4124_v24, 0.0  ;;  %vm4129_vm3 = vcmp.ge.f32.partialorder %v4125_v10, 0.0  ;;  %v4132_v29 = vmul.f32 0.2, %v4124_v24  ;;  %v4133_v50 = vmul.f32 0.2, %v4125_v10  ;;  %p5013_p2 = scmp.lt.s32.totalorder %s5011_s21, %s5007_s20 }
 0x953   :  { %vm4126_vm4 = vcmp.ge.f32.partialorder %v4122_v38, 0.0  ;;  %vm4127_vm5 = vcmp.ge.f32.partialorder %v4123_v44, 0.0  ;;  %v4130_v48 = vmul.f32 0.2, %v4122_v38  ;;  %v4131_v63 = vmul.f32 0.2, %v4123_v44 }
 0x954   :  { %v4136_v6 = vsel %vm4128_vm2, %v4124_v24, %v4132_v29  ;;  %v4137_v9 = vsel %vm4129_vm3, %v4125_v10, %v4133_v50  ;;  %p5014_p3 = por %p5013_p2, %p5012_p1 }
 0x955   :  { %v4152_v12 = vmul.f32 %v4148_v11, %v4136_v6  ;;  %v4153_v59 = vmul.f32 %v4149_v3, %v4137_v9  ;;  %v4134_v21 = vsel %vm4126_vm4, %v4122_v38, %v4130_v48  ;;  %v4135_v27 = vsel %vm4127_vm5, %v4123_v44, %v4131_v63 }
 0x956   :  { %v4150_v31 = vmul.f32 %v4146_v22, %v4134_v21  ;;  %v4151_v17 = vmul.f32 %v4147_v45, %v4135_v27  ;;  %p5015_p4 = pnand %p5014_p3, %p5008_p0 }
 0x957   :  { %v4173_v23 = vsel %vm4154_vm6, %v4152_v12, 0.0  ;;  %v4174_v26 = vsel %vm4154_vm6, %v4153_v59, 0.0 }
 0x958   :  { %v4175_v1 = vadd.f32 %v4174_v26, %v4173_v23  ;;  %v4155_v13 = vsel %vm4154_vm6, %v4150_v31, 0.0  ;;  %v4156_v15 = vsel %vm4154_vm6, %v4151_v17, 0.0 }
 0x959   :  { %v4157_v16 = vadd.f32 %v4156_v15, %v4155_v13 }
 0x95a   :  { %4176 = vadd.xlane.f32.xlu1 %v4175_v1 }
 0x95b   :  { %4158 = vadd.xlane.f32.xlu0 %v4157_v16 }
 0x9e7   :  { %v4177_v19 = vpop.xlane.xlu1 %4176 }
 0x9e8   :  { %v4178_v28 = vsel %vm4154_vm6, %v4177_v19, 0.0  ;;  %v4159_v14 = vpop.xlane.xlu0 %4158 }
 0x9e9   :  { %v4179_v5 = vrot.slane %v4178_v28, 4  ;;  %v4160_v20 = vsel %vm4154_vm6, %v4159_v14, 0.0 }
 0x9ea   :  { %v4161_v25 = vrot.slane %v4160_v20, 4 }
 0x9eb   :  { %v4180_v49 = vadd.f32 %v4179_v5, %v4178_v28 }
 0x9ec   :  { %v4162_v30 = vadd.f32 %v4161_v25, %v4160_v20 }
 0x9ed   :  { %v4181_v33 = vrot.slane %v4180_v49, 2 }
 0x9ee   :  { %v4163_v34 = vrot.slane %v4162_v30, 2 }
 0x9ef   :  { %v4182_v35 = vadd.f32 %v4181_v33, %v4180_v49 }
 0x9f0   :  { %v4164_v36 = vadd.f32 %v4163_v34, %v4162_v30 }
 0x9f1   :  { %v4183_v37 = vrot.slane %v4182_v35, 1 }
 0x9f2   :  { %v4165_v39 = vrot.slane %v4164_v36, 1 }
 0x9f3   :  { %v4184_v32 = vadd.f32 %v4183_v37, %v4182_v35 }
 0x9f4   :  { %v4166_v4 = vadd.f32 %v4165_v39, %v4164_v36 }
 0x9f5   :  { %v4185_v7 = vsub.f32 0.0, %v4184_v32 }
 0x9f6   :  { %v4167_v40 = vsub.f32 0.0, %v4166_v4 }
 0x9f7   :  { %v4186_v42 = vmul.f32 1.442695, %v4185_v7 }
 0x9f8   :  { %v4168_v41 = vmul.f32 1.442695, %v4167_v40 }
 0x9f9   :  { %4999 = vpow2.f32 %v4186_v42 }
 0x9fa   :  { %5001 = vpow2.f32 %v4168_v41 }
 0xa03   :  { %v5000_v43 = vpop.eup %4999 }
 0xa04   :  { %v5002_v53 = vpop.eup %5001  ;;  %v4188_v46 = vadd.f32 1.0, %v5000_v43 }
 0xa05   :  { %v4170_v52 = vadd.f32 1.0, %v5002_v53 }
 0xa06   :  { %5003 = vrcp.f32 %v4188_v46 }
 0xa07   :  { %5005 = vrcp.f32 %v4170_v52 }
 0xa10   :  { %v5004_v47 = vpop.eup %5003 }
 0xa11   :  { %v5006_v51 = vpop.eup %5005 }
 0xa12   :  { %v4192_v54 = vsel %vm4191_vm7, %v5006_v51, %v5004_v47 }
 0xa13   :  { %4194 = vst.msk [vmem:[#allocation5] sm:$0x1] %vm4193_vm8, %v4192_v54 }
 0xa14   :  { %5018 = shalt.err (!%p5015_p4)
}
 0xa15   :  { %s5019_s22 = scalar_lea.hbm %s6719_s14, 16 }
 0xa16   :  { %p5020_p5 = scmp.ne.s32.totalorder %s6719_s14, %s5019_s22  ;;  %p5023_p6 = scmp.lt.u32.totalorder %s5019_s22, %s6719_s14 }
 0xa18   :  { %p5025_p7 = pnand %p5023_p6, %p5020_p5 }
 0xa1a   :  { %5028 = shalt.err (!%p5025_p7)
}
 0xa1b   :  { %4204 = dma.vmem_to_hbm [thread:$0]  %s4202_s19, 16, %s6719_s14, [#allocation6]  }
 0xa1c   :  { %5029 = dma.done.wait [#allocation6], 16  }
 0xa1d   :  { %5030 = vsyncadd [#allocation6], 4294967280 }
 0xa1e   :  { %4208 = vsyncpa [#allocation6], 1 }

</bundles_post_ra>
